<compile_context>
chip_gen: v6e
topology: v6e:2x2x1
jax: 0.10.0
libtpu: 0.0.40
codegen_flags: <defaults>
</compile_context>

<pallas_src>
import functools

import jax
import jax.numpy as jnp
from jax.experimental import pallas as pl
from jax.experimental.pallas import tpu as pltpu

# ----- small, module-consistent config (stand-ins for 768/12/2048) -----
B = 16                 # batch (multiple of BATCH_PER_STEP)
BATCH_PER_STEP = 8     # samples packed per grid step  -> 2 "parallel" steps
S_TOKENS = 9           # 1 CLS + 8 patch tokens (stand-in for 197)
D = 32                 # self.dim / self.dim_a (stand-in for 768)
NUM_HEADS = 4          # stand-in for 12 (D % NUM_HEADS == 0)
HEAD_DIM = D // NUM_HEADS
MLP_HIDDEN = int(D * 4.0)   # mlp_ratio = 4.0
C_FEAT = 64            # self.num_features (stand-in for 2048)
HC = WC = 4            # ResNet feature-map spatial
NUM_PLANT = 10
EPS = 1e-6             # partial(nn.LayerNorm, eps=1e-6)

NEG_INF = -1e30


def _gelu(x):
    # TODO(synk): nn.GELU() default is exact erf; tanh approximation used for
    #             Mosaic-safe lowering.
    return jax.nn.gelu(x, approximate=True)


def _layernorm(x, g, b):
    mu = jnp.mean(x, axis=-1, keepdims=True)
    var = jnp.mean((x - mu) ** 2, axis=-1, keepdims=True)
    return (x - mu) * jax.lax.rsqrt(var + EPS) * g + b


def model_sl_kernel(f1_ref, f2_ref,
                    w_mlp_ref, b_mlp_ref,
                    ln1_g_ref, ln1_b_ref,
                    w_qkv_ref, b_qkv_ref,
                    w_proj_ref, b_proj_ref,
                    ln2_g_ref, ln2_b_ref,
                    w_fc1_ref, b_fc1_ref,
                    w_fc2_ref, b_fc2_ref,
                    out_ref,
                    *, bp, sp, s_valid):
    """One grid step: `bp` samples, M = bp*sp token rows (sp % 8 == 0)."""
    m = bp * sp

    f1 = f1_ref[...]                     # (bp, sp, D); rows >= s_valid are zero pad
    cls = f1[:, 0, :]                    # (bp, D) CLS token of every sample

    # self.mlp: avg-pooled ResNet features (bp, C) @ (C, D), then gate by CLS
    f2 = jnp.dot(f2_ref[...], w_mlp_ref[...],
                 preferred_element_type=jnp.float32) + b_mlp_ref[...]
    f2 = cls * f2                        # torch.mul(f1[:, 0], f2)     (bp, D)

    # f3 = cat([f2.unsqueeze(1), f1[:, 1:]], dim=1): replace token 0 of each sample
    tok = jax.lax.broadcasted_iota(jnp.int32, (bp, sp, D), 1)
    x3 = jnp.where(tok == 0, jnp.broadcast_to(f2[:, None, :], (bp, sp, D)), f1)
    x = x3.reshape(m, D)                 # (M, D) residual stream (layout-preserving)

    # ---------- Block: x = x + Attn(LN1(x)) ----------
    xn = _layernorm(x, ln1_g_ref[...], ln1_b_ref[...])
    qkv = jnp.dot(xn, w_qkv_ref[...],
                  preferred_element_type=jnp.float32) + b_qkv_ref[...]   # (M, 3D)
    qkv3 = qkv.reshape(bp, sp, 3 * D)

    # padded key columns masked; padded query rows produce garbage that is never read
    key_valid = jax.lax.broadcasted_iota(jnp.int32, (bp, sp, sp), 2) < s_valid

    heads = []
    for h in range(NUM_HEADS):
        lo = h * HEAD_DIM
        q = qkv3[:, :, lo:lo + HEAD_DIM]                 # scale already folded into w_qkv
        k = qkv3[:, :, D + lo:D + lo + HEAD_DIM]
        v = qkv3[:, :, 2 * D + lo:2 * D + lo + HEAD_DIM]
        s = jnp.einsum('bqd,bkd->bqk', q, k, preferred_element_type=jnp.float32)
        s = jnp.where(key_valid, s, NEG_INF)
        s = s - jnp.max(s, axis=-1, keepdims=True)
        e = jnp.exp(s)
        p = e * pl.reciprocal(jnp.sum(e, axis=-1, keepdims=True), approx=True)
        heads.append(jnp.einsum('bqk,bkd->bqd', p, v,
                                preferred_element_type=jnp.float32))
    attn = jnp.concatenate(heads, axis=-1).reshape(m, D)   # fold heads back to (M, D)

    x = x + jnp.dot(attn, w_proj_ref[...],
                    preferred_element_type=jnp.float32) + b_proj_ref[...]

    # ---------- Block: x = x + MLP(LN2(x)) ----------
    xn = _layernorm(x, ln2_g_ref[...], ln2_b_ref[...])
    h1 = _gelu(jnp.dot(xn, w_fc1_ref[...],
                       preferred_element_type=jnp.float32) + b_fc1_ref[...])
    x = x + jnp.dot(h1, w_fc2_ref[...],
                    preferred_element_type=jnp.float32) + b_fc2_ref[...]

    # head input: f3[:, 0] + f1[:, 0]   (fc_p itself is applied in the wrapper)
    out_ref[...] = x.reshape(bp, sp, D)[:, 0, :] + cls


KERNEL_PARAMS = ["w_mlp", "b_mlp", "ln1_g", "ln1_b", "w_qkv", "b_qkv",
                 "w_proj", "b_proj", "ln2_g", "ln2_b",
                 "w_fc1", "b_fc1", "w_fc2", "b_fc2"]


def model_sl_forward(f1, f2_map, params, batch_per_step=BATCH_PER_STEP):
    b_, s_, d_ = f1.shape
    assert d_ == D and b_ % batch_per_step == 0
    n_steps = b_ // batch_per_step
    s_pad = ((s_ + 7) // 8) * 8          # sublane-aligned token count
    c_ = f2_map.shape[1]

    # AdaptiveAvgPool2d((1,1)) + flatten done in XLA: kernel sees (B, C)
    f2_pool = jnp.mean(f2_map, axis=(2, 3))
    # pad tokens so per-sample row offsets are sublane aligned (keys masked in-kernel)
    f1_pad = jnp.pad(f1, ((0, 0), (0, s_pad - s_), (0, 0)))

    # fold the attention scale into the q-slice of the qkv projection (free, one-time)
    scale = HEAD_DIM ** -0.5
    params = dict(params)
    params["w_qkv"] = params["w_qkv"].at[:, :D].multiply(scale)
    params["b_qkv"] = params["b_qkv"].at[:, :D].multiply(scale)
    weight_args = [params[k] for k in KERNEL_PARAMS]

    def full_spec(a):
        nd = a.ndim
        return pl.BlockSpec(a.shape, lambda i, _nd=nd: (0,) * _nd)

    in_specs = [
        pl.BlockSpec((batch_per_step, s_pad, d_), lambda i: (i, 0, 0)),
        pl.BlockSpec((batch_per_step, c_), lambda i: (i, 0)),
    ] + [full_spec(a) for a in weight_args]

    kernel = functools.partial(model_sl_kernel, bp=batch_per_step, sp=s_pad,
                               s_valid=s_)

    head_in = pl.pallas_call(
        kernel,
        out_shape=jax.ShapeDtypeStruct((b_, d_), jnp.float32),
        grid=(n_steps,),
        in_specs=in_specs,
        out_specs=pl.BlockSpec((batch_per_step, d_), lambda i: (i, 0)),
        compiler_params=pltpu.CompilerParams(
            dimension_semantics=("parallel",),      # shards steps across v7x's 2 TCs
            vmem_limit_bytes=32 * 1024 * 1024,      # keep <= ~48 MiB on v7x at real scale
        ),
    )(f1_pad, f2_pool, *weight_args)

    # fc_p for the whole batch in one matmul (lane-dense, no per-step width-10 stores)
    return jnp.dot(head_in, params["w_p"]) + params["b_p"]


def trunc_normal(key, shape, std=0.02):
    return std * jax.random.truncated_normal(key, -2.0, 2.0, shape, jnp.float32)


def init_params(key):
    ks = jax.random.split(key, 6)
    p = {}
    p["w_mlp"] = trunc_normal(ks[0], (C_FEAT, D))
    p["b_mlp"] = jnp.zeros((1, D), jnp.float32)
    p["ln1_g"] = jnp.ones((1, D), jnp.float32)
    p["ln1_b"] = jnp.zeros((1, D), jnp.float32)
    p["w_qkv"] = trunc_normal(ks[1], (D, 3 * D))
    p["b_qkv"] = jnp.zeros((1, 3 * D), jnp.float32)
    p["w_proj"] = trunc_normal(ks[2], (D, D))
    p["b_proj"] = jnp.zeros((1, D), jnp.float32)
    p["ln2_g"] = jnp.ones((1, D), jnp.float32)
    p["ln2_b"] = jnp.zeros((1, D), jnp.float32)
    p["w_fc1"] = trunc_normal(ks[3], (D, MLP_HIDDEN))
    p["b_fc1"] = jnp.zeros((1, MLP_HIDDEN), jnp.float32)
    p["w_fc2"] = trunc_normal(ks[4], (MLP_HIDDEN, D))
    p["b_fc2"] = jnp.zeros((1, D), jnp.float32)
    p["w_p"] = trunc_normal(ks[5], (D, NUM_PLANT))
    p["b_p"] = jnp.zeros((1, NUM_PLANT), jnp.float32)
    return p


def reference(f1, f2_map, p):
    """Pure-JAX reference of the Model_SL head (unpadded, exact softmax)."""
    b_, s_, d_ = f1.shape
    f2 = jnp.mean(f2_map, axis=(2, 3))                           # avgpool + flatten
    f2 = f2 @ p["w_mlp"] + p["b_mlp"][0]
    cls = f1[:, 0]
    f2 = cls * f2
    x = jnp.concatenate([f2[:, None, :], f1[:, 1:]], axis=1)

    def ln(y, g, b):
        mu = jnp.mean(y, -1, keepdims=True)
        var = jnp.mean((y - mu) ** 2, -1, keepdims=True)
        return (y - mu) * jax.lax.rsqrt(var + EPS) * g + b

    xn = ln(x, p["ln1_g"][0], p["ln1_b"][0])
    qkv = xn @ p["w_qkv"] + p["b_qkv"][0]
    qkv = qkv.reshape(b_, s_, 3, NUM_HEADS, HEAD_DIM)
    q, k, v = qkv[:, :, 0], qkv[:, :, 1], qkv[:, :, 2]
    q = q * (HEAD_DIM ** -0.5)
    a = jnp.einsum('bqhd,bkhd->bhqk', q, k)
    a = jax.nn.softmax(a, axis=-1)
    o = jnp.einsum('bhqk,bkhd->bqhd', a, v).reshape(b_, s_, d_)
    o = o @ p["w_proj"] + p["b_proj"][0]
    x = x + o
    xn = ln(x, p["ln2_g"][0], p["ln2_b"][0])
    h = _gelu(xn @ p["w_fc1"] + p["b_fc1"][0])
    h = h @ p["w_fc2"] + p["b_fc2"][0]
    x = x + h
    head_in = x[:, 0] + cls
    return head_in @ p["w_p"] + p["b_p"][0]


if __name__ == "__main__":
    key = jax.random.PRNGKey(0)
    k1, k2, kp = jax.random.split(key, 3)
    f1 = jax.random.normal(k1, (B, S_TOKENS, D), jnp.float32)         # ViT features
    f2_map = jax.random.normal(k2, (B, C_FEAT, HC, WC), jnp.float32)  # ResNet map (NCHW)
    params = init_params(kp)

    out = jax.block_until_ready(model_sl_forward(f1, f2_map, params))
    ref = reference(f1, f2_map, params)
    assert out.shape == (B, NUM_PLANT), out.shape
    assert jnp.allclose(out, ref, atol=2e-3, rtol=2e-3), (out, ref)
    print("KERNEL_OK")
</pallas_src>

<mosaic_0001>
module attributes {stable_mosaic.version = 11 : i64} {
  func.func @model_sl_kernel(%arg0: i32, %arg1: memref<8x16x32xf32, #tpu.memory_space<vmem>>, %arg2: memref<8x64xf32, #tpu.memory_space<vmem>>, %arg3: memref<64x32xf32, #tpu.memory_space<vmem>>, %arg4: memref<1x32xf32, #tpu.memory_space<vmem>>, %arg5: memref<1x32xf32, #tpu.memory_space<vmem>>, %arg6: memref<1x32xf32, #tpu.memory_space<vmem>>, %arg7: memref<32x96xf32, #tpu.memory_space<vmem>>, %arg8: memref<1x96xf32, #tpu.memory_space<vmem>>, %arg9: memref<32x32xf32, #tpu.memory_space<vmem>>, %arg10: memref<1x32xf32, #tpu.memory_space<vmem>>, %arg11: memref<1x32xf32, #tpu.memory_space<vmem>>, %arg12: memref<1x32xf32, #tpu.memory_space<vmem>>, %arg13: memref<32x128xf32, #tpu.memory_space<vmem>>, %arg14: memref<1x128xf32, #tpu.memory_space<vmem>>, %arg15: memref<128x32xf32, #tpu.memory_space<vmem>>, %arg16: memref<1x32xf32, #tpu.memory_space<vmem>>, %arg17: memref<8x32xf32, #tpu.memory_space<vmem>>) attributes {dimension_semantics = [#tpu.dimension_semantics<parallel>], iteration_bounds = array<i64: 2>, scalar_prefetch = 0 : i64, scratch_operands = 0 : i64, tpu.core_type = #tpu.core_type<tc>, window_params = [{transform_indices = @transform_0, window_bounds = array<i64: 8, 16, 32>}, {transform_indices = @transform_1, window_bounds = array<i64: 8, 64>}, {pipeline_mode = #tpu.pipeline_mode<synchronous>, transform_indices = @transform_2, window_bounds = array<i64: 64, 32>}, {pipeline_mode = #tpu.pipeline_mode<synchronous>, transform_indices = @transform_3, window_bounds = array<i64: 1, 32>}, {pipeline_mode = #tpu.pipeline_mode<synchronous>, transform_indices = @transform_4, window_bounds = array<i64: 1, 32>}, {pipeline_mode = #tpu.pipeline_mode<synchronous>, transform_indices = @transform_5, window_bounds = array<i64: 1, 32>}, {pipeline_mode = #tpu.pipeline_mode<synchronous>, transform_indices = @transform_6, window_bounds = array<i64: 32, 96>}, {pipeline_mode = #tpu.pipeline_mode<synchronous>, transform_indices = @transform_7, window_bounds = array<i64: 1, 96>}, {pipeline_mode = #tpu.pipeline_mode<synchronous>, transform_indices = @transform_8, window_bounds = array<i64: 32, 32>}, {pipeline_mode = #tpu.pipeline_mode<synchronous>, transform_indices = @transform_9, window_bounds = array<i64: 1, 32>}, {pipeline_mode = #tpu.pipeline_mode<synchronous>, transform_indices = @transform_10, window_bounds = array<i64: 1, 32>}, {pipeline_mode = #tpu.pipeline_mode<synchronous>, transform_indices = @transform_11, window_bounds = array<i64: 1, 32>}, {pipeline_mode = #tpu.pipeline_mode<synchronous>, transform_indices = @transform_12, window_bounds = array<i64: 32, 128>}, {pipeline_mode = #tpu.pipeline_mode<synchronous>, transform_indices = @transform_13, window_bounds = array<i64: 1, 128>}, {pipeline_mode = #tpu.pipeline_mode<synchronous>, transform_indices = @transform_14, window_bounds = array<i64: 128, 32>}, {pipeline_mode = #tpu.pipeline_mode<synchronous>, transform_indices = @transform_15, window_bounds = array<i64: 1, 32>}, {transform_indices = @transform_16, window_bounds = array<i64: 8, 32>}]} {
    %c0 = arith.constant 0 : index
    %c0_0 = arith.constant 0 : index
    %c0_1 = arith.constant 0 : index
    %0 = vector.load %arg1[%c0, %c0_0, %c0_1] : memref<8x16x32xf32, #tpu.memory_space<vmem>>, vector<8x16x32xf32>
    %1 = vector.extract_strided_slice %0 {offsets = [0, 0, 0], sizes = [8, 1, 32], strides = [1, 1, 1]} : vector<8x16x32xf32> to vector<8x1x32xf32>
    %2 = vector.shape_cast %1 : vector<8x1x32xf32> to vector<8x32xf32>
    %c0_2 = arith.constant 0 : index
    %c0_3 = arith.constant 0 : index
    %3 = vector.load %arg2[%c0_2, %c0_3] : memref<8x64xf32, #tpu.memory_space<vmem>>, vector<8x64xf32>
    %c0_4 = arith.constant 0 : index
    %c0_5 = arith.constant 0 : index
    %4 = vector.load %arg3[%c0_4, %c0_5] : memref<64x32xf32, #tpu.memory_space<vmem>>, vector<64x32xf32>
    %cst = arith.constant dense<0.000000e+00> : vector<8x32xf32>
    %5 = tpu.matmul %3, %4, %cst {dimension_numbers = #tpu.dot_dimension_numbers<[1], [0], [0], [1], [0, 0, 1, 1], [], []>} : vector<8x64xf32>, vector<64x32xf32>, vector<8x32xf32> -> vector<8x32xf32>
    %c0_6 = arith.constant 0 : index
    %c0_7 = arith.constant 0 : index
    %6 = vector.load %arg4[%c0_6, %c0_7] : memref<1x32xf32, #tpu.memory_space<vmem>>, vector<1x32xf32>
    %7 = vector.broadcast %6 : vector<1x32xf32> to vector<8x32xf32>
    %8 = arith.addf %5, %7 : vector<8x32xf32>
    %9 = arith.mulf %2, %8 : vector<8x32xf32>
    %10 = tpu.iota {dimensions = array<i32: 1>} : vector<8x16x32xi32>
    %c0_i32 = arith.constant 0 : i32
    %11 = vector.broadcast %c0_i32 : i32 to vector<8x16x32xi32>
    %12 = arith.cmpi eq, %10, %11 : vector<8x16x32xi32>
    %13 = vector.shape_cast %9 : vector<8x32xf32> to vector<8x1x32xf32>
    %14 = vector.shape_cast %13 : vector<8x1x32xf32> to vector<8x1x32xf32>
    %15 = vector.broadcast %14 : vector<8x1x32xf32> to vector<8x16x32xf32>
    %16 = arith.select %12, %15, %0 : vector<8x16x32xi1>, vector<8x16x32xf32>
    %17 = vector.shape_cast %16 : vector<8x16x32xf32> to vector<128x32xf32>
    %c0_8 = arith.constant 0 : index
    %c0_9 = arith.constant 0 : index
    %18 = vector.load %arg5[%c0_8, %c0_9] : memref<1x32xf32, #tpu.memory_space<vmem>>, vector<1x32xf32>
    %c0_10 = arith.constant 0 : index
    %c0_11 = arith.constant 0 : index
    %19 = vector.load %arg6[%c0_10, %c0_11] : memref<1x32xf32, #tpu.memory_space<vmem>>, vector<1x32xf32>
    %cst_12 = arith.constant dense<0.000000e+00> : vector<128xf32>
    %20 = vector.multi_reduction <add>, %17, %cst_12 [1] : vector<128x32xf32> to vector<128xf32>
    %21 = vector.shape_cast %20 : vector<128xf32> to vector<128x1xf32>
    %cst_13 = arith.constant 3.200000e+01 : f32
    %22 = vector.broadcast %cst_13 : f32 to vector<128x1xf32>
    %23 = arith.divf %21, %22 : vector<128x1xf32>
    %24 = vector.broadcast %23 : vector<128x1xf32> to vector<128x32xf32>
    %25 = arith.subf %17, %24 : vector<128x32xf32>
    %26 = arith.mulf %25, %25 : vector<128x32xf32>
    %cst_14 = arith.constant dense<0.000000e+00> : vector<128xf32>
    %27 = vector.multi_reduction <add>, %26, %cst_14 [1] : vector<128x32xf32> to vector<128xf32>
    %28 = vector.shape_cast %27 : vector<128xf32> to vector<128x1xf32>
    %cst_15 = arith.constant 3.200000e+01 : f32
    %29 = vector.broadcast %cst_15 : f32 to vector<128x1xf32>
    %30 = arith.divf %28, %29 : vector<128x1xf32>
    %31 = vector.broadcast %23 : vector<128x1xf32> to vector<128x32xf32>
    %32 = arith.subf %17, %31 : vector<128x32xf32>
    %cst_16 = arith.constant 9.99999997E-7 : f32
    %33 = vector.broadcast %cst_16 : f32 to vector<128x1xf32>
    %34 = arith.addf %30, %33 : vector<128x1xf32>
    %35 = math.rsqrt %34 : vector<128x1xf32>
    %36 = vector.broadcast %35 : vector<128x1xf32> to vector<128x32xf32>
    %37 = arith.mulf %32, %36 : vector<128x32xf32>
    %38 = vector.broadcast %18 : vector<1x32xf32> to vector<128x32xf32>
    %39 = arith.mulf %37, %38 : vector<128x32xf32>
    %40 = vector.broadcast %19 : vector<1x32xf32> to vector<128x32xf32>
    %41 = arith.addf %39, %40 : vector<128x32xf32>
    %c0_17 = arith.constant 0 : index
    %c0_18 = arith.constant 0 : index
    %42 = vector.load %arg7[%c0_17, %c0_18] : memref<32x96xf32, #tpu.memory_space<vmem>>, vector<32x96xf32>
    %cst_19 = arith.constant dense<0.000000e+00> : vector<128x96xf32>
    %43 = tpu.matmul %41, %42, %cst_19 {dimension_numbers = #tpu.dot_dimension_numbers<[1], [0], [0], [1], [0, 0, 1, 1], [], []>} : vector<128x32xf32>, vector<32x96xf32>, vector<128x96xf32> -> vector<128x96xf32>
    %c0_20 = arith.constant 0 : index
    %c0_21 = arith.constant 0 : index
    %44 = vector.load %arg8[%c0_20, %c0_21] : memref<1x96xf32, #tpu.memory_space<vmem>>, vector<1x96xf32>
    %45 = vector.broadcast %44 : vector<1x96xf32> to vector<128x96xf32>
    %46 = arith.addf %43, %45 : vector<128x96xf32>
    %47 = vector.shape_cast %46 : vector<128x96xf32> to vector<8x16x96xf32>
    %48 = tpu.iota {dimensions = array<i32: 2>} : vector<8x16x16xi32>
    %c9_i32 = arith.constant 9 : i32
    %49 = vector.broadcast %c9_i32 : i32 to vector<8x16x16xi32>
    %50 = arith.cmpi slt, %48, %49 : vector<8x16x16xi32>
    %51 = vector.extract_strided_slice %47 {offsets = [0, 0, 0], sizes = [8, 16, 8], strides = [1, 1, 1]} : vector<8x16x96xf32> to vector<8x16x8xf32>
    %52 = vector.extract_strided_slice %47 {offsets = [0, 0, 32], sizes = [8, 16, 8], strides = [1, 1, 1]} : vector<8x16x96xf32> to vector<8x16x8xf32>
    %53 = vector.extract_strided_slice %47 {offsets = [0, 0, 64], sizes = [8, 16, 8], strides = [1, 1, 1]} : vector<8x16x96xf32> to vector<8x16x8xf32>
    "tpu.trace_start"() <{level = 10 : i32, message = "bqd,bkd->bqk"}> : () -> ()
    %cst_22 = arith.constant dense<0.000000e+00> : vector<8x16x16xf32>
    %54 = tpu.matmul %51, %52, %cst_22 {dimension_numbers = #tpu.dot_dimension_numbers<[2], [2], [1], [1], [0, 0, 0, 1, 1, 1], [0], [0]>} : vector<8x16x8xf32>, vector<8x16x8xf32>, vector<8x16x16xf32> -> vector<8x16x16xf32>
    %cst_23 = arith.constant -1.000000e+30 : f32
    "tpu.trace_stop"() : () -> ()
    %55 = vector.broadcast %cst_23 : f32 to vector<8x16x16xf32>
    %56 = arith.select %50, %54, %55 : vector<8x16x16xi1>, vector<8x16x16xf32>
    %cst_24 = arith.constant dense<0xFF800000> : vector<8x16xf32>
    %57 = vector.multi_reduction <maximumf>, %56, %cst_24 [2] : vector<8x16x16xf32> to vector<8x16xf32>
    %58 = vector.shape_cast %57 : vector<8x16xf32> to vector<8x16x1xf32>
    %59 = vector.broadcast %58 : vector<8x16x1xf32> to vector<8x16x16xf32>
    %60 = arith.subf %56, %59 : vector<8x16x16xf32>
    %61 = math.exp %60 : vector<8x16x16xf32>
    %cst_25 = arith.constant dense<0.000000e+00> : vector<8x16xf32>
    %62 = vector.multi_reduction <add>, %61, %cst_25 [2] : vector<8x16x16xf32> to vector<8x16xf32>
    %63 = vector.shape_cast %62 : vector<8x16xf32> to vector<8x16x1xf32>
    %64 = tpu.reciprocal %63 {approx = true} : vector<8x16x1xf32> -> vector<8x16x1xf32>
    %65 = vector.broadcast %64 : vector<8x16x1xf32> to vector<8x16x16xf32>
    %66 = arith.mulf %61, %65 : vector<8x16x16xf32>
    "tpu.trace_start"() <{level = 10 : i32, message = "bqk,bkd->bqd"}> : () -> ()
    %cst_26 = arith.constant dense<0.000000e+00> : vector<8x16x8xf32>
    %67 = tpu.matmul %66, %53, %cst_26 {dimension_numbers = #tpu.dot_dimension_numbers<[2], [1], [1], [2], [0, 0, 0, 1, 1, 2], [0], [0]>} : vector<8x16x16xf32>, vector<8x16x8xf32>, vector<8x16x8xf32> -> vector<8x16x8xf32>
    "tpu.trace_stop"() : () -> ()
    %68 = vector.extract_strided_slice %47 {offsets = [0, 0, 8], sizes = [8, 16, 8], strides = [1, 1, 1]} : vector<8x16x96xf32> to vector<8x16x8xf32>
    %69 = vector.extract_strided_slice %47 {offsets = [0, 0, 40], sizes = [8, 16, 8], strides = [1, 1, 1]} : vector<8x16x96xf32> to vector<8x16x8xf32>
    %70 = vector.extract_strided_slice %47 {offsets = [0, 0, 72], sizes = [8, 16, 8], strides = [1, 1, 1]} : vector<8x16x96xf32> to vector<8x16x8xf32>
    "tpu.trace_start"() <{level = 10 : i32, message = "bqd,bkd->bqk"}> : () -> ()
    %cst_27 = arith.constant dense<0.000000e+00> : vector<8x16x16xf32>
    %71 = tpu.matmul %68, %69, %cst_27 {dimension_numbers = #tpu.dot_dimension_numbers<[2], [2], [1], [1], [0, 0, 0, 1, 1, 1], [0], [0]>} : vector<8x16x8xf32>, vector<8x16x8xf32>, vector<8x16x16xf32> -> vector<8x16x16xf32>
    %cst_28 = arith.constant -1.000000e+30 : f32
    "tpu.trace_stop"() : () -> ()
    %72 = vector.broadcast %cst_28 : f32 to vector<8x16x16xf32>
    %73 = arith.select %50, %71, %72 : vector<8x16x16xi1>, vector<8x16x16xf32>
    %cst_29 = arith.constant dense<0xFF800000> : vector<8x16xf32>
    %74 = vector.multi_reduction <maximumf>, %73, %cst_29 [2] : vector<8x16x16xf32> to vector<8x16xf32>
    %75 = vector.shape_cast %74 : vector<8x16xf32> to vector<8x16x1xf32>
    %76 = vector.broadcast %75 : vector<8x16x1xf32> to vector<8x16x16xf32>
    %77 = arith.subf %73, %76 : vector<8x16x16xf32>
    %78 = math.exp %77 : vector<8x16x16xf32>
    %cst_30 = arith.constant dense<0.000000e+00> : vector<8x16xf32>
    %79 = vector.multi_reduction <add>, %78, %cst_30 [2] : vector<8x16x16xf32> to vector<8x16xf32>
    %80 = vector.shape_cast %79 : vector<8x16xf32> to vector<8x16x1xf32>
    %81 = tpu.reciprocal %80 {approx = true} : vector<8x16x1xf32> -> vector<8x16x1xf32>
    %82 = vector.broadcast %81 : vector<8x16x1xf32> to vector<8x16x16xf32>
    %83 = arith.mulf %78, %82 : vector<8x16x16xf32>
    "tpu.trace_start"() <{level = 10 : i32, message = "bqk,bkd->bqd"}> : () -> ()
    %cst_31 = arith.constant dense<0.000000e+00> : vector<8x16x8xf32>
    %84 = tpu.matmul %83, %70, %cst_31 {dimension_numbers = #tpu.dot_dimension_numbers<[2], [1], [1], [2], [0, 0, 0, 1, 1, 2], [0], [0]>} : vector<8x16x16xf32>, vector<8x16x8xf32>, vector<8x16x8xf32> -> vector<8x16x8xf32>
    "tpu.trace_stop"() : () -> ()
    %85 = vector.extract_strided_slice %47 {offsets = [0, 0, 16], sizes = [8, 16, 8], strides = [1, 1, 1]} : vector<8x16x96xf32> to vector<8x16x8xf32>
    %86 = vector.extract_strided_slice %47 {offsets = [0, 0, 48], sizes = [8, 16, 8], strides = [1, 1, 1]} : vector<8x16x96xf32> to vector<8x16x8xf32>
    %87 = vector.extract_strided_slice %47 {offsets = [0, 0, 80], sizes = [8, 16, 8], strides = [1, 1, 1]} : vector<8x16x96xf32> to vector<8x16x8xf32>
    "tpu.trace_start"() <{level = 10 : i32, message = "bqd,bkd->bqk"}> : () -> ()
    %cst_32 = arith.constant dense<0.000000e+00> : vector<8x16x16xf32>
    %88 = tpu.matmul %85, %86, %cst_32 {dimension_numbers = #tpu.dot_dimension_numbers<[2], [2], [1], [1], [0, 0, 0, 1, 1, 1], [0], [0]>} : vector<8x16x8xf32>, vector<8x16x8xf32>, vector<8x16x16xf32> -> vector<8x16x16xf32>
    %cst_33 = arith.constant -1.000000e+30 : f32
    "tpu.trace_stop"() : () -> ()
    %89 = vector.broadcast %cst_33 : f32 to vector<8x16x16xf32>
    %90 = arith.select %50, %88, %89 : vector<8x16x16xi1>, vector<8x16x16xf32>
    %cst_34 = arith.constant dense<0xFF800000> : vector<8x16xf32>
    %91 = vector.multi_reduction <maximumf>, %90, %cst_34 [2] : vector<8x16x16xf32> to vector<8x16xf32>
    %92 = vector.shape_cast %91 : vector<8x16xf32> to vector<8x16x1xf32>
    %93 = vector.broadcast %92 : vector<8x16x1xf32> to vector<8x16x16xf32>
    %94 = arith.subf %90, %93 : vector<8x16x16xf32>
    %95 = math.exp %94 : vector<8x16x16xf32>
    %cst_35 = arith.constant dense<0.000000e+00> : vector<8x16xf32>
    %96 = vector.multi_reduction <add>, %95, %cst_35 [2] : vector<8x16x16xf32> to vector<8x16xf32>
    %97 = vector.shape_cast %96 : vector<8x16xf32> to vector<8x16x1xf32>
    %98 = tpu.reciprocal %97 {approx = true} : vector<8x16x1xf32> -> vector<8x16x1xf32>
    %99 = vector.broadcast %98 : vector<8x16x1xf32> to vector<8x16x16xf32>
    %100 = arith.mulf %95, %99 : vector<8x16x16xf32>
    "tpu.trace_start"() <{level = 10 : i32, message = "bqk,bkd->bqd"}> : () -> ()
    %cst_36 = arith.constant dense<0.000000e+00> : vector<8x16x8xf32>
    %101 = tpu.matmul %100, %87, %cst_36 {dimension_numbers = #tpu.dot_dimension_numbers<[2], [1], [1], [2], [0, 0, 0, 1, 1, 2], [0], [0]>} : vector<8x16x16xf32>, vector<8x16x8xf32>, vector<8x16x8xf32> -> vector<8x16x8xf32>
    "tpu.trace_stop"() : () -> ()
    %102 = vector.extract_strided_slice %47 {offsets = [0, 0, 24], sizes = [8, 16, 8], strides = [1, 1, 1]} : vector<8x16x96xf32> to vector<8x16x8xf32>
    %103 = vector.extract_strided_slice %47 {offsets = [0, 0, 56], sizes = [8, 16, 8], strides = [1, 1, 1]} : vector<8x16x96xf32> to vector<8x16x8xf32>
    %104 = vector.extract_strided_slice %47 {offsets = [0, 0, 88], sizes = [8, 16, 8], strides = [1, 1, 1]} : vector<8x16x96xf32> to vector<8x16x8xf32>
    "tpu.trace_start"() <{level = 10 : i32, message = "bqd,bkd->bqk"}> : () -> ()
    %cst_37 = arith.constant dense<0.000000e+00> : vector<8x16x16xf32>
    %105 = tpu.matmul %102, %103, %cst_37 {dimension_numbers = #tpu.dot_dimension_numbers<[2], [2], [1], [1], [0, 0, 0, 1, 1, 1], [0], [0]>} : vector<8x16x8xf32>, vector<8x16x8xf32>, vector<8x16x16xf32> -> vector<8x16x16xf32>
    %cst_38 = arith.constant -1.000000e+30 : f32
    "tpu.trace_stop"() : () -> ()
    %106 = vector.broadcast %cst_38 : f32 to vector<8x16x16xf32>
    %107 = arith.select %50, %105, %106 : vector<8x16x16xi1>, vector<8x16x16xf32>
    %cst_39 = arith.constant dense<0xFF800000> : vector<8x16xf32>
    %108 = vector.multi_reduction <maximumf>, %107, %cst_39 [2] : vector<8x16x16xf32> to vector<8x16xf32>
    %109 = vector.shape_cast %108 : vector<8x16xf32> to vector<8x16x1xf32>
    %110 = vector.broadcast %109 : vector<8x16x1xf32> to vector<8x16x16xf32>
    %111 = arith.subf %107, %110 : vector<8x16x16xf32>
    %112 = math.exp %111 : vector<8x16x16xf32>
    %cst_40 = arith.constant dense<0.000000e+00> : vector<8x16xf32>
    %113 = vector.multi_reduction <add>, %112, %cst_40 [2] : vector<8x16x16xf32> to vector<8x16xf32>
    %114 = vector.shape_cast %113 : vector<8x16xf32> to vector<8x16x1xf32>
    %115 = tpu.reciprocal %114 {approx = true} : vector<8x16x1xf32> -> vector<8x16x1xf32>
    %116 = vector.broadcast %115 : vector<8x16x1xf32> to vector<8x16x16xf32>
    %117 = arith.mulf %112, %116 : vector<8x16x16xf32>
    "tpu.trace_start"() <{level = 10 : i32, message = "bqk,bkd->bqd"}> : () -> ()
    %cst_41 = arith.constant dense<0.000000e+00> : vector<8x16x8xf32>
    %118 = tpu.matmul %117, %104, %cst_41 {dimension_numbers = #tpu.dot_dimension_numbers<[2], [1], [1], [2], [0, 0, 0, 1, 1, 2], [0], [0]>} : vector<8x16x16xf32>, vector<8x16x8xf32>, vector<8x16x8xf32> -> vector<8x16x8xf32>
    "tpu.trace_stop"() : () -> ()
    %119 = tpu.concatenate %67, %84, %101, %118 in 2 : vector<8x16x8xf32>, vector<8x16x8xf32>, vector<8x16x8xf32>, vector<8x16x8xf32> -> vector<8x16x32xf32>
    %120 = vector.shape_cast %119 : vector<8x16x32xf32> to vector<128x32xf32>
    %c0_42 = arith.constant 0 : index
    %c0_43 = arith.constant 0 : index
    %121 = vector.load %arg9[%c0_42, %c0_43] : memref<32x32xf32, #tpu.memory_space<vmem>>, vector<32x32xf32>
    %cst_44 = arith.constant dense<0.000000e+00> : vector<128x32xf32>
    %122 = tpu.matmul %120, %121, %cst_44 {dimension_numbers = #tpu.dot_dimension_numbers<[1], [0], [0], [1], [0, 0, 1, 1], [], []>} : vector<128x32xf32>, vector<32x32xf32>, vector<128x32xf32> -> vector<128x32xf32>
    %123 = arith.addf %17, %122 : vector<128x32xf32>
    %c0_45 = arith.constant 0 : index
    %c0_46 = arith.constant 0 : index
    %124 = vector.load %arg10[%c0_45, %c0_46] : memref<1x32xf32, #tpu.memory_space<vmem>>, vector<1x32xf32>
    %125 = vector.broadcast %124 : vector<1x32xf32> to vector<128x32xf32>
    %126 = arith.addf %123, %125 : vector<128x32xf32>
    %c0_47 = arith.constant 0 : index
    %c0_48 = arith.constant 0 : index
    %127 = vector.load %arg11[%c0_47, %c0_48] : memref<1x32xf32, #tpu.memory_space<vmem>>, vector<1x32xf32>
    %c0_49 = arith.constant 0 : index
    %c0_50 = arith.constant 0 : index
    %128 = vector.load %arg12[%c0_49, %c0_50] : memref<1x32xf32, #tpu.memory_space<vmem>>, vector<1x32xf32>
    %cst_51 = arith.constant dense<0.000000e+00> : vector<128xf32>
    %129 = vector.multi_reduction <add>, %126, %cst_51 [1] : vector<128x32xf32> to vector<128xf32>
    %130 = vector.shape_cast %129 : vector<128xf32> to vector<128x1xf32>
    %cst_52 = arith.constant 3.200000e+01 : f32
    %131 = vector.broadcast %cst_52 : f32 to vector<128x1xf32>
    %132 = arith.divf %130, %131 : vector<128x1xf32>
    %133 = vector.broadcast %132 : vector<128x1xf32> to vector<128x32xf32>
    %134 = arith.subf %126, %133 : vector<128x32xf32>
    %135 = arith.mulf %134, %134 : vector<128x32xf32>
    %cst_53 = arith.constant dense<0.000000e+00> : vector<128xf32>
    %136 = vector.multi_reduction <add>, %135, %cst_53 [1] : vector<128x32xf32> to vector<128xf32>
    %137 = vector.shape_cast %136 : vector<128xf32> to vector<128x1xf32>
    %cst_54 = arith.constant 3.200000e+01 : f32
    %138 = vector.broadcast %cst_54 : f32 to vector<128x1xf32>
    %139 = arith.divf %137, %138 : vector<128x1xf32>
    %140 = vector.broadcast %132 : vector<128x1xf32> to vector<128x32xf32>
    %141 = arith.subf %126, %140 : vector<128x32xf32>
    %cst_55 = arith.constant 9.99999997E-7 : f32
    %142 = vector.broadcast %cst_55 : f32 to vector<128x1xf32>
    %143 = arith.addf %139, %142 : vector<128x1xf32>
    %144 = math.rsqrt %143 : vector<128x1xf32>
    %145 = vector.broadcast %144 : vector<128x1xf32> to vector<128x32xf32>
    %146 = arith.mulf %141, %145 : vector<128x32xf32>
    %147 = vector.broadcast %127 : vector<1x32xf32> to vector<128x32xf32>
    %148 = arith.mulf %146, %147 : vector<128x32xf32>
    %149 = vector.broadcast %128 : vector<1x32xf32> to vector<128x32xf32>
    %150 = arith.addf %148, %149 : vector<128x32xf32>
    %c0_56 = arith.constant 0 : index
    %c0_57 = arith.constant 0 : index
    %151 = vector.load %arg13[%c0_56, %c0_57] : memref<32x128xf32, #tpu.memory_space<vmem>>, vector<32x128xf32>
    %cst_58 = arith.constant dense<0.000000e+00> : vector<128x128xf32>
    %152 = tpu.matmul %150, %151, %cst_58 {dimension_numbers = #tpu.dot_dimension_numbers<[1], [0], [0], [1], [0, 0, 1, 1], [], []>} : vector<128x32xf32>, vector<32x128xf32>, vector<128x128xf32> -> vector<128x128xf32>
    %c0_59 = arith.constant 0 : index
    %c0_60 = arith.constant 0 : index
    %153 = vector.load %arg14[%c0_59, %c0_60] : memref<1x128xf32, #tpu.memory_space<vmem>>, vector<1x128xf32>
    %154 = vector.broadcast %153 : vector<1x128xf32> to vector<128x128xf32>
    %155 = arith.addf %152, %154 : vector<128x128xf32>
    %156 = arith.mulf %155, %155 : vector<128x128xf32>
    %157 = arith.mulf %155, %156 : vector<128x128xf32>
    %cst_61 = arith.constant 4.471500e-02 : f32
    %158 = vector.broadcast %cst_61 : f32 to vector<128x128xf32>
    %159 = arith.mulf %158, %157 : vector<128x128xf32>
    %160 = arith.addf %155, %159 : vector<128x128xf32>
    %cst_62 = arith.constant 0.797884583 : f32
    %161 = vector.broadcast %cst_62 : f32 to vector<128x128xf32>
    %162 = arith.mulf %161, %160 : vector<128x128xf32>
    %163 = math.tanh %162 : vector<128x128xf32>
    %cst_63 = arith.constant 1.000000e+00 : f32
    %164 = vector.broadcast %cst_63 : f32 to vector<128x128xf32>
    %165 = arith.addf %164, %163 : vector<128x128xf32>
    %cst_64 = arith.constant 5.000000e-01 : f32
    %166 = vector.broadcast %cst_64 : f32 to vector<128x128xf32>
    %167 = arith.mulf %166, %165 : vector<128x128xf32>
    %168 = arith.mulf %155, %167 : vector<128x128xf32>
    %c0_65 = arith.constant 0 : index
    %c0_66 = arith.constant 0 : index
    %169 = vector.load %arg15[%c0_65, %c0_66] : memref<128x32xf32, #tpu.memory_space<vmem>>, vector<128x32xf32>
    %cst_67 = arith.constant dense<0.000000e+00> : vector<128x32xf32>
    %170 = tpu.matmul %168, %169, %cst_67 {dimension_numbers = #tpu.dot_dimension_numbers<[1], [0], [0], [1], [0, 0, 1, 1], [], []>} : vector<128x128xf32>, vector<128x32xf32>, vector<128x32xf32> -> vector<128x32xf32>
    %171 = arith.addf %126, %170 : vector<128x32xf32>
    %c0_68 = arith.constant 0 : index
    %c0_69 = arith.constant 0 : index
    %172 = vector.load %arg16[%c0_68, %c0_69] : memref<1x32xf32, #tpu.memory_space<vmem>>, vector<1x32xf32>
    %173 = vector.broadcast %172 : vector<1x32xf32> to vector<128x32xf32>
    %174 = arith.addf %171, %173 : vector<128x32xf32>
    %175 = vector.shape_cast %174 : vector<128x32xf32> to vector<8x16x32xf32>
    %176 = vector.extract_strided_slice %175 {offsets = [0, 0, 0], sizes = [8, 1, 32], strides = [1, 1, 1]} : vector<8x16x32xf32> to vector<8x1x32xf32>
    %177 = vector.shape_cast %176 : vector<8x1x32xf32> to vector<8x32xf32>
    %178 = arith.addf %177, %2 : vector<8x32xf32>
    %c0_70 = arith.constant 0 : index
    %c0_71 = arith.constant 0 : index
    %179 = vector.load %arg17[%c0_70, %c0_71] : memref<8x32xf32, #tpu.memory_space<vmem>>, vector<8x32xf32>
    tpu.vector_store %arg17[%c0_70, %c0_71], %178 {strides = array<i32>} : memref<8x32xf32, #tpu.memory_space<vmem>>, vector<8x32xf32>,
    return
  }
  func.func @transform_0(%arg0: i32) -> (i32, i32, i32) {
    %c0_i32 = arith.constant 0 : i32
    %c0_i32_0 = arith.constant 0 : i32
    %c0_i32_1 = arith.constant 0 : i32
    return %arg0, %c0_i32, %c0_i32_0 : i32, i32, i32
  }
  func.func @transform_1(%arg0: i32) -> (i32, i32) {
    %c0_i32 = arith.constant 0 : i32
    %c0_i32_0 = arith.constant 0 : i32
    return %arg0, %c0_i32 : i32, i32
  }
  func.func @transform_2(%arg0: i32) -> (i32, i32) {
    %c0_i32 = arith.constant 0 : i32
    %c0_i32_0 = arith.constant 0 : i32
    %c0_i32_1 = arith.constant 0 : i32
    return %c0_i32, %c0_i32_0 : i32, i32
  }
  func.func @transform_3(%arg0: i32) -> (i32, i32) {
    %c0_i32 = arith.constant 0 : i32
    %c0_i32_0 = arith.constant 0 : i32
    %c0_i32_1 = arith.constant 0 : i32
    return %c0_i32, %c0_i32_0 : i32, i32
  }
  func.func @transform_4(%arg0: i32) -> (i32, i32) {
    %c0_i32 = arith.constant 0 : i32
    %c0_i32_0 = arith.constant 0 : i32
    %c0_i32_1 = arith.constant 0 : i32
    return %c0_i32, %c0_i32_0 : i32, i32
  }
  func.func @transform_5(%arg0: i32) -> (i32, i32) {
    %c0_i32 = arith.constant 0 : i32
    %c0_i32_0 = arith.constant 0 : i32
    %c0_i32_1 = arith.constant 0 : i32
    return %c0_i32, %c0_i32_0 : i32, i32
  }
  func.func @transform_6(%arg0: i32) -> (i32, i32) {
    %c0_i32 = arith.constant 0 : i32
    %c0_i32_0 = arith.constant 0 : i32
    %c0_i32_1 = arith.constant 0 : i32
    return %c0_i32, %c0_i32_0 : i32, i32
  }
  func.func @transform_7(%arg0: i32) -> (i32, i32) {
    %c0_i32 = arith.constant 0 : i32
    %c0_i32_0 = arith.constant 0 : i32
    %c0_i32_1 = arith.constant 0 : i32
    return %c0_i32, %c0_i32_0 : i32, i32
  }
  func.func @transform_8(%arg0: i32) -> (i32, i32) {
    %c0_i32 = arith.constant 0 : i32
    %c0_i32_0 = arith.constant 0 : i32
    %c0_i32_1 = arith.constant 0 : i32
    return %c0_i32, %c0_i32_0 : i32, i32
  }
  func.func @transform_9(%arg0: i32) -> (i32, i32) {
    %c0_i32 = arith.constant 0 : i32
    %c0_i32_0 = arith.constant 0 : i32
    %c0_i32_1 = arith.constant 0 : i32
    return %c0_i32, %c0_i32_0 : i32, i32
  }
  func.func @transform_10(%arg0: i32) -> (i32, i32) {
    %c0_i32 = arith.constant 0 : i32
    %c0_i32_0 = arith.constant 0 : i32
    %c0_i32_1 = arith.constant 0 : i32
    return %c0_i32, %c0_i32_0 : i32, i32
  }
  func.func @transform_11(%arg0: i32) -> (i32, i32) {
    %c0_i32 = arith.constant 0 : i32
    %c0_i32_0 = arith.constant 0 : i32
    %c0_i32_1 = arith.constant 0 : i32
    return %c0_i32, %c0_i32_0 : i32, i32
  }
  func.func @transform_12(%arg0: i32) -> (i32, i32) {
    %c0_i32 = arith.constant 0 : i32
    %c0_i32_0 = arith.constant 0 : i32
    %c0_i32_1 = arith.constant 0 : i32
    return %c0_i32, %c0_i32_0 : i32, i32
  }
  func.func @transform_13(%arg0: i32) -> (i32, i32) {
    %c0_i32 = arith.constant 0 : i32
    %c0_i32_0 = arith.constant 0 : i32
    %c0_i32_1 = arith.constant 0 : i32
    return %c0_i32, %c0_i32_0 : i32, i32
  }
  func.func @transform_14(%arg0: i32) -> (i32, i32) {
    %c0_i32 = arith.constant 0 : i32
    %c0_i32_0 = arith.constant 0 : i32
    %c0_i32_1 = arith.constant 0 : i32
    return %c0_i32, %c0_i32_0 : i32, i32
  }
  func.func @transform_15(%arg0: i32) -> (i32, i32) {
    %c0_i32 = arith.constant 0 : i32
    %c0_i32_0 = arith.constant 0 : i32
    %c0_i32_1 = arith.constant 0 : i32
    return %c0_i32, %c0_i32_0 : i32, i32
  }
  func.func @transform_16(%arg0: i32) -> (i32, i32) {
    %c0_i32 = arith.constant 0 : i32
    %c0_i32_0 = arith.constant 0 : i32
    return %arg0, %c0_i32 : i32, i32
  }
}

</mosaic_0001>

<bundles_post_ra>
// kernel: tpu_custom_call.1
= control target key start
LH: loop header
LB: loop body
LE: loop exit
PB: predicated region body
PF: predicated region fallthrough
CT: control target
= control target key end

     0   :  { %s14174_s0 = inlined_call_operand.vmem [shape: f32[16,16,32], index: 0, kind: input, shape index: {}]   ;;  %s14175_s1 = inlined_call_operand.hbm [shape: f32[16,64], index: 1, kind: input, shape index: {}]   ;;  %s14176_s2 = inlined_call_operand.vmem [shape: f32[64,32], index: 2, kind: input, shape index: {}]   ;;  %s14177_s3 = inlined_call_operand.vmem [shape: f32[1,32], index: 3, kind: input, shape index: {}]   ;;  %s14178_s4 = inlined_call_operand.vmem [shape: f32[1,32], index: 4, kind: input, shape index: {}]   ;;  %s14179_s5 = inlined_call_operand.vmem [shape: f32[1,32], index: 5, kind: input, shape index: {}]   ;;  %s14180_s6 = inlined_call_operand.hbm [shape: f32[32,96], index: 6, kind: input, shape index: {}]   ;;  %s14181_s7 = inlined_call_operand.vmem [shape: f32[1,96], index: 7, kind: input, shape index: {}]   ;;  %s14182_s8 = inlined_call_operand.hbm [shape: f32[32,32], index: 8, kind: input, shape index: {}]   ;;  %s14183_s9 = inlined_call_operand.vmem [shape: f32[1,32], index: 9, kind: input, shape index: {}]   ;;  %s14184_s10 = inlined_call_operand.vmem [shape: f32[1,32], index: 10, kind: input, shape index: {}]   ;;  %s14185_s11 = inlined_call_operand.vmem [shape: f32[1,32], index: 11, kind: input, shape index: {}]   ;;  %s14186_s12 = inlined_call_operand.hbm [shape: f32[32,128], index: 12, kind: input, shape index: {}]   ;;  %s14187_s13 = inlined_call_operand.vmem [shape: f32[1,128], index: 13, kind: input, shape index: {}]   ;;  %s14188_s14 = inlined_call_operand.vmem [shape: f32[128,32], index: 14, kind: input, shape index: {}]   ;;  %s14189_s15 = inlined_call_operand.vmem [shape: f32[1,32], index: 15, kind: input, shape index: {}]   ;;  %s14190_s16 = inlined_call_operand.hbm [shape: f32[16,32], index: 16, kind: output, shape index: {}]  }
   0x1   :  { %14227 = sst [smem:[#allocation66_spill]] %s14174_s0 }
   0x2   :  { %14228 = sst [smem:[#allocation67_spill]] %s14180_s6 }
   0x3   :  { %14229 = sst [smem:[#allocation68_spill]] %s14182_s8 }
   0x4   :  { %14230 = sst [smem:[#allocation69_spill]] %s14186_s12 }
   0x5   :  { %14231 = sst [smem:[#allocation70_spill]] %s14189_s15 }
   0x6   :  { %14232 = sst [smem:[#allocation71_spill]] %s14190_s16 }
   0x7   :  { %21 = vsyncpa [#allocation3], 0 }
   0x8   :  { %23 = vsyncpa [#allocation3 + $0x1], 0 }
   0x9   :  { %24 = vsyncpa [#allocation6], 0 }
   0xa   :  { %25 = vsyncpa [#allocation9], 0 }
   0xb   :  { %26 = vsyncpa [#allocation4], 0 }
   0xc   :  { %28 = vsyncpa [#allocation4 + $0x1], 0  ;;  %s11120_s21 = smov 0   ;;  %s11122_s22 = smov 0  }
   0xd   :  { %s11124_s23 = smov 0   ;;  %s11126_s24 = smov 0  }
   0xe LB: > { %14233 = sst [smem:[#allocation15_spill]] %s10998_s21  ;;  %s11141_s25 = sadd.s32 4294967295, %s11010_s24   ;;  %s11010_s24 = sphi %s11126_s24, %s14371_s24   ;;  %s11006_s23 = sphi %s11124_s23, %s14373_s23   ;;  %s11002_s22 = sphi %s11122_s22, %s14375_s22   ;;  %s10998_s21 = sphi %s11120_s21, %s14374_s21  }
   0xf   : > { %14234 = sst [smem:[#allocation16_spill]] %s11006_s23  ;;  %s9121_s26 = sadd.s32 4294967294, %s11010_s24  }
  0x10   : > { %p80_p0 = scmp.ne.s32.totalorder %s11002_s22, %s10998_s21  ;;  %p14194_p1 = scmp.eq.s32.totalorder %s11141_s25, 0 }
  0x11   : > { %p404_p3 = scmp.eq.s32.totalorder %s9121_s26, 1  ;;  %p9122_p5 = scmp.ge.s32.totalorder %s11010_s24, 1 }
  0x12   : > { %p11150_p4 = por %p14194_p1, %p80_p0  ;;  %p411_p7 = scmp.lt.s32.totalorder %s11010_s24, 3 }
  0x13   : > { %p11155_p6 = por %p404_p3, %p80_p0  ;;  %s11012_s30 = smov [#allocation5]  }
  0x14   : > { %s14235_s27 = scalar_select %p11150_p4, 1, 0 }
  0x15   : > { %s14236_s28 = scalar_select %p11155_p6, 1, 0 }
  0x16   : > { %p11160_p8 = pnand %p9122_p5, %p411_p7  ;;  %s435_s0 = sshll.u32 %s11012_s30, 4  ;;  %s436_s0 = int_to_ptr.vmem [resolvable:$true] %s435_s0 }
  0x17   : > { %14237 = sst [smem:[#allocation17_spill]] %s14236_s28  ;;  %s11013_s18 = smov [#allocation7]  }
  0x18   : > { %s14238_s29 = scalar_select %p11160_p8, 1, 0 }
  0x19   : > { %p10385_p9 = pneg %p11160_p8  ;;  %s451_s19 = sshll.u32 %s11013_s18, 4  ;;  %s452_s19 = int_to_ptr.vmem [resolvable:$true] %s451_s19 }
  0x1a   : > { %s11014_s20 = smov [#allocation8]   ;;  %s10843_s28 = scalar_lea.vmem %s436_s0, 512 }
  0x1b   : > { %p11169_p11 = pnand %p10385_p9, %p14194_p1  ;;  %s473_s26 = sshll.u32 %s11014_s20, 4  ;;  %s474_s26 = int_to_ptr.vmem [resolvable:$true] %s473_s26 }
  0x1c   : > { %p10844_p13 = scmp.ne.s32.totalorder %s436_s0, %s10843_s28  ;;  %p10851_p5 = scmp.lt.s32.totalorder %s436_s0, %s436_s0 }
  0x1d   : > { %p10834_p12 = pneg %p11169_p11  ;;  %p10852_p7 = scmp.lt.s32.totalorder %s10843_s28, %s10843_s28 }
  0x1f   : > { %p10846_p0 = pnand %p10844_p13, %p10834_p12  ;;  %p10853_p9 = por %p10852_p7, %p10851_p5 }
  0x21   : > { %p10847_p3 = pneg %p10846_p0 }
  0x23   : > { %p10854_p10 = pnand %p10853_p9, %p10847_p3 }
  0x25   : > { %10857 = shalt.err (!%p10854_p10)
}
  0x26   : > { %s11015_s30 = smov 128   ;;  %s11016_s18 = smov 8  }
  0x27   : > { %s14240_s6 = sld [smem:[#allocation67_spill]]  ;;  %s10869_s16 = scalar_lea.vmem %s452_s19, 512 }
  0x28   : > { %p10870_p1 = scmp.ne.s32.totalorder %s452_s19, %s10869_s16  ;;  %p10877_p2 = scmp.lt.s32.totalorder %s452_s19, %s452_s19 }
  0x29   : > { %p10878_p6 = scmp.lt.s32.totalorder %s10869_s16, %s10869_s16 }
  0x2a   : > { %p10872_p13 = pnand %p10870_p1, %p10834_p12 }
  0x2b   : > { %p10879_p5 = por %p10878_p6, %p10877_p2 }
  0x2c   : > { %p10873_p0 = pneg %p10872_p13 }
  0x2d   : > { %10388 = dma.hbm_to_vmem [thread:$0]  (!%p11169_p11), %s14240_s6, 512, %s436_s0, [#allocation6], %s11015_s30, %s11015_s30, %s11016_s18  }
  0x2e   : > { %p10880_p3 = pnand %p10879_p5, %p10873_p0 }
  0x30   : > { %10883 = shalt.err (!%p10880_p3)
}
  0x31   : > { %s14241_s8 = sld [smem:[#allocation68_spill]]  ;;  %s10895_s21 = scalar_lea.vmem %s474_s26, 512 }
  0x32   : > { %p10896_p10 = scmp.ne.s32.totalorder %s474_s26, %s10895_s21  ;;  %p10903_p9 = scmp.lt.s32.totalorder %s474_s26, %s474_s26 }
  0x33   : > { %p10904_p13 = scmp.lt.s32.totalorder %s10895_s21, %s10895_s21 }
  0x34   : > { %p10898_p7 = pnand %p10896_p10, %p10834_p12 }
  0x35   : > { %p10905_p4 = por %p10904_p13, %p10903_p9 }
  0x36   : > { %p10899_p1 = pneg %p10898_p7 }
  0x37   : > { %10391 = dma.hbm_to_vmem [thread:$0]  (!%p11169_p11), %s14241_s8, 512, %s452_s19, [#allocation6], %s11015_s30, %s11015_s30, %s11016_s18  }
  0x38   : > { %p10906_p2 = pnand %p10905_p4, %p10899_p1 }
  0x3a   : > { %10909 = shalt.err (!%p10906_p2)
}
  0x3b   : > { %s14242_s12 = sld [smem:[#allocation69_spill]]  ;;  %s11200_s15 = sadd.s32 1, %s11010_s24  }
  0x3c   : > { %14243 = sst [smem:[#allocation18_spill]] %s11200_s15  ;;  %s64_s19 = ssub.s32 %s11010_s24, %s11200_s15 }
  0x3d   : > { %s67_s17 = sadd.s32 1, %s11006_s23  ;;  %p65_p4 = scmp.eq.s32.totalorder %s64_s19, 0 }
  0x3e   : > { %p74_p6 = scmp.ne.s32.totalorder %s11006_s23, %s11002_s22  ;;  %p75_p12 = scmp.eq.s32.totalorder %s11010_s24, 0 }
  0x3f   : > { %p10406_p0 = scmp.lt.s32.totalorder %s11010_s24, 2  ;;  %p14245_p3 = scmp.eq.s32.totalorder %s11141_s25, 1 }
  0x40   : > { %s11210_s20 = scalar_select %p65_p4, %s11006_s23, %s67_s17  }
  0x41   : > { %10394 = dma.hbm_to_vmem [thread:$0]  (!%p11169_p11), %s14242_s12, 512, %s474_s26, [#allocation9], %s11015_s30, %s11015_s30, %s11016_s18  }
  0x42   : > { %14244 = sst [smem:[#allocation19_spill]] %s11210_s20  ;;  %p76_p5 = por %p75_p12, %p74_p6 }
  0x43   : > { %p11214_p10 = por %p14245_p3, %p74_p6  ;;  %s506_s21 = sand.u32 1, %s11006_s23  }
  0x44   : > { %s9128_s16 = sshll.u32 %s11010_s24, 7  ;;  %s9127_s26 = sshll.u32 %s506_s21, 3 }
  0x45   : > { %s14246_s28 = scalar_select %p11214_p10, 1, 0 }
  0x46   : > { %s11223_s0 = scalar_lea.hbm %s14175_s1, %s9128_s16  ;;  %s510_s19 = scalar_lea.vmem [#allocation2], %s9127_s26 }
  0x47   : > { %s517_s17 = sshll.u32 %s510_s19, 4  ;;  %p11225_p11 = pnand %p10406_p0, %p76_p5  ;;  %s518_s17 = int_to_ptr.vmem [resolvable:$true] %s517_s17 }
  0x48   : > { %s507_s8 = scalar_lea.sflag [#allocation3], %s506_s21  ;;  %s10910_s12 = scalar_lea.hbm %s11223_s0, 128 }
  0x49   : > { %p10911_p7 = scmp.ne.s32.totalorder %s11223_s0, %s10910_s12  ;;  %p10912_p1 = pneg %p11225_p11 }
  0x4a   : > { %s10915_s18 = scalar_lea.hbm %s14175_s1, 256  ;;  %p10916_p2 = scmp.lt.s32.totalorder %s11223_s0, %s14175_s1 }
  0x4b   : > { %p10913_p9 = pnand %p10912_p1, %p10911_p7  ;;  %p10917_p4 = scmp.lt.s32.totalorder %s10915_s18, %s10910_s12 }
  0x4d   : > { %p10914_p13 = pneg %p10913_p9  ;;  %p10918_p6 = por %p10917_p4, %p10916_p2 }
  0x4f   : > { %p10919_p12 = pnand %p10918_p6, %p10914_p13 }
  0x51   : > { %10922 = shalt.err (!%p10919_p12)
}
  0x52   : > { %s10923_s19 = scalar_lea.vmem %s518_s17, 128  ;;  %s11017_s21 = smov [#allocation2]  }
  0x53   : > { %p10924_p0 = scmp.ne.s32.totalorder %s518_s17, %s10923_s19  ;;  %s10928_s23 = sshll.u32 %s11017_s21, 4  ;;  %s10929_s23 = int_to_ptr.vmem [resolvable:$false] %s10928_s23 }
  0x54   : > { %s10930_s15 = scalar_lea.vmem %s10929_s23, 256  ;;  %p10931_p7 = scmp.lt.s32.totalorder %s518_s17, %s10929_s23 }
  0x55   : > { %p10926_p5 = pnand %p10924_p0, %p10912_p1  ;;  %p10932_p9 = scmp.lt.s32.totalorder %s10930_s15, %s10923_s19 }
  0x57   : > { %p10927_p3 = pneg %p10926_p5  ;;  %p10933_p10 = por %p10932_p9, %p10931_p7 }
  0x59   : > { %p10934_p8 = pnand %p10933_p10, %p10927_p3 }
  0x5b   : > { %10937 = shalt.err (!%p10934_p8)
}
  0x5c   : > { %10398 = dma.hbm_to_vmem [thread:$0]  (!%p11225_p11), %s11223_s0, 128, %s518_s17, %s507_s8  }
  0x5d   : > { %p14248_p13 = scmp.ne.s32.totalorder %s14238_s29, 0 }
  0x5f   : > { %526 = sbr.rel (%p14248_p13) target bundleno = 4422 (0x1146), region = 84 }
  0x64   : > { %s11246_s12 = sand.u32 1, %s11002_s22   ;;  %p14249_p8 = scmp.ne.s32.totalorder %s14235_s27, 0 }
  0x65   : > { %s9130_s20 = sshll.u32 %s11246_s12, 3  ;;  %s529_s23 = scalar_lea.sflag [#allocation3], %s11246_s12 }
  0x66   : > { %s11252_s15 = scalar_lea.vmem [#allocation2], %s9130_s20 }
  0x67   : > { %10981 = dma.done.wait (%p14249_p8), %s529_s23, 128  }
  0x68   : > { %10983 = vsyncadd (%p14249_p8), %s529_s23, 4294967168  ;;  %p14250_p10 = scmp.eq.s32.totalorder %s11141_s25, 0 }
  0x6a   : > { %10985 = dma.done.wait (%p14250_p10), [#allocation6], 1024   ;;  %p14251_p11 = pmov %p14250_p10 }
  0x6b   : > { %p14252_p1 = pmov %p14250_p10 }
  0x6c   : > { %10987 = vsyncadd (%p14251_p11), [#allocation6], 4294966272 }
  0x6d   : > { %10989 = dma.done.wait (%p14252_p1), [#allocation9], 512   ;;  %p14253_p2 = pmov %p14252_p1 }
  0x6e   : > { %v11018_v0 = vmov 0.0   ;;  %vm11019_vm0 = vmmov 0   ;;  %v630_v1 = vld [vmem:[%s14176_s2 + $0x38] sm:$0xff]  ;;  %v629_v2 = vld [vmem:[%s14176_s2 + $0x30] sm:$0xff]  ;;  %v628_v3 = vld [vmem:[%s14176_s2 + $0x28] sm:$0xff]  ;;  %vm638_vm1 = vcmask 523264   ;;  %v736_v10 = vlaneseq }
  0x6f   : > { %10991 = vsyncadd (%p14253_p2), [#allocation9], 4294966784  ;;  %9750 = vmatprep.subr.mxu1 %v11018_v0  ;;  %9766 = vmatprep.mubr.msk.f32.mxu1 %vm11019_vm0, %v11018_v0  ;;  %v627_v4 = vld [vmem:[%s14176_s2 + $0x20] sm:$0xff]  ;;  %v626_v5 = vld [vmem:[%s14176_s2 + $0x18] sm:$0xff]  ;;  %s9135_s29 = sshll.u32 %s11141_s25, 3  ;;  %s14254_s30 = sld [smem:[#allocation66_spill]] }
  0x70   : > { %9751 = vmatpush3.msra.mxu1 %v630_v1  ;;  %v625_v6 = vld [vmem:[%s14176_s2 + $0x10] sm:$0xff]  ;;  %v624_v7 = vld [vmem:[%s14176_s2 + $0x8] sm:$0xff]  ;;  %v623_v8 = vld [vmem:[%s14176_s2] sm:$0xff]  ;;  %p600_p4 = scmp.lt.s32.totalorder %s9135_s29, 15  ;;  %v11298_v11 = vshrl.u32 %v736_v10, 7  ;;  %vm791_vm3 = vcmask 261120  }
  0x71   : > { %9752 = vmatprep.subr.mxu1 %v11018_v0  ;;  %v622_v9 = vld [vmem:[%s11252_s15] sm:$0xff]  ;;  %vm1258_vm4 = vcmask 64512   ;;  %s11022_s17 = smov 88   ;;  %s11023_s16 = smov 120   ;;  %vm1981_vm6 = vcmask 130048   ;;  %vm7926_vm7 = vcmask 195584  }
  0x72   : > { %9753 = vmatpush3.msra.mxu1 %v629_v2  ;;  %s14377_s29 = smov (!%p600_p4, %s9135_s29), 15  ;;  %v9138_v12 = vld [vmem:[%s14177_s3] ss:$0 sm:$0xff]  ;;  %v11307_v16 = vsub.s32 0, %v11298_v11  ;;  %vm739_vm2 = vcmp.eq.s32.totalorder %v11298_v11, 0  ;;  %s11025_s15 = smov 80  }
  0x73   : > { %9754 = vmatprep.subr.mxu1 %v11018_v0  ;;  %s9392_s0 = sshll.u32 %s14377_s29, 4  ;;  %s11020_s29 = smov 96   ;;  %vm8974_vm8 = vcmask 1041409   ;;  %vm8977_vm9 = vcmask 1042434   ;;  %vm8980_vm10 = vcmask 1043459   ;;  %vm8983_vm11 = vcmask 1044484  }
  0x74   : > { %9755 = vmatpush3.msra.mxu1 %v628_v3  ;;  %s11026_s26 = smov 112   ;;  %s11027_s19 = smov 48   ;;  %vm8986_vm12 = vcmask 1045509   ;;  %vm8989_vm13 = vcmask 1046534   ;;  %vm8992_vm14 = vcmask 1047559  }
  0x75   : > { %9756 = vmatprep.subr.mxu1 %v11018_v0  ;;  %s11295_s18 = scalar_lea.vmem %s14254_s30, %s9392_s0  ;;  %s11021_s0 = smov 64  }
  0x76   : > { %9757 = vmatpush3.msra.mxu1 %v627_v4  ;;  %v606_v14 = vld [vmem:[%s11295_s18] sm:$0xff]  ;;  %v608_v18 = vld [vmem:[%s11295_s18 + $0x10] sm:$0xff]  ;;  %v11324_v30 = vld [vmem:[%s11295_s18 + $0x8] sm:$0xff]  ;;  %s11024_s30 = smov 56   ;;  %s11028_s21 = smov 72  }
  0x77   : > { %9758 = vmatprep.subr.mxu1 %v11018_v0  ;;  %v610_v19 = vld [vmem:[%s11295_s18 + $0x20] sm:$0xff]  ;;  %v612_v27 = vld [vmem:[%s11295_s18 + $0x30] sm:$0xff]  ;;  %v11333_v33 = vld [vmem:[%s11295_s18 + $0x18] sm:$0xff]  ;;  %v795_v38 = vsel %vm791_vm3, %v11324_v30, 0.0  ;;  %s11029_s23 = smov 104   ;;  %s11030_s6 = smov 40  }
  0x78   : > { %9759 = vmatpush3.msra.mxu1 %v626_v5  ;;  %v614_v39 = vld [vmem:[%s11295_s18 + $0x40] sm:$0xff]  ;;  %v801_v40 = vsel %vm791_vm3, %v11333_v33, 0.0  ;;  %v11349_v42 = vld [vmem:[%s11295_s18 + $0x28] sm:$0xff]  ;;  %v616_v46 = vld [vmem:[%s11295_s18 + $0x50] sm:$0xff]  ;;  %s11031_s8 = smov 8   ;;  %s11032_s27 = smov 16  }
  0x79   : > { %9760 = vmatprep.subr.mxu1 %v11018_v0  ;;  %v807_v48 = vsel %vm791_vm3, %v11349_v42, 0.0  ;;  %v11363_v50 = vld [vmem:[%s11295_s18 + $0x38] sm:$0xff]  ;;  %v618_v54 = vld [vmem:[%s11295_s18 + $0x60] sm:$0xff]  ;;  %v11377_v58 = vld [vmem:[%s11295_s18 + $0x48] sm:$0xff]  ;;  %p14366_p12 = scmp.ne.s32.totalorder %s14246_s28, 0 }
  0x7a   : > { %9761 = vmatpush3.msra.mxu1 %v625_v6  ;;  %v813_v56 = vsel %vm791_vm3, %v11363_v50, 0.0  ;;  %v620_v62 = vld [vmem:[%s11295_s18 + $0x70] sm:$0xff]  ;;  %v11391_v2 = vld [vmem:[%s11295_s18 + $0x58] sm:$0xff] }
  0x7b   : > { %9762 = vmatprep.subr.mxu1 %v11018_v0  ;;  %v825_v6 = vsel %vm791_vm3, %v11391_v2, 0.0 }
  0x7c   : > { %9763 = vmatpush3.msra.mxu1 %v624_v7 }
  0x7d   : > { %9764 = vmatprep.subr.mxu1 %v11018_v0  ;;  %v819_v0 = vsel %vm791_vm3, %v11377_v58, 0.0 }
  0x7e   : > { %9765 = vmatpush3.msra.mxu1 %v623_v8  ;;  %v11403_v8 = vld [vmem:[%s11295_s18 + $0x68] sm:$0xff] }
  0x7f   : > { %9767 = vmatmul.mubr.msk.f32.vlgmr.msra.gmra.mxu1 %vm638_vm1, %v622_v9 }
 0x13f   : > { %v708_v13 = vpop.f32.mrf.mxu1 }
 0x140   : > { %v11304_v15 = vadd.f32 %v9138_v12, %v708_v13  ;;  %v831_v13 = vsel %vm791_vm3, %v11403_v8, 0.0 }
 0x141   : > { %v9768_v17 = vpop.f32.mrf.mxu1 }
 0x142   : > { %v728_v20 = vmul.f32 %v11304_v15, %v606_v14  ;;  %v713_v21 = vrot.slane %v11304_v15, 1  ;;  %v714_v22 = vrot.slane %v11304_v15, 2  ;;  %v715_v26 = vrot.slane %v11304_v15, 3 }
 0x143   : > { %v716_v36 = vrot.slane %v11304_v15, 4  ;;  %v717_v45 = vrot.slane %v11304_v15, 5  ;;  %v718_v53 = vrot.slane %v11304_v15, 6  ;;  %v719_v61 = vrot.slane %v11304_v15, 7  ;;  %v11415_v15 = vld [vmem:[%s11295_s18 + $0x78] sm:$0xff] }
 0x144   : > { %v744_v23 = vrot.slane %v728_v20, %v11307_v16  ;;  %v729_v24 = vmul.f32 %v713_v21, %v608_v18  ;;  %v730_v25 = vmul.f32 %v714_v22, %v610_v19  ;;  %v731_v35 = vmul.f32 %v715_v26, %v612_v27 }
 0x145   : > { %v732_v44 = vmul.f32 %v716_v36, %v614_v39  ;;  %v733_v52 = vmul.f32 %v717_v45, %v616_v46  ;;  %v734_v60 = vmul.f32 %v718_v53, %v618_v54  ;;  %v735_v4 = vmul.f32 %v719_v61, %v620_v62 }
 0x146   : > { %v11320_v28 = vsel %vm739_vm2, %v744_v23, %v606_v14  ;;  %v748_v29 = vrot.slane %v729_v24, %v11307_v16  ;;  %v752_v34 = vrot.slane %v730_v25, %v11307_v16  ;;  %v756_v43 = vrot.slane %v731_v35, %v11307_v16 }
 0x147   : > { %14255 = vst [vmem:[#allocation20_spill] sm:$0xff] %v11320_v28  ;;  %v792_v31 = vsel %vm791_vm3, %v11320_v28, 0.0  ;;  %v760_v51 = vrot.slane %v732_v44, %v11307_v16  ;;  %v764_v59 = vrot.slane %v733_v52, %v11307_v16  ;;  %v768_v3 = vrot.slane %v734_v60, %v11307_v16 }
 0x148   : > { %793 = vadd.xlane.f32.xlu0 %v792_v31  ;;  %v11330_v32 = vsel %vm739_vm2, %v748_v29, %v608_v18  ;;  %v11346_v41 = vsel %vm739_vm2, %v752_v34, %v610_v19  ;;  %v11360_v49 = vsel %vm739_vm2, %v756_v43, %v612_v27  ;;  %v772_v9 = vrot.slane %v735_v4, %v11307_v16 }
 0x149   : > { %14256 = vst [vmem:[#allocation21_spill] sm:$0xff] %v11330_v32  ;;  %v798_v37 = vsel %vm791_vm3, %v11330_v32, 0.0  ;;  %14257 = vst [vmem:[#allocation22_spill] sm:$0xff] %v11346_v41  ;;  %v804_v47 = vsel %vm791_vm3, %v11346_v41, 0.0  ;;  %v810_v55 = vsel %vm791_vm3, %v11360_v49, 0.0  ;;  %v11374_v57 = vsel %vm739_vm2, %v760_v51, %v614_v39 }
 0x14a   : > { %799 = vadd.xlane.f32.xlu1 %v798_v37  ;;  %14258 = vst [vmem:[#allocation23_spill] sm:$0xff] %v11360_v49  ;;  %14259 = vst [vmem:[#allocation24_spill] sm:$0xff] %v11374_v57  ;;  %v816_v63 = vsel %vm791_vm3, %v11374_v57, 0.0  ;;  %v11388_v1 = vsel %vm739_vm2, %v764_v59, %v616_v46  ;;  %v11400_v7 = vsel %vm739_vm2, %v768_v3, %v618_v54  ;;  %v837_v16 = vsel %vm791_vm3, %v11415_v15, 0.0 }
 0x14b   : > { %14260 = vst [vmem:[#allocation25_spill] sm:$0xff] %v11388_v1  ;;  %v822_v5 = vsel %vm791_vm3, %v11388_v1, 0.0  ;;  %14261 = vst [vmem:[#allocation26_spill] sm:$0xff] %v11400_v7  ;;  %v828_v12 = vsel %vm791_vm3, %v11400_v7, 0.0  ;;  %v11412_v14 = vsel %vm739_vm2, %v772_v9, %v620_v62 }
 0x14c   : > { %796 = vadd.xlane.f32.xlu0 %v795_v38  ;;  %14262 = vst [vmem:[#allocation27_spill] sm:$0xff] %v11412_v14  ;;  %v834_v17 = vsel %vm791_vm3, %v11412_v14, 0.0 }
 0x14e   : > { %802 = vadd.xlane.f32.xlu1 %v801_v40 }
 0x150   : > { %805 = vadd.xlane.f32.xlu0 %v804_v47 }
 0x152   : > { %808 = vadd.xlane.f32.xlu1 %v807_v48 }
 0x154   : > { %811 = vadd.xlane.f32.xlu0 %v810_v55 }
 0x156   : > { %814 = vadd.xlane.f32.xlu1 %v813_v56 }
 0x158   : > { %817 = vadd.xlane.f32.xlu0 %v816_v63 }
 0x15a   : > { %820 = vadd.xlane.f32.xlu1 %v819_v0 }
 0x15c   : > { %823 = vadd.xlane.f32.xlu0 %v822_v5 }
 0x15e   : > { %826 = vadd.xlane.f32.xlu1 %v825_v6 }
 0x160   : > { %829 = vadd.xlane.f32.xlu0 %v828_v12 }
 0x162   : > { %832 = vadd.xlane.f32.xlu1 %v831_v13 }
 0x164   : > { %835 = vadd.xlane.f32.xlu0 %v834_v17 }
 0x166   : > { %838 = vadd.xlane.f32.xlu1 %v837_v16 }
 0x1d1   : > { %v794_v18 = vpop.xlane.xlu0 %793 }
 0x1d2   : > { %v841_v19 = vmul.f32 0.03125, %v794_v18 }
 0x1d3   : > { %v800_v20 = vpop.xlane.xlu1 %799 }
 0x1d4   : > { %v11422_v21 = vsub.f32 %v11320_v28, %v841_v19  ;;  %v843_v11 = vmul.f32 0.03125, %v800_v20 }
 0x1d5   : > { %v797_v22 = vpop.xlane.xlu0 %796 }
 0x1d6   : > { %v11425_v23 = vsub.f32 %v11330_v32, %v843_v11  ;;  %v842_v24 = vmul.f32 0.03125, %v797_v22  ;;  %v873_v25 = vmul.f32 %v11422_v21, %v11422_v21 }
 0x1d7   : > { %v803_v26 = vpop.xlane.xlu1 %802 }
 0x1d8   : > { %v11430_v27 = vsub.f32 %v11324_v30, %v842_v24  ;;  %v844_v29 = vmul.f32 0.03125, %v803_v26  ;;  %v889_v31 = vsel %vm791_vm3, %v873_v25, 0.0  ;;  %v875_v34 = vmul.f32 %v11425_v23, %v11425_v23 }
 0x1d9   : > { %890 = vadd.xlane.f32.xlu0 %v889_v31  ;;  %v806_v35 = vpop.xlane.xlu0 %805 }
 0x1da   : > { %v11436_v36 = vsub.f32 %v11333_v33, %v844_v29  ;;  %v845_v37 = vmul.f32 0.03125, %v806_v35  ;;  %v874_v38 = vmul.f32 %v11430_v27, %v11430_v27  ;;  %v895_v40 = vsel %vm791_vm3, %v875_v34, 0.0 }
 0x1db   : > { %v809_v39 = vpop.xlane.xlu1 %808 }
 0x1dc   : > { %v11442_v30 = vsub.f32 %v11346_v41, %v845_v37  ;;  %v846_v43 = vmul.f32 0.03125, %v809_v39  ;;  %v892_v44 = vsel %vm791_vm3, %v874_v38, 0.0  ;;  %v876_v45 = vmul.f32 %v11436_v36, %v11436_v36 }
 0x1dd   : > { %896 = vadd.xlane.f32.xlu0 %v895_v40  ;;  %893 = vadd.xlane.f32.xlu1 %v892_v44  ;;  %v812_v33 = vpop.xlane.xlu0 %811 }
 0x1de   : > { %v11448_v46 = vsub.f32 %v11349_v42, %v846_v43  ;;  %v847_v47 = vmul.f32 0.03125, %v812_v33  ;;  %v898_v48 = vsel %vm791_vm3, %v876_v45, 0.0  ;;  %v877_v51 = vmul.f32 %v11442_v30, %v11442_v30 }
 0x1df   : > { %v815_v52 = vpop.xlane.xlu1 %814 }
 0x1e0   : > { %v11454_v53 = vsub.f32 %v11360_v49, %v847_v47  ;;  %v848_v54 = vmul.f32 0.03125, %v815_v52  ;;  %v901_v55 = vsel %vm791_vm3, %v877_v51, 0.0  ;;  %v878_v56 = vmul.f32 %v11448_v46, %v11448_v46 }
 0x1e1   : > { %899 = vadd.xlane.f32.xlu1 %v898_v48  ;;  %902 = vadd.xlane.f32.xlu0 %v901_v55  ;;  %v818_v42 = vpop.xlane.xlu0 %817 }
 0x1e2   : > { %v11460_v59 = vsub.f32 %v11363_v50, %v848_v54  ;;  %v849_v60 = vmul.f32 0.03125, %v818_v42  ;;  %v904_v61 = vsel %vm791_vm3, %v878_v56, 0.0  ;;  %v879_v62 = vmul.f32 %v11454_v53, %v11454_v53  ;;  %v1048_v56 = vld [vmem:[#allocation5 + $0x18] sm:$0xff]  ;;  %v1046_v42 = vld [vmem:[#allocation5 + $0x8] sm:$0xff] }
 0x1e3   : > { %v821_v63 = vpop.xlane.xlu1 %820  ;;  %9769 = vmatprep.subr.mxu1 %v1048_v56 }
 0x1e4   : > { %v11466_v0 = vsub.f32 %v11374_v57, %v849_v60  ;;  %v850_v3 = vmul.f32 0.03125, %v821_v63  ;;  %v907_v4 = vsel %vm791_vm3, %v879_v62, 0.0  ;;  %v880_v5 = vmul.f32 %v11460_v59, %v11460_v59  ;;  %9770 = vmatpush3.msra.mxu1 %v1048_v56  ;;  %v1045_v60 = vld [vmem:[#allocation5] sm:$0xff] }
 0x1e5   : > { %905 = vadd.xlane.f32.xlu1 %v904_v61  ;;  %908 = vadd.xlane.f32.xlu0 %v907_v4  ;;  %v824_v50 = vpop.xlane.xlu0 %823 }
 0x1e6   : > { %v11472_v6 = vsub.f32 %v11377_v58, %v850_v3  ;;  %v851_v9 = vmul.f32 0.03125, %v824_v50  ;;  %v910_v12 = vsel %vm791_vm3, %v880_v5, 0.0  ;;  %v881_v13 = vmul.f32 %v11466_v0, %v11466_v0 }
 0x1e7   : > { %v827_v17 = vpop.xlane.xlu1 %826 }
 0x1e8   : > { %v11478_v16 = vsub.f32 %v11388_v1, %v851_v9  ;;  %v852_v18 = vmul.f32 0.03125, %v827_v17  ;;  %v913_v19 = vsel %vm791_vm3, %v881_v13, 0.0  ;;  %v882_v20 = vmul.f32 %v11472_v6, %v11472_v6 }
 0x1e9   : > { %911 = vadd.xlane.f32.xlu1 %v910_v12  ;;  %914 = vadd.xlane.f32.xlu0 %v913_v19  ;;  %v830_v58 = vpop.xlane.xlu0 %829 }
 0x1ea   : > { %v11484_v11 = vsub.f32 %v11391_v2, %v852_v18  ;;  %v853_v22 = vmul.f32 0.03125, %v830_v58  ;;  %v916_v24 = vsel %vm791_vm3, %v882_v20, 0.0  ;;  %v883_v25 = vmul.f32 %v11478_v16, %v11478_v16 }
 0x1eb   : > { %v833_v26 = vpop.xlane.xlu1 %832 }
 0x1ec   : > { %v11490_v29 = vsub.f32 %v11400_v7, %v853_v22  ;;  %v854_v31 = vmul.f32 0.03125, %v833_v26  ;;  %v919_v34 = vsel %vm791_vm3, %v883_v25, 0.0  ;;  %v884_v35 = vmul.f32 %v11484_v11, %v11484_v11 }
 0x1ed   : > { %917 = vadd.xlane.f32.xlu1 %v916_v24  ;;  %920 = vadd.xlane.f32.xlu0 %v919_v34  ;;  %v836_v2 = vpop.xlane.xlu0 %835 }
 0x1ee   : > { %v11496_v37 = vsub.f32 %v11403_v8, %v854_v31  ;;  %v855_v38 = vmul.f32 0.03125, %v836_v2  ;;  %v922_v39 = vsel %vm791_vm3, %v884_v35, 0.0  ;;  %v885_v40 = vmul.f32 %v11490_v29, %v11490_v29 }
 0x1ef   : > { %v839_v43 = vpop.xlane.xlu1 %838 }
 0x1f0   : > { %v11502_v44 = vsub.f32 %v11412_v14, %v855_v38  ;;  %v856_v45 = vmul.f32 0.03125, %v839_v43  ;;  %v925_v33 = vsel %vm791_vm3, %v885_v40, 0.0  ;;  %v886_v47 = vmul.f32 %v11496_v37, %v11496_v37  ;;  %v11520_v43 = vld [vmem:[%s14178_s4] ss:$0 sm:$0xff] }
 0x1f1   : > { %923 = vadd.xlane.f32.xlu1 %v922_v39  ;;  %926 = vadd.xlane.f32.xlu0 %v925_v33 }
 0x1f2   : > { %v11508_v8 = vsub.f32 %v11415_v15, %v856_v45  ;;  %v928_v48 = vsel %vm791_vm3, %v886_v47, 0.0  ;;  %v887_v51 = vmul.f32 %v11502_v44, %v11502_v44  ;;  %v1047_v15 = vld [vmem:[#allocation5 + $0x10] sm:$0xff] }
 0x1f3   : > { %9771 = vmatprep.subr.mxu1 %v1047_v15 }
 0x1f4   : > { %v931_v52 = vsel %vm791_vm3, %v887_v51, 0.0  ;;  %v888_v54 = vmul.f32 %v11508_v8, %v11508_v8  ;;  %9772 = vmatpush3.msra.mxu1 %v1047_v15 }
 0x1f5   : > { %929 = vadd.xlane.f32.xlu1 %v928_v48  ;;  %932 = vadd.xlane.f32.xlu0 %v931_v52  ;;  %v11526_v52 = vld [vmem:[%s14179_s5] ss:$0 sm:$0xff] }
 0x1f6   : > { %v934_v55 = vsel %vm791_vm3, %v888_v54, 0.0  ;;  %9773 = vmatprep.subr.mxu1 %v1046_v42 }
 0x1f7   : > { %9774 = vmatpush3.msra.mxu1 %v1046_v42 }
 0x1f8   : > { %9775 = vmatprep.subr.mxu1 %v1045_v60 }
 0x1f9   : > { %935 = vadd.xlane.f32.xlu1 %v934_v55  ;;  %9776 = vmatpush3.msra.mxu1 %v1045_v60 }
 0x262   : > { %v891_v61 = vpop.xlane.xlu0 %890 }
 0x263   : > { %v937_v62 = vmul.f32 0.03125, %v891_v61 }
 0x265   : > { %v953_v63 = vadd.f32 1e-06, %v937_v62 }
 0x266   : > { %v894_v3 = vpop.xlane.xlu1 %893  ;;  %v897_v4 = vpop.xlane.xlu0 %896 }
 0x267   : > { %10464 = vrsqrt.f32 %v953_v63  ;;  %v938_v5 = vmul.f32 0.03125, %v894_v3  ;;  %v939_v50 = vmul.f32 0.03125, %v897_v4 }
 0x269   : > { %v954_v9 = vadd.f32 1e-06, %v938_v5  ;;  %v955_v12 = vadd.f32 1e-06, %v939_v50 }
 0x26a   : > { %v900_v13 = vpop.xlane.xlu1 %899  ;;  %v903_v17 = vpop.xlane.xlu0 %902 }
 0x26b   : > { %10466 = vrsqrt.f32 %v954_v9  ;;  %v940_v18 = vmul.f32 0.03125, %v900_v13  ;;  %v941_v19 = vmul.f32 0.03125, %v903_v17 }
 0x26c   : > { %10468 = vrsqrt.f32 %v955_v12 }
 0x26d   : > { %v956_v20 = vadd.f32 1e-06, %v940_v18  ;;  %v957_v58 = vadd.f32 1e-06, %v941_v19 }
 0x26e   : > { %v906_v22 = vpop.xlane.xlu1 %905  ;;  %v909_v24 = vpop.xlane.xlu0 %908 }
 0x26f   : > { %10470 = vrsqrt.f32 %v956_v20  ;;  %v942_v25 = vmul.f32 0.03125, %v906_v22  ;;  %v943_v26 = vmul.f32 0.03125, %v909_v24 }
 0x270   : > { %10472 = vrsqrt.f32 %v957_v58 }
 0x271   : > { %v958_v31 = vadd.f32 1e-06, %v942_v25  ;;  %v959_v34 = vadd.f32 1e-06, %v943_v26 }
 0x272   : > { %v912_v35 = vpop.xlane.xlu1 %911  ;;  %v915_v2 = vpop.xlane.xlu0 %914 }
 0x273   : > { %10474 = vrsqrt.f32 %v958_v31  ;;  %v944_v38 = vmul.f32 0.03125, %v912_v35  ;;  %v945_v39 = vmul.f32 0.03125, %v915_v2 }
 0x274   : > { %v10465_v40 = vpop.eup %10464  ;;  %10476 = vrsqrt.f32 %v959_v34 }
 0x275   : > { %v960_v45 = vadd.f32 1e-06, %v944_v38  ;;  %v961_v33 = vadd.f32 1e-06, %v945_v39  ;;  %v985_v47 = vmul.f32 %v10465_v40, %v11422_v21 }
 0x276   : > { %v918_v48 = vpop.xlane.xlu1 %917  ;;  %v921_v51 = vpop.xlane.xlu0 %920 }
 0x277   : > { %10478 = vrsqrt.f32 %v960_v45  ;;  %v946_v54 = vmul.f32 0.03125, %v918_v48  ;;  %v947_v55 = vmul.f32 0.03125, %v921_v51  ;;  %v1007_v56 = vmul.f32 %v11520_v43, %v985_v47 }
 0x278   : > { %v10467_v15 = vpop.eup %10466  ;;  %10480 = vrsqrt.f32 %v961_v33 }
 0x279   : > { %v10469_v42 = vpop.eup %10468  ;;  %v962_v60 = vadd.f32 1e-06, %v946_v54  ;;  %v963_v61 = vadd.f32 1e-06, %v947_v55  ;;  %v1029_v62 = vadd.f32 %v11526_v52, %v1007_v56  ;;  %v986_v21 = vmul.f32 %v10467_v15, %v11430_v27 }
 0x27a   : > { %v924_v63 = vpop.xlane.xlu1 %923  ;;  %v927_v3 = vpop.xlane.xlu0 %926  ;;  %v987_v4 = vmul.f32 %v10469_v42, %v11425_v23 }
 0x27b   : > { %10482 = vrsqrt.f32 %v962_v60  ;;  %v948_v5 = vmul.f32 0.03125, %v924_v63  ;;  %v949_v50 = vmul.f32 0.03125, %v927_v3  ;;  %9777 = vmatprep.mubr.msk.f32.mxu1 %vm791_vm3, %v1029_v62  ;;  %v1008_v9 = vmul.f32 %v11520_v43, %v986_v21 }
 0x27c   : > { %v10471_v12 = vpop.eup %10470  ;;  %10484 = vrsqrt.f32 %v963_v61  ;;  %v1009_v13 = vmul.f32 %v11520_v43, %v987_v4 }
 0x27d   : > { %v10473_v17 = vpop.eup %10472  ;;  %v964_v18 = vadd.f32 1e-06, %v948_v5  ;;  %v965_v19 = vadd.f32 1e-06, %v949_v50  ;;  %v1030_v27 = vadd.f32 %v11526_v52, %v1008_v9  ;;  %v988_v20 = vmul.f32 %v10471_v12, %v11436_v36 }
 0x27e   : > { %v930_v58 = vpop.xlane.xlu1 %929  ;;  %v933_v23 = vpop.xlane.xlu0 %932  ;;  %v1031_v22 = vadd.f32 %v11526_v52, %v1009_v13  ;;  %v989_v24 = vmul.f32 %v10473_v17, %v11442_v30 }
 0x27f   : > { %10486 = vrsqrt.f32 %v964_v18  ;;  %v950_v25 = vmul.f32 0.03125, %v930_v58  ;;  %v951_v26 = vmul.f32 0.03125, %v933_v23  ;;  %9778 = vmatmul.mubr.msk.f32.vlgmr.msra.gmra.mxu1 %vm791_vm3, %v1030_v27  ;;  %v1010_v31 = vmul.f32 %v11520_v43, %v988_v20 }
 0x280   : > { %v10475_v34 = vpop.eup %10474  ;;  %10488 = vrsqrt.f32 %v965_v19  ;;  %9780 = vmatprep.mubr.msk.f32.mxu1 %vm791_vm3, %v1031_v22  ;;  %v1011_v35 = vmul.f32 %v11520_v43, %v989_v24 }
 0x281   : > { %v10477_v36 = vpop.eup %10476  ;;  %v966_v2 = vadd.f32 1e-06, %v950_v25  ;;  %v967_v38 = vadd.f32 1e-06, %v951_v26  ;;  %v1032_v39 = vadd.f32 %v11526_v52, %v1010_v31  ;;  %v990_v30 = vmul.f32 %v10475_v34, %v11448_v46  ;;  %v9142_v34 = vld [vmem:[%s14181_s7] ss:$0 sm:$0xff] }
 0x282   : > { %v936_v40 = vpop.xlane.xlu1 %935  ;;  %v1033_v45 = vadd.f32 %v11526_v52, %v1011_v35  ;;  %v991_v33 = vmul.f32 %v10477_v36, %v11454_v53 }
 0x283   : > { %10490 = vrsqrt.f32 %v966_v2  ;;  %v952_v47 = vmul.f32 0.03125, %v936_v40  ;;  %9781 = vmatmul.mubr.msk.f32.gmra.mxu1 %vm791_vm3, %v1032_v39  ;;  %v1012_v48 = vmul.f32 %v11520_v43, %v990_v30 }
 0x284   : > { %v10479_v51 = vpop.eup %10478  ;;  %10492 = vrsqrt.f32 %v967_v38  ;;  %9783 = vmatprep.mubr.msk.f32.mxu1 %vm791_vm3, %v1033_v45  ;;  %v1013_v54 = vmul.f32 %v11520_v43, %v991_v33 }
 0x285   : > { %v10481_v55 = vpop.eup %10480  ;;  %v968_v56 = vadd.f32 1e-06, %v952_v47  ;;  %v1034_v46 = vadd.f32 %v11526_v52, %v1012_v48  ;;  %v992_v15 = vmul.f32 %v10479_v51, %v11460_v59 }
 0x286   : > { %v1035_v53 = vadd.f32 %v11526_v52, %v1013_v54  ;;  %v993_v42 = vmul.f32 %v10481_v55, %v11466_v0 }
 0x287   : > { %10494 = vrsqrt.f32 %v968_v56  ;;  %9784 = vmatmul.mubr.msk.f32.gmra.mxu1 %vm791_vm3, %v1034_v46  ;;  %v1014_v60 = vmul.f32 %v11520_v43, %v992_v15 }
 0x288   : > { %v10483_v61 = vpop.eup %10482  ;;  %9786 = vmatprep.mubr.msk.f32.mxu1 %vm791_vm3, %v1035_v53  ;;  %v1015_v62 = vmul.f32 %v11520_v43, %v993_v42 }
 0x289   : > { %v10485_v21 = vpop.eup %10484  ;;  %v1036_v63 = vadd.f32 %v11526_v52, %v1014_v60  ;;  %v994_v3 = vmul.f32 %v10483_v61, %v11472_v6 }
 0x28a   : > { %v1037_v59 = vadd.f32 %v11526_v52, %v1015_v62  ;;  %v995_v4 = vmul.f32 %v10485_v21, %v11478_v16 }
 0x28b   : > { %9787 = vmatmul.mubr.msk.f32.gmra.mxu1 %vm791_vm3, %v1036_v63  ;;  %v1016_v0 = vmul.f32 %v11520_v43, %v994_v3 }
 0x28c   : > { %v10487_v5 = vpop.eup %10486  ;;  %9789 = vmatprep.mubr.msk.f32.mxu1 %vm791_vm3, %v1037_v59  ;;  %v1017_v50 = vmul.f32 %v11520_v43, %v995_v4 }
 0x28d   : > { %v10489_v9 = vpop.eup %10488  ;;  %v1038_v12 = vadd.f32 %v11526_v52, %v1016_v0  ;;  %v996_v13 = vmul.f32 %v10487_v5, %v11484_v11 }
 0x28e   : > { %v1039_v6 = vadd.f32 %v11526_v52, %v1017_v50  ;;  %v997_v17 = vmul.f32 %v10489_v9, %v11490_v29 }
 0x28f   : > { %9790 = vmatmul.mubr.msk.f32.gmra.mxu1 %vm791_vm3, %v1038_v12  ;;  %v1018_v16 = vmul.f32 %v11520_v43, %v996_v13 }
 0x290   : > { %v10491_v18 = vpop.eup %10490  ;;  %9792 = vmatprep.mubr.msk.f32.mxu1 %vm791_vm3, %v1039_v6  ;;  %v1019_v19 = vmul.f32 %v11520_v43, %v997_v17 }
 0x291   : > { %v10493_v27 = vpop.eup %10492  ;;  %v1040_v20 = vadd.f32 %v11526_v52, %v1018_v16  ;;  %v998_v58 = vmul.f32 %v10491_v18, %v11496_v37 }
 0x292   : > { %v1041_v11 = vadd.f32 %v11526_v52, %v1019_v19  ;;  %v999_v23 = vmul.f32 %v10493_v27, %v11502_v44 }
 0x293   : > { %9793 = vmatmul.mubr.msk.f32.gmra.mxu1 %vm791_vm3, %v1040_v20  ;;  %v1020_v29 = vmul.f32 %v11520_v43, %v998_v58 }
 0x294   : > { %v10495_v22 = vpop.eup %10494  ;;  %9795 = vmatprep.mubr.msk.f32.mxu1 %vm791_vm3, %v1041_v11  ;;  %v1021_v24 = vmul.f32 %v11520_v43, %v999_v23 }
 0x295   : > { %v1042_v25 = vadd.f32 %v11526_v52, %v1020_v29  ;;  %v1000_v26 = vmul.f32 %v10495_v22, %v11508_v8 }
 0x296   : > { %v1043_v31 = vadd.f32 %v11526_v52, %v1021_v24 }
 0x297   : > { %9796 = vmatmul.mubr.msk.f32.gmra.mxu1 %vm791_vm3, %v1042_v25  ;;  %v1022_v37 = vmul.f32 %v11520_v43, %v1000_v26 }
 0x298   : > { %9798 = vmatprep.mubr.msk.f32.mxu1 %vm791_vm3, %v1043_v31 }
 0x299   : > { %v1044_v44 = vadd.f32 %v11526_v52, %v1022_v37 }
 0x29b   : > { %9799 = vmatmul.mubr.msk.f32.gmra.mxu1 %vm791_vm3, %v1044_v44 }
 0x33f   : > { %v9779_v35 = vpop.f32.mrf.mxu1 }
 0x340   : > { %v11594_v36 = vadd.f32 %v9779_v35, %v9142_v34 }
 0x341   : > { %v1170_v8 = vpop.f32.mrf.mxu1 }
 0x342   : > { %14263 = vst [vmem:[#allocation28_spill] sm:$0xff] %v11594_v36  ;;  %v11596_v2 = vadd.f32 %v9142_v34, %v1170_v8  ;;  %1256 = vrot.lane.b32.xlu0 %v11594_v36, %s11020_s29 }
 0x343   : > { %v9782_v43 = vpop.f32.mrf.mxu1 }
 0x344   : > { %14264 = vst [vmem:[#allocation29_spill] sm:$0xff] %v11596_v2  ;;  %1254 = vrot.lane.b32.xlu1 %v11596_v2, %s11020_s29  ;;  %9805 = vmatprep.mubr.msk.f32.mxu0 %vm1258_vm4, %v11596_v2  ;;  %v11604_v38 = vadd.f32 %v9782_v43, %v9142_v34 }
 0x345   : > { %v1180_v52 = vpop.f32.mrf.mxu1 }
 0x346   : > { %14265 = vst [vmem:[#allocation30_spill] sm:$0xff] %v11604_v38  ;;  %v11610_v45 = vadd.f32 %v9142_v34, %v1180_v52 }
 0x347   : > { %v9785_v39 = vpop.f32.mrf.mxu1 }
 0x348   : > { %v11606_v30 = vadd.f32 %v9785_v39, %v9142_v34  ;;  %1346 = vrot.lane.b32.xlu1 %v11604_v38, %s11020_s29  ;;  %14266 = vst [vmem:[#allocation31_spill] sm:$0xff] %v11610_v45 }
 0x349   : > { %v1190_v40 = vpop.f32.mrf.mxu1 }
 0x34a   : > { %1435 = vrot.lane.b32.xlu0 %v11606_v30, %s11020_s29  ;;  %v11618_v51 = vadd.f32 %v9142_v34, %v1190_v40 }
 0x34b   : > { %v9788_v33 = vpop.f32.mrf.mxu1 }
 0x34c   : > { %v11614_v47 = vadd.f32 %v9788_v33, %v9142_v34  ;;  %1344 = vrot.lane.b32.xlu1 %v11610_v45, %s11020_s29 }
 0x34d   : > { %v1200_v48 = vpop.f32.mrf.mxu1 }
 0x34e   : > { %v11620_v54 = vadd.f32 %v9142_v34, %v1200_v48  ;;  %1524 = vrot.lane.b32.xlu0 %v11614_v47, %s11020_s29 }
 0x34f   : > { %v9791_v55 = vpop.f32.mrf.mxu1 }
 0x350   : > { %v11624_v56 = vadd.f32 %v9791_v55, %v9142_v34  ;;  %1433 = vrot.lane.b32.xlu1 %v11618_v51, %s11020_s29  ;;  %9826 = vmatprep.mubr.msk.f32.mxu1 %vm1258_vm4, %v11620_v54 }
 0x351   : > { %v1210_v46 = vpop.f32.mrf.mxu1 }
 0x352   : > { %1613 = vrot.lane.b32.xlu0 %v11624_v56, %s11020_s29  ;;  %v11636_v60 = vadd.f32 %v9142_v34, %v1210_v46 }
 0x353   : > { %v9794_v15 = vpop.f32.mrf.mxu1 }
 0x354   : > { %v11632_v53 = vadd.f32 %v9794_v15, %v9142_v34  ;;  %1522 = vrot.lane.b32.xlu1 %v11620_v54, %s11020_s29 }
 0x355   : > { %v1220_v42 = vpop.f32.mrf.mxu1 }
 0x356   : > { %1702 = vrot.lane.b32.xlu0 %v11632_v53, %s11020_s29  ;;  %v11644_v63 = vadd.f32 %v9142_v34, %v1220_v42 }
 0x357   : > { %v9797_v61 = vpop.f32.mrf.mxu1 }
 0x358   : > { %v11640_v62 = vadd.f32 %v9797_v61, %v9142_v34  ;;  %1611 = vrot.lane.b32.xlu1 %v11636_v60, %s11020_s29 }
 0x359   : > { %v1230_v21 = vpop.f32.mrf.mxu1 }
 0x35a   : > { %1791 = vrot.lane.b32.xlu0 %v11640_v62, %s11020_s29  ;;  %v11652_v4 = vadd.f32 %v9142_v34, %v1230_v21 }
 0x35b   : > { %v9800_v3 = vpop.f32.mrf.mxu1 }
 0x35c   : > { %v11648_v59 = vadd.f32 %v9800_v3, %v9142_v34  ;;  %1700 = vrot.lane.b32.xlu1 %v11644_v63, %s11020_s29 }
 0x35d   : > { %v1240_v0 = vpop.f32.mrf.mxu1 }
 0x35e   : > { %14267 = vst [vmem:[#allocation32_spill] sm:$0xff] %v11648_v59  ;;  %1880 = vrot.lane.b32.xlu0 %v11648_v59, %s11020_s29  ;;  %v11658_v5 = vadd.f32 %v9142_v34, %v1240_v0  ;;  %v11765_v34 = vand.u32 127, %v736_v10 }
 0x360   : > { %1789 = vrot.lane.b32.xlu1 %v11652_v4, %s11020_s29  ;;  %14268 = vst [vmem:[#allocation33_spill] sm:$0xff] %v11658_v5  ;;  %14269 = vst [vmem:[#allocation34_spill] sm:$0xff] %v11765_v34  ;;  %vm1251_vm5 = vcmp.lt.s32.totalorder %v11765_v34, 9 }
 0x362   : > { %2160 = vrot.lane.b32.xlu0 %v11594_v36, %s11021_s0 }
 0x364   : > { %1878 = vrot.lane.b32.xlu1 %v11658_v5, %s11020_s29  ;;  %s11033_s29 = smov 24  }
 0x366   : > { %2245 = vrot.lane.b32.xlu0 %v11610_v45, %s11021_s0 }
 0x368   : > { %2158 = vrot.lane.b32.xlu1 %v11596_v2, %s11021_s0 }
 0x36a   : > { %2421 = vrot.lane.b32.xlu0 %v11614_v47, %s11021_s0 }
 0x36c   : > { %2247 = vrot.lane.b32.xlu1 %v11604_v38, %s11021_s0 }
 0x36e   : > { %2419 = vrot.lane.b32.xlu0 %v11620_v54, %s11021_s0 }
 0x370   : > { %2334 = vrot.lane.b32.xlu1 %v11606_v30, %s11021_s0 }
 0x372   : > { %2595 = vrot.lane.b32.xlu0 %v11632_v53, %s11021_s0 }
 0x374   : > { %2332 = vrot.lane.b32.xlu1 %v11618_v51, %s11021_s0 }
 0x376   : > { %2593 = vrot.lane.b32.xlu0 %v11644_v63, %s11021_s0 }
 0x378   : > { %2508 = vrot.lane.b32.xlu1 %v11624_v56, %s11021_s0 }
 0x37a   : > { %2769 = vrot.lane.b32.xlu0 %v11648_v59, %s11021_s0 }
 0x37c   : > { %2506 = vrot.lane.b32.xlu1 %v11636_v60, %s11021_s0 }
 0x37e   : > { %2951 = vrot.lane.b32.xlu0 %v11604_v38, %s11022_s17 }
 0x380   : > { %2682 = vrot.lane.b32.xlu1 %v11640_v62, %s11021_s0 }
 0x382   : > { %2949 = vrot.lane.b32.xlu0 %v11610_v45, %s11022_s17 }
 0x384   : > { %2680 = vrot.lane.b32.xlu1 %v11652_v4, %s11021_s0 }
 0x386   : > { %2856 = vrot.lane.b32.xlu0 %v11594_v36, %s11023_s16 }
 0x388   : > { %2860 = vrot.lane.b32.xlu1 %v11594_v36, %s11022_s17 }
 0x38a   : > { %3040 = vrot.lane.b32.xlu0 %v11618_v51, %s11022_s17 }
 0x38c   : > { %2858 = vrot.lane.b32.xlu1 %v11596_v2, %s11022_s17 }
 0x38e   : > { %2767 = vrot.lane.b32.xlu0 %v11658_v5, %s11021_s0 }
 0x390   : > { %2854 = vrot.lane.b32.xlu1 %v11596_v2, %s11023_s16 }
 0x394   : > { %3042 = vrot.lane.b32.xlu1 %v11606_v30, %s11022_s17 }
 0x398   : > { %2945 = vrot.lane.b32.xlu1 %v11610_v45, %s11023_s16 }
 0x39c   : > { %3133 = vrot.lane.b32.xlu1 %v11614_v47, %s11022_s17 }
 0x3b4   : > { %v1257_v50 = vpop.permute.xlu0 %1256 }
 0x3b5   : > { %9801 = vmatprep.subr.msk.mxu0 %vm1258_vm4, %v1257_v50 }
 0x3b6   : > { %v1255_v9 = vpop.permute.xlu1 %1254  ;;  %9802 = vmatpush3.xpose.msk.msra.mxu0 %vm1258_vm4, %v1257_v50 }
 0x3b7   : > { %9803 = vmatprep.subr.msk.mxu0 %vm1258_vm4, %v1255_v9 }
 0x3ba   : > { %v1347_v12 = vpop.permute.xlu1 %1346  ;;  %9804 = vmatpush3.xpose.msk.msra.mxu0 %vm1258_vm4, %v1255_v9 }
 0x3bb   : > { %9808 = vmatprep.subr.msk.mxu0 %vm1258_vm4, %v1347_v12 }
 0x3bc   : > { %v1436_v13 = vpop.permute.xlu0 %1435 }
 0x3bd   : > { %9806 = vmatmul.mubr.msk.f32.vlgmr.msra.gmra.mxu0 %vm1258_vm4, %v11594_v36 }
 0x3be   : > { %v1345_v6 = vpop.permute.xlu1 %1344  ;;  %9809 = vmatpush3.xpose.msk.msra.mxu0 %vm1258_vm4, %v1347_v12  ;;  %9812 = vmatprep.mubr.msk.f32.mxu0 %vm1258_vm4, %v11610_v45 }
 0x3bf   : > { %9810 = vmatprep.subr.msk.mxu0 %vm1258_vm4, %v1345_v6 }
 0x3c0   : > { %v1525_v17 = vpop.permute.xlu0 %1524 }
 0x3c1   : > { %9822 = vmatprep.subr.msk.mxu1 %vm1258_vm4, %v1525_v17 }
 0x3c2   : > { %v1434_v16 = vpop.permute.xlu1 %1433  ;;  %9811 = vmatpush3.xpose.msk.msra.mxu0 %vm1258_vm4, %v1345_v6  ;;  %9823 = vmatpush3.xpose.msk.msra.mxu1 %vm1258_vm4, %v1525_v17 }
 0x3c3   : > { %9815 = vmatprep.subr.msk.mxu0 %vm1258_vm4, %v1436_v13 }
 0x3c4   : > { %v1614_v18 = vpop.permute.xlu0 %1613 }
 0x3c5   : > { %9813 = vmatmul.mubr.msk.f32.vlgmr.msra.gmra.mxu0 %vm1258_vm4, %v11604_v38 }
 0x3c6   : > { %v1523_v19 = vpop.permute.xlu1 %1522  ;;  %9816 = vmatpush3.xpose.msk.msra.mxu0 %vm1258_vm4, %v1436_v13  ;;  %9819 = vmatprep.mubr.msk.f32.mxu0 %vm1258_vm4, %v11618_v51 }
 0x3c7   : > { %9817 = vmatprep.subr.msk.mxu0 %vm1258_vm4, %v1434_v16  ;;  %9824 = vmatprep.subr.msk.mxu1 %vm1258_vm4, %v1523_v19 }
 0x3c8   : > { %9825 = vmatpush3.xpose.msk.msra.mxu1 %vm1258_vm4, %v1523_v19  ;;  %v1703_v27 = vpop.permute.xlu0 %1702 }
 0x3c9   : > { %9836 = vmatprep.subr.msk.mxu1 %vm1258_vm4, %v1703_v27 }
 0x3ca   : > { %v1612_v20 = vpop.permute.xlu1 %1611  ;;  %9818 = vmatpush3.xpose.msk.msra.mxu0 %vm1258_vm4, %v1434_v16 }
 0x3cb   : > { %9827 = vmatmul.mubr.msk.f32.vlgmr.msra.gmra.mxu1 %vm1258_vm4, %v11614_v47  ;;  %9829 = vmatprep.subr.msk.mxu0 %vm1258_vm4, %v1614_v18 }
 0x3cc   : > { %9837 = vmatpush3.xpose.msk.msra.mxu1 %vm1258_vm4, %v1703_v27  ;;  %9840 = vmatprep.mubr.msk.f32.mxu1 %vm1258_vm4, %v11644_v63  ;;  %v1792_v58 = vpop.permute.xlu0 %1791 }
 0x3cd   : > { %9820 = vmatmul.mubr.msk.f32.vlgmr.msra.gmra.mxu0 %vm1258_vm4, %v11606_v30 }
 0x3ce   : > { %v1701_v11 = vpop.permute.xlu1 %1700  ;;  %9830 = vmatpush3.xpose.msk.msra.mxu0 %vm1258_vm4, %v1614_v18  ;;  %9833 = vmatprep.mubr.msk.f32.mxu0 %vm1258_vm4, %v11636_v60 }
 0x3cf   : > { %9831 = vmatprep.subr.msk.mxu0 %vm1258_vm4, %v1612_v20  ;;  %9838 = vmatprep.subr.msk.mxu1 %vm1258_vm4, %v1701_v11 }
 0x3d0   : > { %9839 = vmatpush3.xpose.msk.msra.mxu1 %vm1258_vm4, %v1701_v11  ;;  %v1881_v23 = vpop.permute.xlu0 %1880 }
 0x3d1   : > { %9850 = vmatprep.subr.msk.mxu1 %vm1258_vm4, %v1881_v23 }
 0x3d2   : > { %v1790_v29 = vpop.permute.xlu1 %1789  ;;  %9832 = vmatpush3.xpose.msk.msra.mxu0 %vm1258_vm4, %v1612_v20 }
 0x3d3   : > { %9841 = vmatmul.mubr.msk.f32.vlgmr.msra.gmra.mxu1 %vm1258_vm4, %v11632_v53  ;;  %9843 = vmatprep.subr.msk.mxu0 %vm1258_vm4, %v1792_v58 }
 0x3d4   : > { %9851 = vmatpush3.xpose.msk.msra.mxu1 %vm1258_vm4, %v1881_v23  ;;  %9854 = vmatprep.mubr.msk.f32.mxu1 %vm1258_vm4, %v11658_v5  ;;  %v2161_v22 = vpop.permute.xlu0 %2160 }
 0x3d5   : > { %9834 = vmatmul.mubr.msk.f32.vlgmr.msra.gmra.mxu0 %vm1258_vm4, %v11624_v56 }
 0x3d6   : > { %v1879_v24 = vpop.permute.xlu1 %1878  ;;  %9844 = vmatpush3.xpose.msk.msra.mxu0 %vm1258_vm4, %v1792_v58  ;;  %9847 = vmatprep.mubr.msk.f32.mxu0 %vm1258_vm4, %v11652_v4 }
 0x3d7   : > { %9845 = vmatprep.subr.msk.mxu0 %vm1258_vm4, %v1790_v29  ;;  %9852 = vmatprep.subr.msk.mxu1 %vm1258_vm4, %v1879_v24 }
 0x3d8   : > { %9853 = vmatpush3.xpose.msk.msra.mxu1 %vm1258_vm4, %v1879_v24  ;;  %v2246_v26 = vpop.permute.xlu0 %2245 }
 0x3da   : > { %v2159_v25 = vpop.permute.xlu1 %2158  ;;  %9846 = vmatpush3.xpose.msk.msra.mxu0 %vm1258_vm4, %v1790_v29 }
 0x3db   : > { %9855 = vmatmul.mubr.msk.f32.vlgmr.msra.gmra.mxu1 %vm1258_vm4, %v11648_v59  ;;  %9857 = vmatprep.subr.mxu0 %v2161_v22 }
 0x3dc   : > { %v11758_v37 = vpop.permute.xlu0 %2421 }
 0x3dd   : > { %9848 = vmatmul.mubr.msk.f32.vlgmr.msra.gmra.mxu0 %vm1258_vm4, %v11640_v62 }
 0x3de   : > { %v2248_v31 = vpop.permute.xlu1 %2247  ;;  %9858 = vmatpush3.msra.mxu0 %v2161_v22 }
 0x3df   : > { %9859 = vmatprep.subr.mxu0 %v2159_v25  ;;  %9864 = vmatprep.subr.mxu1 %v2248_v31 }
 0x3e0   : > { %9860 = vmatpush3.msra.mxu0 %v2159_v25  ;;  %9865 = vmatpush3.msra.mxu1 %v2248_v31 }
 0x3e1   : > { %9866 = vmatprep.subr.mxu1 %v2246_v26 }
 0x3e2   : > { %v11760_v44 = vpop.permute.xlu1 %2334  ;;  %9867 = vmatpush3.msra.mxu1 %v2246_v26 }
 0x3e3   : > { %9871 = vmatprep.subr.mxu0 %v11760_v44  ;;  %9878 = vmatprep.subr.mxu1 %v11758_v37 }
 0x47d   : > { %v9807_v35 = vpop.f32.mrf.mxu0 }
 0x47e   : > { %v11770_v8 = vsel %vm1251_vm5, %v9807_v35, -1e+30 }
 0x47f   : > { %v1333_v43 = vpop.f32.mrf.mxu0  ;;  %v1985_v52 = vsel %vm1981_vm6, %v11770_v8, -inf }
 0x480   : > { %v11776_v39 = vsel %vm1251_vm5, %v1333_v43, -1e+30  ;;  %1986 = vmax.xlane.f32.xlu1 %v1985_v52 }
 0x481   : > { %v1982_v10 = vsel %vm1981_vm6, %v11776_v39, -inf }
 0x482   : > { %1983 = vmax.xlane.f32.xlu0 %v1982_v10 }
 0x485   : > { %v9814_v40 = vpop.f32.mrf.mxu0 }
 0x486   : > { %v11782_v33 = vsel %vm1251_vm5, %v9814_v40, -1e+30 }
 0x487   : > { %v1422_v48 = vpop.f32.mrf.mxu0  ;;  %v1991_v55 = vsel %vm1981_vm6, %v11782_v33, -inf }
 0x488   : > { %v11788_v46 = vsel %vm1251_vm5, %v1422_v48, -1e+30  ;;  %1992 = vmax.xlane.f32.xlu0 %v1991_v55 }
 0x489   : > { %v1988_v42 = vsel %vm1981_vm6, %v11788_v46, -inf }
 0x48b   : > { %v9828_v15 = vpop.f32.mrf.mxu1 }
 0x48c   : > { %v11794_v61 = vsel %vm1251_vm5, %v9828_v15, -1e+30  ;;  %1989 = vmax.xlane.f32.xlu0 %v1988_v42 }
 0x48d   : > { %v9821_v21 = vpop.f32.mrf.mxu0  ;;  %v1600_v3 = vpop.f32.mrf.mxu1  ;;  %v2003_v9 = vsel %vm1981_vm6, %v11794_v61, -inf }
 0x48e   : > { %v11798_v0 = vsel %vm1251_vm5, %v9821_v21, -1e+30  ;;  %v11806_v12 = vsel %vm1251_vm5, %v1600_v3, -1e+30 }
 0x48f   : > { %v1997_v50 = vsel %vm1981_vm6, %v11798_v0, -inf  ;;  %v1511_v13 = vpop.f32.mrf.mxu0  ;;  %v2000_v6 = vsel %vm1981_vm6, %v11806_v12, -inf }
 0x490   : > { %1998 = vmax.xlane.f32.xlu1 %v1997_v50  ;;  %2004 = vmax.xlane.f32.xlu0 %v2003_v9  ;;  %v11812_v17 = vsel %vm1251_vm5, %v1511_v13, -1e+30  ;;  %v11876_v50 = vpop.permute.xlu1 %2332 }
 0x491   : > { %v1994_v20 = vsel %vm1981_vm6, %v11812_v17, -inf }
 0x493   : > { %v9842_v16 = vpop.f32.mrf.mxu1 }
 0x494   : > { %2001 = vmax.xlane.f32.xlu0 %v2000_v6  ;;  %v11824_v11 = vsel %vm1251_vm5, %v9842_v16, -1e+30  ;;  %v11878_v9 = vpop.permute.xlu1 %2508  ;;  %v11882_v6 = vpop.permute.xlu0 %2419 }
 0x495   : > { %v9835_v18 = vpop.f32.mrf.mxu0  ;;  %v1778_v29 = vpop.f32.mrf.mxu1  ;;  %v2015_v25 = vsel %vm1981_vm6, %v11824_v11, -inf }
 0x496   : > { %v11816_v19 = vsel %vm1251_vm5, %v9835_v18, -1e+30  ;;  %v11836_v26 = vsel %vm1251_vm5, %v1778_v29, -1e+30 }
 0x497   : > { %v1689_v27 = vpop.f32.mrf.mxu0  ;;  %v2009_v58 = vsel %vm1981_vm6, %v11816_v19, -inf  ;;  %v2012_v52 = vsel %vm1981_vm6, %v11836_v26, -inf }
 0x498   : > { %v11828_v23 = vsel %vm1251_vm5, %v1689_v27, -1e+30  ;;  %1995 = vmax.xlane.f32.xlu0 %v1994_v20  ;;  %2010 = vmax.xlane.f32.xlu1 %v2009_v58  ;;  %v11880_v13 = vpop.permute.xlu1 %2506  ;;  %v11886_v18 = vpop.permute.xlu0 %2595 }
 0x499   : > { %v2006_v24 = vsel %vm1981_vm6, %v11828_v23, -inf }
 0x49b   : > { %v9856_v22 = vpop.f32.mrf.mxu1 }
 0x49c   : > { %v11840_v31 = vsel %vm1251_vm5, %v9856_v22, -1e+30  ;;  %2007 = vmax.xlane.f32.xlu1 %v2006_v24  ;;  %2016 = vmax.xlane.f32.xlu0 %v2015_v25  ;;  %v11884_v16 = vpop.permute.xlu1 %2682  ;;  %v11890_v20 = vpop.permute.xlu0 %2593 }
 0x49d   : > { %v9849_v35 = vpop.f32.mrf.mxu0  ;;  %v1956_v43 = vpop.f32.mrf.mxu1  ;;  %v2027_v10 = vsel %vm1981_vm6, %v11840_v31, -inf }
 0x49e   : > { %v11848_v40 = vsel %vm1251_vm5, %v9849_v35, -1e+30  ;;  %v11852_v48 = vsel %vm1251_vm5, %v1956_v43, -1e+30 }
 0x49f   : > { %v1867_v55 = vpop.f32.mrf.mxu0  ;;  %v2021_v15 = vsel %vm1981_vm6, %v11848_v40, -inf  ;;  %v2024_v42 = vsel %vm1981_vm6, %v11852_v48, -inf }
 0x4a0   : > { %2013 = vmax.xlane.f32.xlu0 %v2012_v52  ;;  %2028 = vmax.xlane.f32.xlu1 %v2027_v10  ;;  %v11860_v21 = vsel %vm1251_vm5, %v1867_v55, -1e+30  ;;  %v11888_v27 = vpop.permute.xlu1 %2680  ;;  %v11894_v29 = vpop.permute.xlu0 %2769 }
 0x4a1   : > { %v2018_v3 = vsel %vm1981_vm6, %v11860_v21, -inf }
 0x4a4   : > { %2022 = vmax.xlane.f32.xlu1 %v2021_v15  ;;  %2025 = vmax.xlane.f32.xlu0 %v2024_v42  ;;  %v11892_v58 = vpop.permute.xlu1 %2860  ;;  %v11898_v24 = vpop.permute.xlu0 %2951 }
 0x4a8   : > { %2019 = vmax.xlane.f32.xlu1 %v2018_v3  ;;  %v11896_v22 = vpop.permute.xlu1 %2858  ;;  %v11902_v35 = vpop.permute.xlu0 %2949 }
 0x4a9   : > { %14270 = vst [vmem:[#allocation35_spill] sm:$0xff] %v11896_v22 }
 0x4ac   : > { %v11900_v25 = vpop.permute.xlu1 %2854  ;;  %v11906_v52 = vpop.permute.xlu0 %2856 }
 0x4ad   : > { %14272 = vst [vmem:[#allocation37_spill] sm:$0xff] %v11906_v52 }
 0x4b0   : > { %v11904_v43 = vpop.permute.xlu1 %3042  ;;  %v11910_v55 = vpop.permute.xlu0 %3040 }
 0x4b1   : > { %14271 = vst [vmem:[#allocation36_spill] sm:$0xff] %v11904_v43  ;;  %14273 = vst [vmem:[#allocation38_spill] sm:$0xff] %v11910_v55 }
 0x4b4   : > { %v11908_v10 = vpop.permute.xlu1 %2945  ;;  %v11914_v42 = vpop.permute.xlu0 %2767 }
 0x4b8   : > { %v11912_v15 = vpop.permute.xlu1 %3133 }
 0x4b9   : > { %3036 = vrot.lane.b32.xlu1 %v11618_v51, %s11023_s16 }
 0x4ba   : > { %2947 = vrot.lane.b32.xlu0 %v11604_v38, %s11023_s16 }
 0x4bd   : > { %3224 = vrot.lane.b32.xlu1 %v11624_v56, %s11022_s17 }
 0x4be   : > { %3131 = vrot.lane.b32.xlu0 %v11620_v54, %s11022_s17 }
 0x4c1   : > { %3127 = vrot.lane.b32.xlu1 %v11620_v54, %s11023_s16 }
 0x4c2   : > { %3038 = vrot.lane.b32.xlu0 %v11606_v30, %s11023_s16 }
 0x509   : > { %v1987_v3 = vpop.xlane.xlu1 %1986 }
 0x50a   : > { %v2031_v14 = vsub.f32 %v11770_v8, %v1987_v3 }
 0x50b   : > { %v1984_v7 = vpop.xlane.xlu0 %1983 }
 0x50c   : > { %v2048_v1 = vmul.f32 1.442695, %v2031_v14  ;;  %v2030_v57 = vsub.f32 %v11776_v39, %v1984_v7 }
 0x50e   : > { %10496 = vpow2.f32 %v2048_v1  ;;  %v2046_v49 = vmul.f32 1.442695, %v2030_v57 }
 0x510   : > { %10498 = vpow2.f32 %v2046_v49 }
 0x511   : > { %v1993_v41 = vpop.xlane.xlu0 %1992 }
 0x512   : > { %v2033_v32 = vsub.f32 %v11782_v33, %v1993_v41 }
 0x514   : > { %v2052_v28 = vmul.f32 1.442695, %v2033_v32 }
 0x515   : > { %v1990_v34 = vpop.xlane.xlu0 %1989 }
 0x516   : > { %10500 = vpow2.f32 %v2052_v28  ;;  %v2032_v55 = vsub.f32 %v11788_v46, %v1990_v34 }
 0x518   : > { %v2050_v52 = vmul.f32 1.442695, %v2032_v55 }
 0x519   : > { %v1999_v43 = vpop.xlane.xlu1 %1998  ;;  %v2005_v22 = vpop.xlane.xlu0 %2004 }
 0x51a   : > { %10502 = vpow2.f32 %v2050_v52  ;;  %v2035_v8 = vsub.f32 %v11798_v0, %v1999_v43  ;;  %v2037_v14 = vsub.f32 %v11794_v61, %v2005_v22 }
 0x51b   : > { %v11922_v7 = vpop.eup %10496 }
 0x51c   : > { %v2056_v57 = vmul.f32 1.442695, %v2035_v8  ;;  %v2060_v49 = vmul.f32 1.442695, %v2037_v14  ;;  %v2081_v41 = vsel %vm1981_vm6, %v11922_v7, 0.0 }
 0x51d   : > { %v11926_v32 = vpop.eup %10498  ;;  %2082 = vadd.xlane.f32.xlu1 %v2081_v41  ;;  %v2002_v28 = vpop.xlane.xlu0 %2001 }
 0x51e   : > { %10504 = vpow2.f32 %v2056_v57  ;;  %v2036_v1 = vsub.f32 %v11806_v12, %v2002_v28  ;;  %v2078_v34 = vsel %vm1981_vm6, %v11926_v32, 0.0 }
 0x51f   : > { %10506 = vpow2.f32 %v2060_v49  ;;  %2079 = vadd.xlane.f32.xlu0 %v2078_v34 }
 0x520   : > { %v2058_v39 = vmul.f32 1.442695, %v2036_v1 }
 0x521   : > { %v2011_v33 = vpop.xlane.xlu1 %2010  ;;  %v1996_v46 = vpop.xlane.xlu0 %1995 }
 0x522   : > { %10508 = vpow2.f32 %v2058_v39  ;;  %v2039_v61 = vsub.f32 %v11816_v19, %v2011_v33  ;;  %v2034_v0 = vsub.f32 %v11812_v17, %v1996_v46 }
 0x523   : > { %v11933_v22 = vpop.eup %10500 }
 0x524   : > { %v2054_v43 = vmul.f32 1.442695, %v2034_v0  ;;  %v2087_v52 = vsel %vm1981_vm6, %v11933_v22, 0.0  ;;  %v2064_v12 = vmul.f32 1.442695, %v2039_v61 }
 0x525   : > { %v2008_v55 = vpop.xlane.xlu1 %2007  ;;  %2088 = vadd.xlane.f32.xlu0 %v2087_v52  ;;  %v2017_v3 = vpop.xlane.xlu0 %2016 }
 0x526   : > { %v2038_v8 = vsub.f32 %v11828_v23, %v2008_v55  ;;  %v2041_v14 = vsub.f32 %v11824_v11, %v2017_v3  ;;  %10510 = vpow2.f32 %v2054_v43 }
 0x527   : > { %v11939_v57 = vpop.eup %10502  ;;  %10512 = vpow2.f32 %v2064_v12 }
 0x528   : > { %v2068_v19 = vmul.f32 1.442695, %v2041_v14  ;;  %v2084_v17 = vsel %vm1981_vm6, %v11939_v57, 0.0  ;;  %v2062_v49 = vmul.f32 1.442695, %v2038_v8 }
 0x529   : > { %v2029_v41 = vpop.xlane.xlu1 %2028  ;;  %2085 = vadd.xlane.f32.xlu0 %v2084_v17  ;;  %v2014_v28 = vpop.xlane.xlu0 %2013 }
 0x52a   : > { %v2045_v1 = vsub.f32 %v11840_v31, %v2029_v41  ;;  %v2040_v34 = vsub.f32 %v11836_v26, %v2014_v28  ;;  %10514 = vpow2.f32 %v2068_v19 }
 0x52b   : > { %v11945_v39 = vpop.eup %10504  ;;  %10516 = vpow2.f32 %v2062_v49 }
 0x52c   : > { %v11947_v11 = vpop.eup %10506  ;;  %v2066_v23 = vmul.f32 1.442695, %v2040_v34  ;;  %v2093_v33 = vsel %vm1981_vm6, %v11945_v39, 0.0  ;;  %v2076_v46 = vmul.f32 1.442695, %v2045_v1 }
 0x52d   : > { %2094 = vadd.xlane.f32.xlu1 %v2093_v33  ;;  %v2023_v61 = vpop.xlane.xlu1 %2022  ;;  %v2099_v0 = vsel %vm1981_vm6, %v11947_v11, 0.0  ;;  %v2026_v43 = vpop.xlane.xlu0 %2025 }
 0x52e   : > { %v2043_v31 = vsub.f32 %v11848_v40, %v2023_v61  ;;  %2100 = vadd.xlane.f32.xlu0 %v2099_v0  ;;  %v2044_v26 = vsub.f32 %v11852_v48, %v2026_v43  ;;  %10518 = vpow2.f32 %v2066_v23 }
 0x52f   : > { %v11955_v52 = vpop.eup %10508  ;;  %10520 = vpow2.f32 %v2076_v46 }
 0x530   : > { %v2074_v12 = vmul.f32 1.442695, %v2044_v26  ;;  %v2096_v55 = vsel %vm1981_vm6, %v11955_v52, 0.0  ;;  %v2072_v3 = vmul.f32 1.442695, %v2043_v31 }
 0x531   : > { %v2020_v8 = vpop.xlane.xlu1 %2019 }
 0x532   : > { %v2042_v14 = vsub.f32 %v11860_v21, %v2020_v8  ;;  %2097 = vadd.xlane.f32.xlu0 %v2096_v55  ;;  %10522 = vpow2.f32 %v2074_v12 }
 0x533   : > { %v11960_v19 = vpop.eup %10510  ;;  %10524 = vpow2.f32 %v2072_v3  ;;  %v12046_v3 = vpop.permute.xlu0 %2947 }
 0x534   : > { %v2070_v40 = vmul.f32 1.442695, %v2042_v14  ;;  %v2090_v48 = vsel %vm1981_vm6, %v11960_v19, 0.0  ;;  %v11964_v17 = vpop.eup %10512 }
 0x535   : > { %2091 = vadd.xlane.f32.xlu1 %v2090_v48  ;;  %v2105_v41 = vsel %vm1981_vm6, %v11964_v17, 0.0  ;;  %v12043_v55 = vpop.permute.xlu1 %3036 }
 0x536   : > { %10526 = vpow2.f32 %v2070_v40 }
 0x537   : > { %v11966_v49 = vpop.eup %10514  ;;  %v12056_v14 = vpop.permute.xlu0 %3131 }
 0x538   : > { %v2111_v21 = vsel %vm1981_vm6, %v11966_v49, 0.0  ;;  %v11972_v28 = vpop.eup %10516 }
 0x539   : > { %2106 = vadd.xlane.f32.xlu1 %v2105_v41  ;;  %2112 = vadd.xlane.f32.xlu0 %v2111_v21  ;;  %v2102_v34 = vsel %vm1981_vm6, %v11972_v28, 0.0  ;;  %v12052_v8 = vpop.permute.xlu1 %3224 }
 0x53b   : > { %v11974_v1 = vpop.eup %10518  ;;  %v12066_v48 = vpop.permute.xlu0 %3038 }
 0x53c   : > { %v2108_v23 = vsel %vm1981_vm6, %v11974_v1, 0.0  ;;  %v11980_v33 = vpop.eup %10520 }
 0x53d   : > { %2103 = vadd.xlane.f32.xlu1 %v2102_v34  ;;  %2109 = vadd.xlane.f32.xlu0 %v2108_v23  ;;  %v2123_v61 = vsel %vm1981_vm6, %v11980_v33, 0.0  ;;  %v12062_v40 = vpop.permute.xlu1 %3127 }
 0x53f   : > { %v11982_v46 = vpop.eup %10522 }
 0x540   : > { %v2120_v0 = vsel %vm1981_vm6, %v11982_v46, 0.0  ;;  %v11988_v43 = vpop.eup %10524 }
 0x541   : > { %2124 = vadd.xlane.f32.xlu1 %v2123_v61  ;;  %2121 = vadd.xlane.f32.xlu0 %v2120_v0  ;;  %v2117_v31 = vsel %vm1981_vm6, %v11988_v43, 0.0 }
 0x543   : > { %v11992_v26 = vpop.eup %10526 }
 0x544   : > { %v2114_v12 = vsel %vm1981_vm6, %v11992_v26, 0.0 }
 0x545   : > { %2118 = vadd.xlane.f32.xlu1 %v2117_v31 }
 0x549   : > { %2115 = vadd.xlane.f32.xlu1 %v2114_v12 }
 0x557   : > { %3222 = vrot.lane.b32.xlu0 %v11636_v60, %s11022_s17 }
 0x55a   : > { %3315 = vrot.lane.b32.xlu1 %v11632_v53, %s11022_s17 }
 0x55b   : > { %3129 = vrot.lane.b32.xlu0 %v11614_v47, %s11023_s16 }
 0x55e   : > { %3218 = vrot.lane.b32.xlu1 %v11636_v60, %s11023_s16 }
 0x55f   : > { %3313 = vrot.lane.b32.xlu0 %v11644_v63, %s11022_s17 }
 0x562   : > { %3406 = vrot.lane.b32.xlu1 %v11640_v62, %s11022_s17 }
 0x563   : > { %3220 = vrot.lane.b32.xlu0 %v11624_v56, %s11023_s16 }
 0x566   : > { %3309 = vrot.lane.b32.xlu1 %v11644_v63, %s11023_s16 }
 0x567   : > { %3404 = vrot.lane.b32.xlu0 %v11652_v4, %s11022_s17 }
 0x56a   : > { %3497 = vrot.lane.b32.xlu1 %v11648_v59, %s11022_s17 }
 0x56b   : > { %3311 = vrot.lane.b32.xlu0 %v11632_v53, %s11023_s16 }
 0x56e   : > { %3400 = vrot.lane.b32.xlu1 %v11652_v4, %s11023_s16 }
 0x56f   : > { %3402 = vrot.lane.b32.xlu0 %v11640_v62, %s11023_s16 }
 0x572   : > { %3495 = vrot.lane.b32.xlu1 %v11658_v5, %s11022_s17 }
 0x573   : > { %3491 = vrot.lane.b32.xlu0 %v11658_v5, %s11023_s16 }
 0x576   : > { %3493 = vrot.lane.b32.xlu1 %v11648_v59, %s11023_s16 }
 0x577   : > { %3776 = vrot.lane.b32.xlu0 %v11594_v36, %s11024_s30 }
 0x57a   : > { %3774 = vrot.lane.b32.xlu1 %v11596_v2, %s11024_s30 }
 0x57b   : > { %3861 = vrot.lane.b32.xlu0 %v11610_v45, %s11024_s30 }
 0x57e   : > { %3863 = vrot.lane.b32.xlu1 %v11604_v38, %s11024_s30 }
 0x57f   : > { %4037 = vrot.lane.b32.xlu0 %v11614_v47, %s11024_s30 }
 0x582   : > { %3950 = vrot.lane.b32.xlu1 %v11606_v30, %s11024_s30 }
 0x583   : > { %4035 = vrot.lane.b32.xlu0 %v11620_v54, %s11024_s30 }
 0x586   : > { %3948 = vrot.lane.b32.xlu1 %v11618_v51, %s11024_s30 }
 0x587   : > { %4211 = vrot.lane.b32.xlu0 %v11632_v53, %s11024_s30 }
 0x58a   : > { %4124 = vrot.lane.b32.xlu1 %v11624_v56, %s11024_s30 }
 0x58b   : > { %4209 = vrot.lane.b32.xlu0 %v11644_v63, %s11024_s30 }
 0x58e   : > { %4122 = vrot.lane.b32.xlu1 %v11636_v60, %s11024_s30 }
 0x58f   : > { %4385 = vrot.lane.b32.xlu0 %v11648_v59, %s11024_s30 }
 0x592   : > { %4298 = vrot.lane.b32.xlu1 %v11640_v62, %s11024_s30 }
 0x593   : > { %4383 = vrot.lane.b32.xlu0 %v11658_v5, %s11024_s30 }
 0x596   : > { %4296 = vrot.lane.b32.xlu1 %v11652_v4, %s11024_s30  ;;  %s14364_s30 = sld [smem:[#allocation70_spill]] }
 0x597   : > { %4567 = vrot.lane.b32.xlu0 %v11604_v38, %s11025_s15 }
 0x59a   : > { %4476 = vrot.lane.b32.xlu1 %v11594_v36, %s11025_s15 }
 0x59b   : > { %4565 = vrot.lane.b32.xlu0 %v11610_v45, %s11025_s15 }
 0x59e   : > { %4474 = vrot.lane.b32.xlu1 %v11596_v2, %s11025_s15 }
 0x59f   : > { %4472 = vrot.lane.b32.xlu0 %v11594_v36, %s11026_s26 }
 0x5a2   : > { %4470 = vrot.lane.b32.xlu1 %v11596_v2, %s11026_s26 }
 0x5a3   : > { %4656 = vrot.lane.b32.xlu0 %v11618_v51, %s11025_s15 }
 0x5a6   : > { %v2083_v41 = vpop.xlane.xlu1 %2082  ;;  %4658 = vrot.lane.b32.xlu1 %v11606_v30, %s11025_s15 }
 0x5a7   : > { %10528 = vrcp.f32 %v2083_v41 }
 0x5a8   : > { %v2080_v21 = vpop.xlane.xlu0 %2079 }
 0x5a9   : > { %10530 = vrcp.f32 %v2080_v21 }
 0x5aa   : > { %4561 = vrot.lane.b32.xlu1 %v11610_v45, %s11026_s26 }
 0x5ae   : > { %v2089_v34 = vpop.xlane.xlu0 %2088  ;;  %4749 = vrot.lane.b32.xlu1 %v11614_v47, %s11025_s15 }
 0x5af   : > { %10532 = vrcp.f32 %v2089_v34 }
 0x5b2   : > { %v2086_v23 = vpop.xlane.xlu0 %2085 }
 0x5b3   : > { %10534 = vrcp.f32 %v2086_v23 }
 0x5b4   : > { %v10529_v61 = vpop.eup %10528 }
 0x5b5   : > { %v2143_v2 = vmul.f32 %v10529_v61, %v11922_v7 }
 0x5b6   : > { %v10531_v0 = vpop.eup %10530  ;;  %v2095_v41 = vpop.xlane.xlu1 %2094 }
 0x5b7   : > { %v2101_v31 = vpop.xlane.xlu0 %2100  ;;  %v2142_v12 = vmul.f32 %v10531_v0, %v11926_v32 }
 0x5b8   : > { %10536 = vrcp.f32 %v2101_v31 }
 0x5b9   : > { %9861 = vmatprep.mubr.msk.f32.mxu0 %vm1981_vm6, %v2142_v12 }
 0x5ba   : > { %9862 = vmatmul.mubr.msk.f32.vlgmr.msra.gmra.mxu0 %vm1981_vm6, %v2143_v2 }
 0x5bb   : > { %9872 = vmatpush3.msra.mxu0 %v11760_v44  ;;  %v2098_v21 = vpop.xlane.xlu0 %2097 }
 0x5bc   : > { %10538 = vrcp.f32 %v2098_v21  ;;  %9873 = vmatprep.subr.mxu0 %v11876_v50  ;;  %v10533_v34 = vpop.eup %10532 }
 0x5bd   : > { %9874 = vmatpush3.msra.mxu0 %v11876_v50  ;;  %10540 = vrcp.f32 %v2095_v41  ;;  %v2145_v2 = vmul.f32 %v10533_v34, %v11933_v22 }
 0x5be   : > { %9885 = vmatprep.subr.mxu0 %v11878_v9  ;;  %v2092_v32 = vpop.xlane.xlu1 %2091 }
 0x5bf   : > { %10542 = vrcp.f32 %v2092_v32 }
 0x5c0   : > { %v10535_v7 = vpop.eup %10534 }
 0x5c1   : > { %v2144_v23 = vmul.f32 %v10535_v7, %v11939_v57 }
 0x5c2   : > { %v2107_v61 = vpop.xlane.xlu1 %2106  ;;  %v2113_v0 = vpop.xlane.xlu0 %2112 }
 0x5c3   : > { %9868 = vmatprep.mubr.msk.f32.mxu1 %vm1981_vm6, %v2144_v23  ;;  %10544 = vrcp.f32 %v2107_v61 }
 0x5c4   : > { %9869 = vmatmul.mubr.msk.f32.vlgmr.msra.gmra.mxu1 %vm1981_vm6, %v2145_v2  ;;  %10546 = vrcp.f32 %v2113_v0 }
 0x5c5   : > { %9879 = vmatpush3.msra.mxu1 %v11758_v37  ;;  %v10537_v31 = vpop.eup %10536 }
 0x5c6   : > { %9880 = vmatprep.subr.mxu1 %v11882_v6  ;;  %v2104_v44 = vpop.xlane.xlu1 %2103  ;;  %v2110_v50 = vpop.xlane.xlu0 %2109  ;;  %v2149_v37 = vmul.f32 %v10537_v31, %v11947_v11 }
 0x5c7   : > { %9881 = vmatpush3.msra.mxu1 %v11882_v6  ;;  %10548 = vrcp.f32 %v2104_v44 }
 0x5c8   : > { %9892 = vmatprep.subr.mxu1 %v11886_v18  ;;  %10550 = vrcp.f32 %v2110_v50 }
 0x5c9   : > { %v10539_v22 = vpop.eup %10538 }
 0x5ca   : > { %v2148_v57 = vmul.f32 %v10539_v22, %v11955_v52  ;;  %v2125_v12 = vpop.xlane.xlu1 %2124  ;;  %v2122_v41 = vpop.xlane.xlu0 %2121 }
 0x5cb   : > { %v10541_v21 = vpop.eup %10540  ;;  %10552 = vrcp.f32 %v2125_v12 }
 0x5cc   : > { %9882 = vmatprep.mubr.msk.f32.mxu1 %vm1981_vm6, %v2148_v57  ;;  %v10543_v34 = vpop.eup %10542  ;;  %10554 = vrcp.f32 %v2122_v41  ;;  %v2147_v7 = vmul.f32 %v10541_v21, %v11945_v39 }
 0x5cd   : > { %9883 = vmatmul.mubr.msk.f32.vlgmr.msra.gmra.mxu1 %vm1981_vm6, %v2149_v37  ;;  %v2146_v6 = vmul.f32 %v10543_v34, %v11960_v19 }
 0x5ce   : > { %9893 = vmatpush3.msra.mxu1 %v11886_v18  ;;  %v2119_v32 = vpop.xlane.xlu1 %2118  ;;  %v12099_v52 = vpop.permute.xlu0 %3222 }
 0x5cf   : > { %9894 = vmatprep.subr.mxu1 %v11890_v20  ;;  %9875 = vmatprep.mubr.msk.f32.mxu0 %vm1981_vm6, %v2146_v6  ;;  %10556 = vrcp.f32 %v2119_v32 }
 0x5d0   : > { %9895 = vmatpush3.msra.mxu1 %v11890_v20  ;;  %9876 = vmatmul.mubr.msk.f32.vlgmr.msra.gmra.mxu0 %vm1981_vm6, %v2147_v7  ;;  %v10545_v18 = vpop.eup %10544 }
 0x5d1   : > { %9906 = vmatprep.subr.mxu1 %v11894_v29  ;;  %9886 = vmatpush3.msra.mxu0 %v11878_v9  ;;  %v10547_v23 = vpop.eup %10546  ;;  %v2151_v44 = vmul.f32 %v10545_v18, %v11964_v17 }
 0x5d2   : > { %9887 = vmatprep.subr.mxu0 %v11880_v13  ;;  %v2116_v11 = vpop.xlane.xlu1 %2115  ;;  %v12108_v19 = vpop.permute.xlu0 %3129  ;;  %v2153_v50 = vmul.f32 %v10547_v23, %v11966_v49 }
 0x5d3   : > { %10558 = vrcp.f32 %v2116_v11  ;;  %9888 = vmatpush3.msra.mxu0 %v11880_v13 }
 0x5d4   : > { %v10549_v20 = vpop.eup %10548  ;;  %9899 = vmatprep.subr.mxu0 %v11884_v16 }
 0x5d5   : > { %v10551_v39 = vpop.eup %10550  ;;  %v2150_v2 = vmul.f32 %v10549_v20, %v11972_v28 }
 0x5d6   : > { %v3316_v61 = vpop.permute.xlu1 %3315  ;;  %v12113_v0 = vpop.permute.xlu0 %3313  ;;  %v2152_v9 = vmul.f32 %v10551_v39, %v11974_v1 }
 0x5d7   : > { %9889 = vmatprep.mubr.msk.f32.mxu0 %vm1981_vm6, %v2150_v2 }
 0x5d8   : > { %v10553_v31 = vpop.eup %10552  ;;  %9896 = vmatprep.mubr.msk.f32.mxu1 %vm1981_vm6, %v2152_v9  ;;  %9890 = vmatmul.mubr.msk.f32.vlgmr.msra.gmra.mxu0 %vm1981_vm6, %v2151_v44 }
 0x5d9   : > { %v10555_v13 = vpop.eup %10554  ;;  %9897 = vmatmul.mubr.msk.f32.vlgmr.msra.gmra.mxu1 %vm1981_vm6, %v2153_v50  ;;  %9900 = vmatpush3.msra.mxu0 %v11884_v16  ;;  %v2157_v49 = vmul.f32 %v10553_v31, %v11980_v33 }
 0x5da   : > { %9907 = vmatpush3.msra.mxu1 %v11894_v29  ;;  %9901 = vmatprep.subr.mxu0 %v11888_v27  ;;  %v3219_v28 = vpop.permute.xlu1 %3218  ;;  %v12125_v17 = vpop.permute.xlu0 %3220  ;;  %v2156_v1 = vmul.f32 %v10555_v13, %v11982_v46 }
 0x5db   : > { %9908 = vmatprep.subr.mxu1 %v11914_v42  ;;  %9902 = vmatpush3.msra.mxu0 %v11888_v27 }
 0x5dc   : > { %9909 = vmatpush3.msra.mxu1 %v11914_v42  ;;  %9910 = vmatprep.mubr.msk.f32.mxu1 %vm1981_vm6, %v2156_v1  ;;  %v10557_v33 = vpop.eup %10556 }
 0x5dd   : > { %9913 = vmatprep.subr.msk.mxu0 %vm1258_vm4, %v11892_v58  ;;  %9920 = vmatprep.subr.msk.mxu1 %vm1258_vm4, %v11898_v24  ;;  %v2155_v22 = vmul.f32 %v10557_v33, %v11988_v43  ;;  %v14277_v43 = vld [vmem:[#allocation38_spill] sm:$0xff] }
 0x5de   : > { %9911 = vmatmul.mubr.msk.f32.vlgmr.msra.gmra.mxu1 %vm1981_vm6, %v2157_v49  ;;  %v3407_v16 = vpop.permute.xlu1 %3406  ;;  %v12138_v29 = vpop.permute.xlu0 %3404 }
 0x5df   : > { %9921 = vmatpush3.xpose.msk.msra.mxu1 %vm1258_vm4, %v11898_v24  ;;  %9924 = vmatprep.mubr.msk.f32.mxu1 %vm1258_vm4, %v11908_v10  ;;  %v14274_v24 = vld [vmem:[#allocation35_spill] sm:$0xff] }
 0x5e0   : > { %v10559_v27 = vpop.eup %10558  ;;  %9922 = vmatprep.subr.msk.mxu1 %vm1258_vm4, %v11902_v35 }
 0x5e1   : > { %v2154_v42 = vmul.f32 %v10559_v27, %v11992_v26 }
 0x5e2   : > { %v3310_v46 = vpop.permute.xlu1 %3309  ;;  %v3312_v57 = vpop.permute.xlu0 %3311 }
 0x5e3   : > { %9923 = vmatpush3.xpose.msk.msra.mxu1 %vm1258_vm4, %v11902_v35  ;;  %9903 = vmatprep.mubr.msk.f32.mxu0 %vm1981_vm6, %v2154_v42 }
 0x5e4   : > { %9934 = vmatprep.subr.msk.mxu1 %vm1258_vm4, %v11912_v15  ;;  %9904 = vmatmul.mubr.msk.f32.vlgmr.msra.gmra.mxu0 %vm1981_vm6, %v2155_v22 }
 0x5e5   : > { %9914 = vmatpush3.xpose.msk.msra.mxu0 %vm1258_vm4, %v11892_v58  ;;  %9917 = vmatprep.mubr.msk.f32.mxu0 %vm1258_vm4, %v11900_v25  ;;  %v14275_v25 = vld [vmem:[#allocation36_spill] sm:$0xff] }
 0x5e6   : > { %9925 = vmatmul.mubr.msk.f32.vlgmr.msra.gmra.mxu1 %vm1258_vm4, %v12046_v3  ;;  %9915 = vmatprep.subr.msk.mxu0 %vm1258_vm4, %v14274_v24  ;;  %v3498_v35 = vpop.permute.xlu1 %3497  ;;  %v3403_v58 = vpop.permute.xlu0 %3402 }
 0x5e7   : > { %9935 = vmatpush3.xpose.msk.msra.mxu1 %vm1258_vm4, %v11912_v15  ;;  %9938 = vmatprep.mubr.msk.f32.mxu1 %vm1258_vm4, %v12062_v40  ;;  %v14276_v15 = vld [vmem:[#allocation37_spill] sm:$0xff] }
 0x5e8   : > { %9936 = vmatprep.subr.msk.mxu1 %vm1258_vm4, %v12056_v14 }
 0x5e9   : > { %9916 = vmatpush3.xpose.msk.msra.mxu0 %vm1258_vm4, %v14274_v24 }
 0x5ea   : > { %9927 = vmatprep.subr.msk.mxu0 %vm1258_vm4, %v14275_v25  ;;  %v3401_v10 = vpop.permute.xlu1 %3400  ;;  %v3492_v3 = vpop.permute.xlu0 %3491 }
 0x5eb   : > { %9937 = vmatpush3.xpose.msk.msra.mxu1 %vm1258_vm4, %v12056_v14 }
 0x5ec   : > { %9948 = vmatprep.subr.msk.mxu1 %vm1258_vm4, %v3316_v61  ;;  %9918 = vmatmul.mubr.msk.f32.vlgmr.msra.gmra.mxu0 %vm1258_vm4, %v14276_v15 }
 0x5ed   : > { %9928 = vmatpush3.xpose.msk.msra.mxu0 %vm1258_vm4, %v14275_v25  ;;  %9931 = vmatprep.mubr.msk.f32.mxu0 %vm1258_vm4, %v12043_v55 }
 0x5ee   : > { %9939 = vmatmul.mubr.msk.f32.vlgmr.msra.gmra.mxu1 %vm1258_vm4, %v12108_v19  ;;  %9929 = vmatprep.subr.msk.mxu0 %vm1258_vm4, %v14277_v43  ;;  %v3496_v26 = vpop.permute.xlu1 %3495  ;;  %v3777_v14 = vpop.permute.xlu0 %3776 }
 0x5ef   : > { %9949 = vmatpush3.xpose.msk.msra.mxu1 %vm1258_vm4, %v3316_v61  ;;  %9952 = vmatprep.mubr.msk.f32.mxu1 %vm1258_vm4, %v3310_v46 }
 0x5f0   : > { %9950 = vmatprep.subr.msk.mxu1 %vm1258_vm4, %v12113_v0 }
 0x5f1   : > { %9930 = vmatpush3.xpose.msk.msra.mxu0 %vm1258_vm4, %v14277_v43 }
 0x5f2   : > { %9941 = vmatprep.subr.msk.mxu0 %vm1258_vm4, %v12052_v8  ;;  %v3494_v55 = vpop.permute.xlu1 %3493 }
 0x5f3   : > { %9951 = vmatpush3.xpose.msk.msra.mxu1 %vm1258_vm4, %v12113_v0 }
 0x5f4   : > { %9962 = vmatprep.subr.msk.mxu1 %vm1258_vm4, %v3498_v35  ;;  %9932 = vmatmul.mubr.msk.f32.vlgmr.msra.gmra.mxu0 %vm1258_vm4, %v12066_v48  ;;  %v3862_v48 = vpop.permute.xlu0 %3861 }
 0x5f5   : > { %9942 = vmatpush3.xpose.msk.msra.mxu0 %vm1258_vm4, %v12052_v8  ;;  %9945 = vmatprep.mubr.msk.f32.mxu0 %vm1258_vm4, %v3219_v28 }
 0x5f6   : > { %9953 = vmatmul.mubr.msk.f32.vlgmr.msra.gmra.mxu1 %vm1258_vm4, %v3312_v57  ;;  %9943 = vmatprep.subr.msk.mxu0 %vm1258_vm4, %v12099_v52  ;;  %v3775_v40 = vpop.permute.xlu1 %3774 }
 0x5f7   : > { %9963 = vmatpush3.xpose.msk.msra.mxu1 %vm1258_vm4, %v3498_v35  ;;  %9966 = vmatprep.mubr.msk.f32.mxu1 %vm1258_vm4, %v3492_v3 }
 0x5f8   : > { %9964 = vmatprep.subr.msk.mxu1 %vm1258_vm4, %v3496_v26  ;;  %v12218_v12 = vpop.permute.xlu0 %4037 }
 0x5f9   : > { %9944 = vmatpush3.xpose.msk.msra.mxu0 %vm1258_vm4, %v12099_v52 }
 0x5fa   : > { %9955 = vmatprep.subr.msk.mxu0 %vm1258_vm4, %v3407_v16  ;;  %v3864_v8 = vpop.permute.xlu1 %3863 }
 0x5fb   : > { %9965 = vmatpush3.xpose.msk.msra.mxu1 %vm1258_vm4, %v3496_v26 }
 0x5fc   : > { %9946 = vmatmul.mubr.msk.f32.vlgmr.msra.gmra.mxu0 %vm1258_vm4, %v12125_v17  ;;  %9976 = vmatprep.subr.mxu1 %v3864_v8 }
 0x5fd   : > { %9956 = vmatpush3.xpose.msk.msra.mxu0 %vm1258_vm4, %v3407_v16  ;;  %9959 = vmatprep.mubr.msk.f32.mxu0 %vm1258_vm4, %v3401_v10 }
 0x5fe   : > { %9967 = vmatmul.mubr.msk.f32.vlgmr.msra.gmra.mxu1 %vm1258_vm4, %v3494_v55  ;;  %9957 = vmatprep.subr.msk.mxu0 %vm1258_vm4, %v12138_v29  ;;  %v12224_v41 = vpop.permute.xlu1 %3950 }
 0x5ff   : > { %9977 = vmatpush3.msra.mxu1 %v3864_v8 }
 0x600   : > { %9978 = vmatprep.subr.mxu1 %v3862_v48 }
 0x601   : > { %9979 = vmatpush3.msra.mxu1 %v3862_v48  ;;  %9958 = vmatpush3.xpose.msk.msra.mxu0 %vm1258_vm4, %v12138_v29 }
 0x602   : > { %9990 = vmatprep.subr.mxu1 %v12218_v12  ;;  %9969 = vmatprep.subr.mxu0 %v3777_v14 }
 0x604   : > { %9960 = vmatmul.mubr.msk.f32.vlgmr.msra.gmra.mxu0 %vm1258_vm4, %v3403_v58 }
 0x605   : > { %9970 = vmatpush3.msra.mxu0 %v3777_v14 }
 0x606   : > { %9971 = vmatprep.subr.mxu0 %v3775_v40 }
 0x607   : > { %9972 = vmatpush3.msra.mxu0 %v3775_v40 }
 0x608   : > { %9983 = vmatprep.subr.mxu0 %v12224_v41 }
 0x67a   : > { %v12233_v6 = vpop.f32.mrf.mxu0 }
 0x67b   : > { %14281 = vst [vmem:[#allocation38_spill] sm:$0xff] %v12233_v6 }
 0x67c   : > { %v12237_v52 = vpop.f32.mrf.mxu0 }
 0x67d   : > { %14283 = vst [vmem:[#allocation40_spill] sm:$0xff] %v12237_v52 }
 0x684   : > { %v12227_v37 = vpop.f32.mrf.mxu1 }
 0x685   : > { %14278 = vst [vmem:[#allocation35_spill] sm:$0xff] %v12227_v37 }
 0x686   : > { %v12229_v21 = vpop.f32.mrf.mxu1 }
 0x687   : > { %14279 = vst [vmem:[#allocation36_spill] sm:$0xff] %v12229_v21 }
 0x68d   : > { %v12231_v34 = vpop.f32.mrf.mxu1 }
 0x68e   : > { %14280 = vst [vmem:[#allocation37_spill] sm:$0xff] %v12231_v34 }
 0x68f   : > { %v12235_v32 = vpop.f32.mrf.mxu1 }
 0x690   : > { %14282 = vst [vmem:[#allocation39_spill] sm:$0xff] %v12235_v32  ;;  %v12241_v18 = vpop.f32.mrf.mxu0 }
 0x691   : > { %14285 = vst [vmem:[#allocation42_spill] sm:$0xff] %v12241_v18 }
 0x692   : > { %v12245_v19 = vpop.f32.mrf.mxu0 }
 0x693   : > { %14287 = vst [vmem:[#allocation44_spill] sm:$0xff] %v12245_v19 }
 0x698   : > { %v12247_v23 = vpop.f32.mrf.mxu0 }
 0x699   : > { %v12239_v7 = vpop.f32.mrf.mxu1  ;;  %14288 = vst [vmem:[#allocation45_spill] sm:$0xff] %v12247_v23 }
 0x69a   : > { %14284 = vst [vmem:[#allocation41_spill] sm:$0xff] %v12239_v7  ;;  %v12251_v39 = vpop.f32.mrf.mxu0 }
 0x69b   : > { %v12243_v11 = vpop.f32.mrf.mxu1  ;;  %14290 = vst [vmem:[#allocation47_spill] sm:$0xff] %v12251_v39 }
 0x69c   : > { %14286 = vst [vmem:[#allocation43_spill] sm:$0xff] %v12243_v11 }
 0x69e   : > { %v12249_v20 = vpop.f32.mrf.mxu1 }
 0x69f   : > { %14289 = vst [vmem:[#allocation46_spill] sm:$0xff] %v12249_v20 }
 0x6a0   : > { %v12253_v2 = vpop.f32.mrf.mxu1 }
 0x6a1   : > { %14291 = vst [vmem:[#allocation48_spill] sm:$0xff] %v12253_v2 }
 0x6a4   : > { %v12255_v0 = vpop.f32.mrf.mxu0 }
 0x6a5   : > { %14292 = vst [vmem:[#allocation49_spill] sm:$0xff] %v12255_v0 }
 0x6a6   : > { %v9926_v61 = vpop.f32.mrf.mxu1  ;;  %v12267_v28 = vpop.f32.mrf.mxu0 }
 0x6a7   : > { %v12259_v44 = vsel %vm1251_vm5, %v9926_v61, -1e+30  ;;  %14294 = vst [vmem:[#allocation50_spill] sm:$0xff] %v12267_v28 }
 0x6a8   : > { %v3607_v50 = vsel %vm1981_vm6, %v12259_v44, -inf  ;;  %v3027_v31 = vpop.f32.mrf.mxu1 }
 0x6a9   : > { %v12265_v13 = vsel %vm1251_vm5, %v3027_v31, -1e+30  ;;  %3608 = vmax.xlane.f32.xlu0 %v3607_v50 }
 0x6aa   : > { %v3604_v17 = vsel %vm1981_vm6, %v12265_v13, -inf }
 0x6ac   : > { %v9919_v1 = vpop.f32.mrf.mxu0 }
 0x6ad   : > { %3605 = vmax.xlane.f32.xlu0 %v3604_v17  ;;  %v12273_v49 = vsel %vm1251_vm5, %v9919_v1, -1e+30 }
 0x6ae   : > { %v3601_v16 = vsel %vm1981_vm6, %v12273_v49, -inf  ;;  %v9940_v29 = vpop.f32.mrf.mxu1  ;;  %v2936_v33 = vpop.f32.mrf.mxu0 }
 0x6af   : > { %v12279_v27 = vsel %vm1251_vm5, %v2936_v33, -1e+30  ;;  %3602 = vmax.xlane.f32.xlu1 %v3601_v16  ;;  %v12285_v46 = vsel %vm1251_vm5, %v9940_v29, -1e+30 }
 0x6b0   : > { %v3598_v42 = vsel %vm1981_vm6, %v12279_v27, -inf  ;;  %v3209_v22 = vpop.f32.mrf.mxu1  ;;  %v3619_v57 = vsel %vm1981_vm6, %v12285_v46, -inf }
 0x6b1   : > { %3599 = vmax.xlane.f32.xlu0 %v3598_v42  ;;  %v12291_v35 = vsel %vm1251_vm5, %v3209_v22, -1e+30 }
 0x6b2   : > { %v3616_v15 = vsel %vm1981_vm6, %v12291_v35, -inf }
 0x6b4   : > { %v9933_v24 = vpop.f32.mrf.mxu0 }
 0x6b5   : > { %v12295_v58 = vsel %vm1251_vm5, %v9933_v24, -1e+30  ;;  %3620 = vmax.xlane.f32.xlu0 %v3619_v57 }
 0x6b6   : > { %v3613_v25 = vsel %vm1981_vm6, %v12295_v58, -inf  ;;  %v3118_v10 = vpop.f32.mrf.mxu0  ;;  %v9954_v43 = vpop.f32.mrf.mxu1 }
 0x6b7   : > { %3614 = vmax.xlane.f32.xlu1 %v3613_v25  ;;  %v12303_v26 = vsel %vm1251_vm5, %v3118_v10, -1e+30  ;;  %v12309_v40 = vsel %vm1251_vm5, %v9954_v43, -1e+30 }
 0x6b8   : > { %v3610_v3 = vsel %vm1981_vm6, %v12303_v26, -inf  ;;  %v3391_v55 = vpop.f32.mrf.mxu1  ;;  %v3631_v17 = vsel %vm1981_vm6, %v12309_v40, -inf }
 0x6b9   : > { %3617 = vmax.xlane.f32.xlu0 %v3616_v15  ;;  %v12325_v1 = vsel %vm1251_vm5, %v3391_v55, -1e+30 }
 0x6ba   : > { %v3628_v42 = vsel %vm1981_vm6, %v12325_v1, -inf }
 0x6bc   : > { %v9947_v14 = vpop.f32.mrf.mxu0 }
 0x6bd   : > { %v12313_v8 = vsel %vm1251_vm5, %v9947_v14, -1e+30  ;;  %3611 = vmax.xlane.f32.xlu0 %v3610_v3  ;;  %v12367_v14 = vpop.permute.xlu1 %3948 }
 0x6be   : > { %v3625_v48 = vsel %vm1981_vm6, %v12313_v8, -inf  ;;  %v9968_v61 = vpop.f32.mrf.mxu1  ;;  %v3300_v50 = vpop.f32.mrf.mxu0 }
 0x6bf   : > { %v12319_v31 = vsel %vm1251_vm5, %v3300_v50, -1e+30  ;;  %3626 = vmax.xlane.f32.xlu1 %v3625_v48  ;;  %v12331_v33 = vsel %vm1251_vm5, %v9968_v61, -1e+30  ;;  %v12369_v48 = vpop.permute.xlu0 %4035 }
 0x6c0   : > { %v3622_v16 = vsel %vm1981_vm6, %v12319_v31, -inf  ;;  %v3573_v29 = vpop.f32.mrf.mxu1  ;;  %v3643_v24 = vsel %vm1981_vm6, %v12331_v33, -inf }
 0x6c1   : > { %3632 = vmax.xlane.f32.xlu0 %v3631_v17  ;;  %v12337_v57 = vsel %vm1251_vm5, %v3573_v29, -1e+30  ;;  %v12371_v61 = vpop.permute.xlu1 %4124 }
 0x6c2   : > { %v3640_v10 = vsel %vm1981_vm6, %v12337_v57, -inf }
 0x6c3   : > { %3623 = vmax.xlane.f32.xlu1 %v3622_v16  ;;  %v12373_v50 = vpop.permute.xlu0 %4211 }
 0x6c4   : > { %v9961_v22 = vpop.f32.mrf.mxu0 }
 0x6c5   : > { %3629 = vmax.xlane.f32.xlu0 %v3628_v42  ;;  %v12343_v25 = vsel %vm1251_vm5, %v9961_v22, -1e+30  ;;  %v12375_v17 = vpop.permute.xlu1 %4122 }
 0x6c6   : > { %v3482_v15 = vpop.f32.mrf.mxu0  ;;  %v3637_v43 = vsel %vm1981_vm6, %v12343_v25, -inf }
 0x6c7   : > { %3644 = vmax.xlane.f32.xlu1 %v3643_v24  ;;  %v12351_v3 = vsel %vm1251_vm5, %v3482_v15, -1e+30  ;;  %v12377_v16 = vpop.permute.xlu0 %4209 }
 0x6c8   : > { %v3634_v55 = vsel %vm1981_vm6, %v12351_v3, -inf }
 0x6c9   : > { %3641 = vmax.xlane.f32.xlu0 %v3640_v10  ;;  %v12379_v29 = vpop.permute.xlu1 %4298 }
 0x6cb   : > { %3638 = vmax.xlane.f32.xlu1 %v3637_v43  ;;  %v12381_v42 = vpop.permute.xlu0 %4385 }
 0x6cd   : > { %v12383_v22 = vpop.permute.xlu1 %4296 }
 0x6cf   : > { %3635 = vmax.xlane.f32.xlu1 %v3634_v55  ;;  %v12385_v24 = vpop.permute.xlu0 %4383 }
 0x6d1   : > { %v12387_v10 = vpop.permute.xlu1 %4476 }
 0x6d3   : > { %v12389_v15 = vpop.permute.xlu0 %4567 }
 0x6d5   : > { %v12391_v43 = vpop.permute.xlu1 %4474 }
 0x6d7   : > { %v12393_v55 = vpop.permute.xlu0 %4565 }
 0x6d9   : > { %v12395_v20 = vpop.permute.xlu1 %4470 }
 0x6db   : > { %v12397_v2 = vpop.permute.xlu0 %4472 }
 0x6dc   : > { %14295 = vst [vmem:[#allocation51_spill] sm:$0xff] %v12397_v2 }
 0x6dd   : > { %v12399_v0 = vpop.permute.xlu1 %4658 }
 0x6df   : > { %4563 = vrot.lane.b32.xlu0 %v11604_v38, %s11026_s26  ;;  %v12401_v28 = vpop.permute.xlu0 %4656 }
 0x6e0   : > { %4652 = vrot.lane.b32.xlu1 %v11618_v51, %s11026_s26  ;;  %14296 = vst [vmem:[#allocation52_spill] sm:$0xff] %v12401_v28 }
 0x6e1   : > { %v12403_v7 = vpop.permute.xlu1 %4561 }
 0x6e3   : > { %4747 = vrot.lane.b32.xlu0 %v11620_v54, %s11025_s15 }
 0x6e4   : > { %4840 = vrot.lane.b32.xlu1 %v11624_v56, %s11025_s15 }
 0x6e5   : > { %v12406_v39 = vpop.permute.xlu1 %4749 }
 0x6e7   : > { %4654 = vrot.lane.b32.xlu0 %v11606_v30, %s11026_s26 }
 0x6e8   : > { %4743 = vrot.lane.b32.xlu1 %v11620_v54, %s11026_s26 }
 0x732   : > { %v3609_v11 = vpop.xlane.xlu0 %3608 }
 0x733   : > { %v3649_v23 = vsub.f32 %v12259_v44, %v3609_v11 }
 0x735   : > { %v3668_v34 = vmul.f32 1.442695, %v3649_v23 }
 0x736   : > { %v3606_v32 = vpop.xlane.xlu0 %3605 }
 0x737   : > { %10560 = vpow2.f32 %v3668_v34  ;;  %v3648_v18 = vsub.f32 %v12265_v13, %v3606_v32 }
 0x738   : > { %v3603_v19 = vpop.xlane.xlu1 %3602 }
 0x739   : > { %v3666_v37 = vmul.f32 1.442695, %v3648_v18  ;;  %v3647_v21 = vsub.f32 %v12273_v49, %v3603_v19 }
 0x73a   : > { %v3600_v6 = vpop.xlane.xlu0 %3599 }
 0x73b   : > { %10562 = vpow2.f32 %v3666_v37  ;;  %v3664_v52 = vmul.f32 1.442695, %v3647_v21  ;;  %v3646_v9 = vsub.f32 %v12279_v27, %v3600_v6 }
 0x73d   : > { %10564 = vpow2.f32 %v3664_v52  ;;  %v3662_v28 = vmul.f32 1.442695, %v3646_v9 }
 0x73e   : > { %v3621_v2 = vpop.xlane.xlu0 %3620 }
 0x73f   : > { %10566 = vpow2.f32 %v3662_v28  ;;  %v3653_v11 = vsub.f32 %v12285_v46, %v3621_v2 }
 0x740   : > { %v3615_v23 = vpop.xlane.xlu1 %3614 }
 0x741   : > { %v3676_v44 = vmul.f32 1.442695, %v3653_v11  ;;  %v3651_v34 = vsub.f32 %v12295_v58, %v3615_v23 }
 0x742   : > { %v3618_v32 = vpop.xlane.xlu0 %3617 }
 0x743   : > { %10568 = vpow2.f32 %v3676_v44  ;;  %v3672_v18 = vmul.f32 1.442695, %v3651_v34  ;;  %v3652_v19 = vsub.f32 %v12291_v35, %v3618_v32 }
 0x744   : > { %v12414_v13 = vpop.eup %10560 }
 0x745   : > { %10570 = vpow2.f32 %v3672_v18  ;;  %v3674_v37 = vmul.f32 1.442695, %v3652_v19  ;;  %v3703_v21 = vsel %vm1981_vm6, %v12414_v13, 0.0 }
 0x746   : > { %3704 = vadd.xlane.f32.xlu0 %v3703_v21  ;;  %v3612_v6 = vpop.xlane.xlu0 %3611 }
 0x747   : > { %10572 = vpow2.f32 %v3674_v37  ;;  %v3650_v52 = vsub.f32 %v12303_v26, %v3612_v6 }
 0x748   : > { %v12419_v2 = vpop.eup %10562  ;;  %v3627_v9 = vpop.xlane.xlu1 %3626 }
 0x749   : > { %v3670_v28 = vmul.f32 1.442695, %v3650_v52  ;;  %v3655_v49 = vsub.f32 %v12313_v8, %v3627_v9  ;;  %v3700_v27 = vsel %vm1981_vm6, %v12419_v2, 0.0 }
 0x74a   : > { %v12424_v46 = vpop.eup %10564  ;;  %3701 = vadd.xlane.f32.xlu0 %v3700_v27  ;;  %v3633_v35 = vpop.xlane.xlu0 %3632 }
 0x74b   : > { %10574 = vpow2.f32 %v3670_v28  ;;  %v3680_v58 = vmul.f32 1.442695, %v3655_v49  ;;  %v3657_v11 = vsub.f32 %v12309_v40, %v3633_v35  ;;  %v3697_v26 = vsel %vm1981_vm6, %v12424_v46, 0.0 }
 0x74c   : > { %v12429_v23 = vpop.eup %10566  ;;  %v3624_v44 = vpop.xlane.xlu1 %3623  ;;  %3698 = vadd.xlane.f32.xlu1 %v3697_v26 }
 0x74d   : > { %10576 = vpow2.f32 %v3680_v58  ;;  %v3684_v8 = vmul.f32 1.442695, %v3657_v11  ;;  %v3654_v34 = vsub.f32 %v12319_v31, %v3624_v44  ;;  %v3694_v32 = vsel %vm1981_vm6, %v12429_v23, 0.0 }
 0x74e   : > { %3695 = vadd.xlane.f32.xlu0 %v3694_v32  ;;  %v3630_v18 = vpop.xlane.xlu0 %3629 }
 0x74f   : > { %10578 = vpow2.f32 %v3684_v8  ;;  %v3678_v19 = vmul.f32 1.442695, %v3654_v34  ;;  %v3656_v40 = vsub.f32 %v12325_v1, %v3630_v18 }
 0x750   : > { %v12435_v37 = vpop.eup %10568  ;;  %v3645_v21 = vpop.xlane.xlu1 %3644 }
 0x751   : > { %10580 = vpow2.f32 %v3678_v19  ;;  %v3682_v6 = vmul.f32 1.442695, %v3656_v40  ;;  %v3661_v52 = vsub.f32 %v12331_v33, %v3645_v21  ;;  %v3715_v9 = vsel %vm1981_vm6, %v12435_v37, 0.0 }
 0x752   : > { %v12440_v31 = vpop.eup %10570  ;;  %3716 = vadd.xlane.f32.xlu0 %v3715_v9  ;;  %v3642_v28 = vpop.xlane.xlu0 %3641 }
 0x753   : > { %10582 = vpow2.f32 %v3682_v6  ;;  %v3692_v49 = vmul.f32 1.442695, %v3661_v52  ;;  %v3660_v27 = vsub.f32 %v12337_v57, %v3642_v28  ;;  %v3709_v1 = vsel %vm1981_vm6, %v12440_v31, 0.0 }
 0x754   : > { %v12445_v35 = vpop.eup %10572  ;;  %3710 = vadd.xlane.f32.xlu1 %v3709_v1  ;;  %v3639_v58 = vpop.xlane.xlu1 %3638 }
 0x755   : > { %10584 = vpow2.f32 %v3692_v49  ;;  %v3690_v33 = vmul.f32 1.442695, %v3660_v27  ;;  %v3659_v11 = vsub.f32 %v12343_v25, %v3639_v58  ;;  %v3712_v26 = vsel %vm1981_vm6, %v12445_v35, 0.0 }
 0x756   : > { %3713 = vadd.xlane.f32.xlu0 %v3712_v26 }
 0x757   : > { %10586 = vpow2.f32 %v3690_v33  ;;  %v3688_v44 = vmul.f32 1.442695, %v3659_v11 }
 0x758   : > { %v12450_v8 = vpop.eup %10574  ;;  %v3636_v57 = vpop.xlane.xlu1 %3635 }
 0x759   : > { %10588 = vpow2.f32 %v3688_v44  ;;  %v3658_v34 = vsub.f32 %v12351_v3, %v3636_v57  ;;  %v3706_v32 = vsel %vm1981_vm6, %v12450_v8, 0.0  ;;  %v14297_v44 = vld [vmem:[#allocation29_spill] sm:$0xff]  ;;  %v12537_v57 = vpop.permute.xlu0 %4563 }
 0x75a   : > { %v12455_v18 = vpop.eup %10576  ;;  %3707 = vadd.xlane.f32.xlu1 %v3706_v32 }
 0x75b   : > { %v3686_v19 = vmul.f32 1.442695, %v3658_v34  ;;  %v3721_v40 = vsel %vm1981_vm6, %v12455_v18, 0.0 }
 0x75c   : > { %v12457_v25 = vpop.eup %10578  ;;  %v12549_v32 = vpop.permute.xlu1 %4652 }
 0x75d   : > { %10590 = vpow2.f32 %v3686_v19  ;;  %v3727_v21 = vsel %vm1981_vm6, %v12457_v25, 0.0  ;;  %v12547_v34 = vpop.permute.xlu0 %4747 }
 0x75e   : > { %v12463_v6 = vpop.eup %10580  ;;  %3722 = vadd.xlane.f32.xlu1 %v3721_v40  ;;  %3728 = vadd.xlane.f32.xlu0 %v3727_v21 }
 0x75f   : > { %v3718_v52 = vsel %vm1981_vm6, %v12463_v6, 0.0 }
 0x760   : > { %v12465_v3 = vpop.eup %10582  ;;  %v12557_v40 = vpop.permute.xlu1 %4840 }
 0x761   : > { %v3724_v9 = vsel %vm1981_vm6, %v12465_v3, 0.0  ;;  %v12555_v19 = vpop.permute.xlu0 %4654 }
 0x762   : > { %v12471_v28 = vpop.eup %10584  ;;  %3719 = vadd.xlane.f32.xlu1 %v3718_v52  ;;  %3725 = vadd.xlane.f32.xlu0 %v3724_v9 }
 0x763   : > { %v3739_v27 = vsel %vm1981_vm6, %v12471_v28, 0.0 }
 0x764   : > { %v12473_v49 = vpop.eup %10586  ;;  %v12563_v52 = vpop.permute.xlu1 %4743 }
 0x765   : > { %v3736_v1 = vsel %vm1981_vm6, %v12473_v49, 0.0 }
 0x766   : > { %v12479_v58 = vpop.eup %10588  ;;  %3740 = vadd.xlane.f32.xlu1 %v3739_v27  ;;  %3737 = vadd.xlane.f32.xlu0 %v3736_v1 }
 0x767   : > { %v3733_v33 = vsel %vm1981_vm6, %v12479_v58, 0.0 }
 0x76a   : > { %v12483_v11 = vpop.eup %10590  ;;  %3734 = vadd.xlane.f32.xlu1 %v3733_v33 }
 0x76b   : > { %v3730_v26 = vsel %vm1981_vm6, %v12483_v11, 0.0 }
 0x76e   : > { %3731 = vadd.xlane.f32.xlu1 %v3730_v26 }
 0x77c   : > { %4838 = vrot.lane.b32.xlu0 %v11636_v60, %s11025_s15 }
 0x77f   : > { %4931 = vrot.lane.b32.xlu1 %v11632_v53, %s11025_s15 }
 0x780   : > { %4745 = vrot.lane.b32.xlu0 %v11614_v47, %s11026_s26 }
 0x783   : > { %4834 = vrot.lane.b32.xlu1 %v11636_v60, %s11026_s26 }
 0x784   : > { %4929 = vrot.lane.b32.xlu0 %v11644_v63, %s11025_s15 }
 0x787   : > { %5022 = vrot.lane.b32.xlu1 %v11640_v62, %s11025_s15 }
 0x788   : > { %4836 = vrot.lane.b32.xlu0 %v11624_v56, %s11026_s26 }
 0x78b   : > { %4925 = vrot.lane.b32.xlu1 %v11644_v63, %s11026_s26 }
 0x78c   : > { %5020 = vrot.lane.b32.xlu0 %v11652_v4, %s11025_s15 }
 0x78f   : > { %5113 = vrot.lane.b32.xlu1 %v11648_v59, %s11025_s15 }
 0x790   : > { %4927 = vrot.lane.b32.xlu0 %v11632_v53, %s11026_s26 }
 0x793   : > { %5016 = vrot.lane.b32.xlu1 %v11652_v4, %s11026_s26 }
 0x794   : > { %5018 = vrot.lane.b32.xlu0 %v11640_v62, %s11026_s26 }
 0x797   : > { %5111 = vrot.lane.b32.xlu1 %v11658_v5, %s11025_s15  ;;  %s9389_s15 = sshll.u32 %s11141_s25, 7  ;;  %s11034_s25 = smov [#allocation10]  }
 0x798   : > { %5107 = vrot.lane.b32.xlu0 %v11658_v5, %s11026_s26 }
 0x79b   : > { %5109 = vrot.lane.b32.xlu1 %v11648_v59, %s11026_s26  ;;  %s598_s26 = scalar_lea.vmem [#allocation10], %s9130_s20  ;;  %s10942_s20 = sshll.u32 %s11034_s25, 4  ;;  %s10943_s20 = int_to_ptr.vmem [resolvable:$false] %s10942_s20 }
 0x79c   : > { %5392 = vrot.lane.b32.xlu0 %v11594_v36, %s11027_s19 }
 0x79f   : > { %5390 = vrot.lane.b32.xlu1 %v14297_v44, %s11027_s19 }
 0x7a0   : > { %5477 = vrot.lane.b32.xlu0 %v11610_v45, %s11027_s19 }
 0x7a3   : > { %5479 = vrot.lane.b32.xlu1 %v11604_v38, %s11027_s19 }
 0x7a4   : > { %5653 = vrot.lane.b32.xlu0 %v11614_v47, %s11027_s19 }
 0x7a7   : > { %5566 = vrot.lane.b32.xlu1 %v11606_v30, %s11027_s19 }
 0x7a8   : > { %5651 = vrot.lane.b32.xlu0 %v11620_v54, %s11027_s19 }
 0x7ab   : > { %5564 = vrot.lane.b32.xlu1 %v11618_v51, %s11027_s19 }
 0x7ac   : > { %5827 = vrot.lane.b32.xlu0 %v11632_v53, %s11027_s19 }
 0x7af   : > { %5740 = vrot.lane.b32.xlu1 %v11624_v56, %s11027_s19 }
 0x7b0   : > { %5825 = vrot.lane.b32.xlu0 %v11644_v63, %s11027_s19 }
 0x7b3   : > { %5738 = vrot.lane.b32.xlu1 %v11636_v60, %s11027_s19 }
 0x7b4   : > { %6001 = vrot.lane.b32.xlu0 %v11648_v59, %s11027_s19 }
 0x7b7   : > { %5914 = vrot.lane.b32.xlu1 %v11640_v62, %s11027_s19 }
 0x7b8   : > { %5999 = vrot.lane.b32.xlu0 %v11658_v5, %s11027_s19 }
 0x7bb   : > { %5912 = vrot.lane.b32.xlu1 %v11652_v4, %s11027_s19  ;;  %s9010_s19 = sshll.u32 %s598_s26, 4  ;;  %s9011_s19 = int_to_ptr.vmem [resolvable:$true] %s9010_s19 }
 0x7bc   : > { %6183 = vrot.lane.b32.xlu0 %v11604_v38, %s11028_s21  ;;  %p10945_p3 = scmp.lt.s32.totalorder %s9011_s19, %s10943_s20 }
 0x7bf   : > { %6092 = vrot.lane.b32.xlu1 %v11594_v36, %s11028_s21 }
 0x7c0   : > { %6088 = vrot.lane.b32.xlu0 %v11594_v36, %s11029_s23 }
 0x7c3   : > { %6090 = vrot.lane.b32.xlu1 %v14297_v44, %s11028_s21 }
 0x7c4   : > { %6274 = vrot.lane.b32.xlu0 %v11606_v30, %s11028_s21 }
 0x7c7   : > { %6086 = vrot.lane.b32.xlu1 %v14297_v44, %s11029_s23 }
 0x7c8   : > { %6179 = vrot.lane.b32.xlu0 %v11604_v38, %s11029_s23 }
 0x7cb   : > { %6181 = vrot.lane.b32.xlu1 %v11610_v45, %s11028_s21 }
 0x7cf   : > { %v3705_v21 = vpop.xlane.xlu0 %3704  ;;  %6177 = vrot.lane.b32.xlu1 %v11610_v45, %s11029_s23 }
 0x7d0   : > { %10592 = vrcp.f32 %v3705_v21 }
 0x7d3   : > { %v3702_v9 = vpop.xlane.xlu0 %3701  ;;  %6272 = vrot.lane.b32.xlu1 %v11618_v51, %s11028_s21 }
 0x7d4   : > { %10594 = vrcp.f32 %v3702_v9 }
 0x7d5   : > { %v3699_v27 = vpop.xlane.xlu1 %3698 }
 0x7d6   : > { %10596 = vrcp.f32 %v3699_v27 }
 0x7d7   : > { %v3696_v1 = vpop.xlane.xlu0 %3695 }
 0x7d8   : > { %10598 = vrcp.f32 %v3696_v1 }
 0x7db   : > { %v3717_v33 = vpop.xlane.xlu0 %3716 }
 0x7dc   : > { %10600 = vrcp.f32 %v3717_v33 }
 0x7dd   : > { %v3711_v26 = vpop.xlane.xlu1 %3710  ;;  %v10593_v44 = vpop.eup %10592 }
 0x7de   : > { %v3761_v5 = vmul.f32 %v10593_v44, %v12414_v13 }
 0x7df   : > { %v3714_v38 = vpop.xlane.xlu0 %3713 }
 0x7e0   : > { %10602 = vrcp.f32 %v3714_v38 }
 0x7e1   : > { %v10595_v36 = vpop.eup %10594  ;;  %10604 = vrcp.f32 %v3711_v26 }
 0x7e2   : > { %v3760_v45 = vmul.f32 %v10595_v36, %v12419_v2 }
 0x7e3   : > { %v3708_v21 = vpop.xlane.xlu1 %3707  ;;  %v10597_v59 = vpop.eup %10596 }
 0x7e4   : > { %9980 = vmatprep.mubr.msk.f32.mxu1 %vm1981_vm6, %v3760_v45  ;;  %10606 = vrcp.f32 %v3708_v21  ;;  %v3759_v36 = vmul.f32 %v10597_v59, %v12424_v46 }
 0x7e5   : > { %v10599_v9 = vpop.eup %10598  ;;  %9981 = vmatmul.mubr.msk.f32.vlgmr.msra.gmra.mxu1 %vm1981_vm6, %v3761_v5 }
 0x7e6   : > { %9991 = vmatpush3.msra.mxu1 %v12218_v12  ;;  %v3758_v27 = vmul.f32 %v10599_v9, %v12429_v23 }
 0x7e7   : > { %9992 = vmatprep.subr.mxu1 %v12369_v48  ;;  %v3723_v38 = vpop.xlane.xlu1 %3722  ;;  %v3729_v1 = vpop.xlane.xlu0 %3728 }
 0x7e8   : > { %9993 = vmatpush3.msra.mxu1 %v12369_v48  ;;  %9973 = vmatprep.mubr.msk.f32.mxu0 %vm1981_vm6, %v3758_v27  ;;  %10608 = vrcp.f32 %v3723_v38 }
 0x7e9   : > { %10004 = vmatprep.subr.mxu1 %v12373_v50  ;;  %9974 = vmatmul.mubr.msk.f32.vlgmr.msra.gmra.mxu0 %vm1981_vm6, %v3759_v36  ;;  %10610 = vrcp.f32 %v3729_v1  ;;  %v10601_v12 = vpop.eup %10600 }
 0x7ea   : > { %9984 = vmatpush3.msra.mxu0 %v12224_v41  ;;  %v3765_v46 = vmul.f32 %v10601_v12, %v12435_v37 }
 0x7eb   : > { %9985 = vmatprep.subr.mxu0 %v12367_v14  ;;  %v3720_v45 = vpop.xlane.xlu1 %3719  ;;  %v3726_v5 = vpop.xlane.xlu0 %3725 }
 0x7ec   : > { %10612 = vrcp.f32 %v3720_v45  ;;  %9986 = vmatpush3.msra.mxu0 %v12367_v14 }
 0x7ed   : > { %v10603_v59 = vpop.eup %10602  ;;  %10614 = vrcp.f32 %v3726_v5  ;;  %9997 = vmatprep.subr.mxu0 %v12371_v61 }
 0x7ee   : > { %v3764_v48 = vmul.f32 %v10603_v59, %v12445_v35  ;;  %v10605_v41 = vpop.eup %10604 }
 0x7ef   : > { %v3741_v13 = vpop.xlane.xlu1 %3740  ;;  %v3738_v2 = vpop.xlane.xlu0 %3737  ;;  %v3763_v33 = vmul.f32 %v10605_v41, %v12440_v31 }
 0x7f0   : > { %10616 = vrcp.f32 %v3741_v13  ;;  %9994 = vmatprep.mubr.msk.f32.mxu1 %vm1981_vm6, %v3764_v48 }
 0x7f1   : > { %v10607_v23 = vpop.eup %10606  ;;  %10618 = vrcp.f32 %v3738_v2  ;;  %9995 = vmatmul.mubr.msk.f32.vlgmr.msra.gmra.mxu1 %vm1981_vm6, %v3765_v46 }
 0x7f2   : > { %10005 = vmatpush3.msra.mxu1 %v12373_v50  ;;  %v3762_v14 = vmul.f32 %v10607_v23, %v12450_v8 }
 0x7f3   : > { %10006 = vmatprep.subr.mxu1 %v12377_v16  ;;  %v3735_v44 = vpop.xlane.xlu1 %3734  ;;  %v12590_v35 = vpop.permute.xlu0 %4838 }
 0x7f4   : > { %10007 = vmatpush3.msra.mxu1 %v12377_v16  ;;  %9987 = vmatprep.mubr.msk.f32.mxu0 %vm1981_vm6, %v3762_v14  ;;  %10620 = vrcp.f32 %v3735_v44 }
 0x7f5   : > { %10018 = vmatprep.subr.mxu1 %v12381_v42  ;;  %9988 = vmatmul.mubr.msk.f32.vlgmr.msra.gmra.mxu0 %vm1981_vm6, %v3763_v33  ;;  %v10609_v50 = vpop.eup %10608 }
 0x7f6   : > { %9998 = vmatpush3.msra.mxu0 %v12371_v61  ;;  %v10611_v26 = vpop.eup %10610  ;;  %v3767_v38 = vmul.f32 %v10609_v50, %v12455_v18 }
 0x7f7   : > { %9999 = vmatprep.subr.mxu0 %v12375_v17  ;;  %v3732_v37 = vpop.xlane.xlu1 %3731  ;;  %v12599_v8 = vpop.permute.xlu0 %4745  ;;  %v3769_v1 = vmul.f32 %v10611_v26, %v12457_v25 }
 0x7f8   : > { %10622 = vrcp.f32 %v3732_v37  ;;  %10000 = vmatpush3.msra.mxu0 %v12375_v17 }
 0x7f9   : > { %v10613_v16 = vpop.eup %10612  ;;  %10011 = vmatprep.subr.mxu0 %v12379_v29 }
 0x7fa   : > { %v10615_v31 = vpop.eup %10614  ;;  %v3766_v21 = vmul.f32 %v10613_v16, %v12463_v6 }
 0x7fb   : > { %v4932_v9 = vpop.permute.xlu1 %4931  ;;  %v12604_v27 = vpop.permute.xlu0 %4929  ;;  %v3768_v61 = vmul.f32 %v10615_v31, %v12465_v3 }
 0x7fc   : > { %10001 = vmatprep.mubr.msk.f32.mxu0 %vm1981_vm6, %v3766_v21 }
 0x7fd   : > { %v10617_v36 = vpop.eup %10616  ;;  %10008 = vmatprep.mubr.msk.f32.mxu1 %vm1981_vm6, %v3768_v61  ;;  %10002 = vmatmul.mubr.msk.f32.vlgmr.msra.gmra.mxu0 %vm1981_vm6, %v3767_v38 }
 0x7fe   : > { %v10619_v17 = vpop.eup %10618  ;;  %10009 = vmatmul.mubr.msk.f32.vlgmr.msra.gmra.mxu1 %vm1981_vm6, %v3769_v1  ;;  %10012 = vmatpush3.msra.mxu0 %v12379_v29  ;;  %v3773_v25 = vmul.f32 %v10617_v36, %v12471_v28 }
 0x7ff   : > { %10019 = vmatpush3.msra.mxu1 %v12381_v42  ;;  %10013 = vmatprep.subr.mxu0 %v12383_v22  ;;  %v4835_v6 = vpop.permute.xlu1 %4834  ;;  %v12616_v18 = vpop.permute.xlu0 %4836  ;;  %v3772_v3 = vmul.f32 %v10619_v17, %v12473_v49 }
 0x800   : > { %10020 = vmatprep.subr.mxu1 %v12385_v24  ;;  %10014 = vmatpush3.msra.mxu0 %v12383_v22 }
 0x801   : > { %10021 = vmatpush3.msra.mxu1 %v12385_v24  ;;  %10022 = vmatprep.mubr.msk.f32.mxu1 %vm1981_vm6, %v3772_v3  ;;  %v10621_v28 = vpop.eup %10620 }
 0x802   : > { %10025 = vmatprep.subr.msk.mxu0 %vm1258_vm4, %v12387_v10  ;;  %10032 = vmatprep.subr.msk.mxu1 %vm1258_vm4, %v12389_v15  ;;  %v3771_v45 = vmul.f32 %v10621_v28, %v12479_v58 }
 0x803   : > { %10023 = vmatmul.mubr.msk.f32.vlgmr.msra.gmra.mxu1 %vm1981_vm6, %v3773_v25  ;;  %v5023_v29 = vpop.permute.xlu1 %5022  ;;  %v12629_v42 = vpop.permute.xlu0 %5020 }
 0x804   : > { %10033 = vmatpush3.xpose.msk.msra.mxu1 %vm1258_vm4, %v12389_v15  ;;  %10036 = vmatprep.mubr.msk.f32.mxu1 %vm1258_vm4, %v12403_v7  ;;  %v14299_v15 = vld [vmem:[#allocation52_spill] sm:$0xff] }
 0x805   : > { %v10623_v22 = vpop.eup %10622  ;;  %10034 = vmatprep.subr.msk.mxu1 %vm1258_vm4, %v12393_v55 }
 0x806   : > { %v3770_v24 = vmul.f32 %v10623_v22, %v12483_v11 }
 0x807   : > { %v4926_v49 = vpop.permute.xlu1 %4925  ;;  %v4928_v5 = vpop.permute.xlu0 %4927 }
 0x808   : > { %10035 = vmatpush3.xpose.msk.msra.mxu1 %vm1258_vm4, %v12393_v55  ;;  %10015 = vmatprep.mubr.msk.f32.mxu0 %vm1981_vm6, %v3770_v24 }
 0x809   : > { %10046 = vmatprep.subr.msk.mxu1 %vm1258_vm4, %v12406_v39  ;;  %10016 = vmatmul.mubr.msk.f32.vlgmr.msra.gmra.mxu0 %vm1981_vm6, %v3771_v45 }
 0x80a   : > { %10026 = vmatpush3.xpose.msk.msra.mxu0 %vm1258_vm4, %v12387_v10  ;;  %10029 = vmatprep.mubr.msk.f32.mxu0 %vm1258_vm4, %v12395_v20 }
 0x80b   : > { %10037 = vmatmul.mubr.msk.f32.vlgmr.msra.gmra.mxu1 %vm1258_vm4, %v12537_v57  ;;  %10027 = vmatprep.subr.msk.mxu0 %vm1258_vm4, %v12391_v43  ;;  %v5114_v7 = vpop.permute.xlu1 %5113  ;;  %v5019_v10 = vpop.permute.xlu0 %5018 }
 0x80c   : > { %10047 = vmatpush3.xpose.msk.msra.mxu1 %vm1258_vm4, %v12406_v39  ;;  %10050 = vmatprep.mubr.msk.f32.mxu1 %vm1258_vm4, %v12563_v52  ;;  %v14298_v39 = vld [vmem:[#allocation51_spill] sm:$0xff] }
 0x80d   : > { %10048 = vmatprep.subr.msk.mxu1 %vm1258_vm4, %v12547_v34 }
 0x80e   : > { %10028 = vmatpush3.xpose.msk.msra.mxu0 %vm1258_vm4, %v12391_v43 }
 0x80f   : > { %10039 = vmatprep.subr.msk.mxu0 %vm1258_vm4, %v12399_v0  ;;  %v5017_v20 = vpop.permute.xlu1 %5016  ;;  %v5108_v55 = vpop.permute.xlu0 %5107 }
 0x810   : > { %10049 = vmatpush3.xpose.msk.msra.mxu1 %vm1258_vm4, %v12547_v34 }
 0x811   : > { %10060 = vmatprep.subr.msk.mxu1 %vm1258_vm4, %v4932_v9  ;;  %10030 = vmatmul.mubr.msk.f32.vlgmr.msra.gmra.mxu0 %vm1258_vm4, %v14298_v39 }
 0x812   : > { %10040 = vmatpush3.xpose.msk.msra.mxu0 %vm1258_vm4, %v12399_v0  ;;  %10043 = vmatprep.mubr.msk.f32.mxu0 %vm1258_vm4, %v12549_v32 }
 0x813   : > { %10051 = vmatmul.mubr.msk.f32.vlgmr.msra.gmra.mxu1 %vm1258_vm4, %v12599_v8  ;;  %10041 = vmatprep.subr.msk.mxu0 %vm1258_vm4, %v14299_v15  ;;  %v5112_v43 = vpop.permute.xlu1 %5111  ;;  %v5393_v58 = vpop.permute.xlu0 %5392 }
 0x814   : > { %10061 = vmatpush3.xpose.msk.msra.mxu1 %vm1258_vm4, %v4932_v9  ;;  %10064 = vmatprep.mubr.msk.f32.mxu1 %vm1258_vm4, %v4926_v49 }
 0x815   : > { %10062 = vmatprep.subr.msk.mxu1 %vm1258_vm4, %v12604_v27 }
 0x816   : > { %10042 = vmatpush3.xpose.msk.msra.mxu0 %vm1258_vm4, %v14299_v15 }
 0x817   : > { %10053 = vmatprep.subr.msk.mxu0 %vm1258_vm4, %v12557_v40  ;;  %v5110_v0 = vpop.permute.xlu1 %5109  ;;  %v5478_v34 = vpop.permute.xlu0 %5477 }
 0x818   : > { %10063 = vmatpush3.xpose.msk.msra.mxu1 %vm1258_vm4, %v12604_v27 }
 0x819   : > { %10074 = vmatprep.subr.msk.mxu1 %vm1258_vm4, %v5114_v7  ;;  %10044 = vmatmul.mubr.msk.f32.vlgmr.msra.gmra.mxu0 %vm1258_vm4, %v12555_v19 }
 0x81a   : > { %10054 = vmatpush3.xpose.msk.msra.mxu0 %vm1258_vm4, %v12557_v40  ;;  %10057 = vmatprep.mubr.msk.f32.mxu0 %vm1258_vm4, %v4835_v6 }
 0x81b   : > { %10065 = vmatmul.mubr.msk.f32.vlgmr.msra.gmra.mxu1 %vm1258_vm4, %v4928_v5  ;;  %10055 = vmatprep.subr.msk.mxu0 %vm1258_vm4, %v12590_v35  ;;  %v5391_v11 = vpop.permute.xlu1 %5390  ;;  %v12709_v32 = vpop.permute.xlu0 %5653 }
 0x81c   : > { %10075 = vmatpush3.xpose.msk.msra.mxu1 %vm1258_vm4, %v5114_v7  ;;  %10078 = vmatprep.mubr.msk.f32.mxu1 %vm1258_vm4, %v5108_v55 }
 0x81d   : > { %10076 = vmatprep.subr.msk.mxu1 %vm1258_vm4, %v5112_v43 }
 0x81e   : > { %10056 = vmatpush3.xpose.msk.msra.mxu0 %vm1258_vm4, %v12590_v35 }
 0x81f   : > { %10067 = vmatprep.subr.msk.mxu0 %vm1258_vm4, %v5023_v29  ;;  %v5480_v57 = vpop.permute.xlu1 %5479 }
 0x820   : > { %10077 = vmatpush3.xpose.msk.msra.mxu1 %vm1258_vm4, %v5112_v43 }
 0x821   : > { %10058 = vmatmul.mubr.msk.f32.vlgmr.msra.gmra.mxu0 %vm1258_vm4, %v12616_v18  ;;  %10088 = vmatprep.subr.mxu1 %v5480_v57 }
 0x822   : > { %10068 = vmatpush3.xpose.msk.msra.mxu0 %vm1258_vm4, %v5023_v29  ;;  %10071 = vmatprep.mubr.msk.f32.mxu0 %vm1258_vm4, %v5017_v20 }
 0x823   : > { %10079 = vmatmul.mubr.msk.f32.vlgmr.msra.gmra.mxu1 %vm1258_vm4, %v5110_v0  ;;  %10069 = vmatprep.subr.msk.mxu0 %vm1258_vm4, %v12629_v42  ;;  %v12715_v19 = vpop.permute.xlu1 %5566 }
 0x824   : > { %10089 = vmatpush3.msra.mxu1 %v5480_v57 }
 0x825   : > { %10090 = vmatprep.subr.mxu1 %v5478_v34 }
 0x826   : > { %10091 = vmatpush3.msra.mxu1 %v5478_v34  ;;  %10070 = vmatpush3.xpose.msk.msra.mxu0 %vm1258_vm4, %v12629_v42 }
 0x827   : > { %10102 = vmatprep.subr.mxu1 %v12709_v32  ;;  %10081 = vmatprep.subr.mxu0 %v5393_v58 }
 0x829   : > { %10072 = vmatmul.mubr.msk.f32.vlgmr.msra.gmra.mxu0 %vm1258_vm4, %v5019_v10 }
 0x82a   : > { %10082 = vmatpush3.msra.mxu0 %v5393_v58 }
 0x82b   : > { %10083 = vmatprep.subr.mxu0 %v5391_v11 }
 0x82c   : > { %10084 = vmatpush3.msra.mxu0 %v5391_v11 }
 0x82d   : > { %10095 = vmatprep.subr.mxu0 %v12715_v19 }
 0x8a5   : > { %v12718_v40 = vpop.f32.mrf.mxu1 }
 0x8a6   : > { %14300 = vst [vmem:[#allocation51_spill] sm:$0xff] %v12718_v40 }
 0x8a7   : > { %v12720_v52 = vpop.f32.mrf.mxu1 }
 0x8a8   : > { %14301 = vst [vmem:[#allocation52_spill] sm:$0xff] %v12720_v52 }
 0x8a9   : > { %v12724_v59 = vpop.f32.mrf.mxu0 }
 0x8aa   : > { %14303 = vst [vmem:[#allocation54_spill] sm:$0xff] %v12724_v59 }
 0x8ab   : > { %v12728_v13 = vpop.f32.mrf.mxu0 }
 0x8ac   : > { %14305 = vst [vmem:[#allocation56_spill] sm:$0xff] %v12728_v13 }
 0x8b1   : > { %v12722_v12 = vpop.f32.mrf.mxu1 }
 0x8b2   : > { %14302 = vst [vmem:[#allocation53_spill] sm:$0xff] %v12722_v12 }
 0x8b3   : > { %v12726_v48 = vpop.f32.mrf.mxu1 }
 0x8b4   : > { %14304 = vst [vmem:[#allocation55_spill] sm:$0xff] %v12726_v48 }
 0x8b5   : > { %v12732_v46 = vpop.f32.mrf.mxu0 }
 0x8b6   : > { %14307 = vst [vmem:[#allocation58_spill] sm:$0xff] %v12732_v46 }
 0x8b7   : > { %v12736_v23 = vpop.f32.mrf.mxu0 }
 0x8b8   : > { %14309 = vst [vmem:[#allocation60_spill] sm:$0xff] %v12736_v23 }
 0x8bd   : > { %v12738_v14 = vpop.f32.mrf.mxu0 }
 0x8be   : > { %v12730_v2 = vpop.f32.mrf.mxu1  ;;  %14310 = vst [vmem:[#allocation61_spill] sm:$0xff] %v12738_v14 }
 0x8bf   : > { %14306 = vst [vmem:[#allocation57_spill] sm:$0xff] %v12730_v2  ;;  %v12742_v35 = vpop.f32.mrf.mxu0 }
 0x8c0   : > { %v12734_v41 = vpop.f32.mrf.mxu1  ;;  %14312 = vst [vmem:[#allocation63_spill] sm:$0xff] %v12742_v35 }
 0x8c1   : > { %14308 = vst [vmem:[#allocation59_spill] sm:$0xff] %v12734_v41 }
 0x8c3   : > { %v12740_v44 = vpop.f32.mrf.mxu1 }
 0x8c4   : > { %14311 = vst [vmem:[#allocation62_spill] sm:$0xff] %v12740_v44 }
 0x8c5   : > { %v12744_v33 = vpop.f32.mrf.mxu1 }
 0x8c6   : > { %14313 = vst [vmem:[#allocation64_spill] sm:$0xff] %v12744_v33 }
 0x8c9   : > { %v12746_v37 = vpop.f32.mrf.mxu0 }
 0x8ca   : > { %14314 = vst [vmem:[#allocation65_spill] sm:$0xff] %v12746_v37 }
 0x8cb   : > { %v10038_v50 = vpop.f32.mrf.mxu1  ;;  %v12758_v9 = vpop.f32.mrf.mxu0 }
 0x8cc   : > { %v12750_v26 = vsel %vm1251_vm5, %v10038_v50, -1e+30  ;;  %14316 = vst [vmem:[#allocation34_spill] sm:$0xff] %v12758_v9 }
 0x8cd   : > { %v5223_v16 = vsel %vm1981_vm6, %v12750_v26, -inf  ;;  %v4643_v31 = vpop.f32.mrf.mxu1 }
 0x8ce   : > { %v12756_v21 = vsel %vm1251_vm5, %v4643_v31, -1e+30  ;;  %5224 = vmax.xlane.f32.xlu0 %v5223_v16 }
 0x8cf   : > { %v5220_v27 = vsel %vm1981_vm6, %v12756_v21, -inf }
 0x8d1   : > { %v10031_v61 = vpop.f32.mrf.mxu0 }
 0x8d2   : > { %5221 = vmax.xlane.f32.xlu0 %v5220_v27  ;;  %v12764_v38 = vsel %vm1251_vm5, %v10031_v61, -1e+30 }
 0x8d3   : > { %v5217_v1 = vsel %vm1981_vm6, %v12764_v38, -inf  ;;  %v10052_v36 = vpop.f32.mrf.mxu1  ;;  %v4552_v17 = vpop.f32.mrf.mxu0 }
 0x8d4   : > { %v12770_v6 = vsel %vm1251_vm5, %v4552_v17, -1e+30  ;;  %5218 = vmax.xlane.f32.xlu1 %v5217_v1  ;;  %v12776_v3 = vsel %vm1251_vm5, %v10052_v36, -1e+30 }
 0x8d5   : > { %v5214_v18 = vsel %vm1981_vm6, %v12770_v6, -inf  ;;  %v4825_v25 = vpop.f32.mrf.mxu1  ;;  %v5235_v29 = vsel %vm1981_vm6, %v12776_v3, -inf }
 0x8d6   : > { %5215 = vmax.xlane.f32.xlu0 %v5214_v18  ;;  %v12782_v28 = vsel %vm1251_vm5, %v4825_v25, -1e+30 }
 0x8d7   : > { %v5232_v45 = vsel %vm1981_vm6, %v12782_v28, -inf }
 0x8d9   : > { %v10045_v42 = vpop.f32.mrf.mxu0 }
 0x8da   : > { %v12786_v22 = vsel %vm1251_vm5, %v10045_v42, -1e+30  ;;  %5236 = vmax.xlane.f32.xlu0 %v5235_v29 }
 0x8db   : > { %v5229_v24 = vsel %vm1981_vm6, %v12786_v22, -inf  ;;  %v4734_v49 = vpop.f32.mrf.mxu0  ;;  %v10066_v5 = vpop.f32.mrf.mxu1 }
 0x8dc   : > { %5230 = vmax.xlane.f32.xlu1 %v5229_v24  ;;  %v12794_v7 = vsel %vm1251_vm5, %v4734_v49, -1e+30  ;;  %v12800_v15 = vsel %vm1251_vm5, %v10066_v5, -1e+30  ;;  %v12858_v49 = vpop.permute.xlu1 %5564 }
 0x8dd   : > { %v5226_v10 = vsel %vm1981_vm6, %v12794_v7, -inf  ;;  %v5007_v20 = vpop.f32.mrf.mxu1  ;;  %v5247_v57 = vsel %vm1981_vm6, %v12800_v15, -inf }
 0x8de   : > { %5233 = vmax.xlane.f32.xlu0 %v5232_v45  ;;  %v12816_v34 = vsel %vm1251_vm5, %v5007_v20, -1e+30  ;;  %v12860_v45 = vpop.permute.xlu0 %5651 }
 0x8df   : > { %v5244_v27 = vsel %vm1981_vm6, %v12816_v34, -inf }
 0x8e0   : > { %v12862_v5 = vpop.permute.xlu1 %5740 }
 0x8e1   : > { %v10059_v39 = vpop.f32.mrf.mxu0 }
 0x8e2   : > { %v12804_v43 = vsel %vm1251_vm5, %v10059_v39, -1e+30  ;;  %5227 = vmax.xlane.f32.xlu0 %v5226_v10  ;;  %v12864_v10 = vpop.permute.xlu0 %5827 }
 0x8e3   : > { %v5241_v55 = vsel %vm1981_vm6, %v12804_v43, -inf  ;;  %v10080_v0 = vpop.f32.mrf.mxu1  ;;  %v4916_v58 = vpop.f32.mrf.mxu0 }
 0x8e4   : > { %v12810_v11 = vsel %vm1251_vm5, %v4916_v58, -1e+30  ;;  %5242 = vmax.xlane.f32.xlu1 %v5241_v55  ;;  %v12822_v31 = vsel %vm1251_vm5, %v10080_v0, -1e+30  ;;  %v12866_v20 = vpop.permute.xlu1 %5738 }
 0x8e5   : > { %v5238_v50 = vsel %vm1981_vm6, %v12810_v11, -inf  ;;  %v5189_v16 = vpop.f32.mrf.mxu1  ;;  %v5259_v36 = vsel %vm1981_vm6, %v12822_v31, -inf }
 0x8e6   : > { %5248 = vmax.xlane.f32.xlu0 %v5247_v57  ;;  %v12828_v1 = vsel %vm1251_vm5, %v5189_v16, -1e+30  ;;  %v12868_v39 = vpop.permute.xlu0 %5825 }
 0x8e7   : > { %v5256_v18 = vsel %vm1981_vm6, %v12828_v1, -inf }
 0x8e8   : > { %5239 = vmax.xlane.f32.xlu1 %v5238_v50  ;;  %v12870_v55 = vpop.permute.xlu1 %5914 }
 0x8e9   : > { %v10073_v61 = vpop.f32.mrf.mxu0 }
 0x8ea   : > { %5245 = vmax.xlane.f32.xlu0 %v5244_v27  ;;  %v12834_v17 = vsel %vm1251_vm5, %v10073_v61, -1e+30  ;;  %v12872_v0 = vpop.permute.xlu0 %6001 }
 0x8eb   : > { %v5098_v25 = vpop.f32.mrf.mxu0  ;;  %v5253_v29 = vsel %vm1981_vm6, %v12834_v17, -inf }
 0x8ec   : > { %5260 = vmax.xlane.f32.xlu1 %v5259_v36  ;;  %v12842_v42 = vsel %vm1251_vm5, %v5098_v25, -1e+30  ;;  %v12874_v58 = vpop.permute.xlu1 %5912 }
 0x8ed   : > { %v5250_v24 = vsel %vm1981_vm6, %v12842_v42, -inf }
 0x8ee   : > { %5257 = vmax.xlane.f32.xlu0 %v5256_v18  ;;  %v12876_v57 = vpop.permute.xlu0 %5999 }
 0x8f0   : > { %5254 = vmax.xlane.f32.xlu1 %v5253_v29  ;;  %v12878_v50 = vpop.permute.xlu1 %6092 }
 0x8f2   : > { %v12880_v16 = vpop.permute.xlu0 %6183 }
 0x8f4   : > { %5251 = vmax.xlane.f32.xlu1 %v5250_v24  ;;  %v12882_v27 = vpop.permute.xlu1 %6090 }
 0x8f6   : > { %v12884_v61 = vpop.permute.xlu0 %6088 }
 0x8f8   : > { %v12886_v36 = vpop.permute.xlu1 %6086 }
 0x8fa   : > { %v12888_v18 = vpop.permute.xlu0 %6274 }
 0x8fc   : > { %v12890_v25 = vpop.permute.xlu1 %6181 }
 0x8fe   : > { %v12892_v29 = vpop.permute.xlu0 %6179 }
 0x900   : > { %v12894_v24 = vpop.permute.xlu1 %6177 }
 0x904   : > { %6365 = vrot.lane.b32.xlu0 %v11614_v47, %s11028_s21  ;;  %v12897_v9 = vpop.permute.xlu1 %6272 }
 0x905   : > { %6268 = vrot.lane.b32.xlu1 %v11618_v51, %s11029_s23 }
 0x908   : > { %6270 = vrot.lane.b32.xlu0 %v11606_v30, %s11029_s23 }
 0x909   : > { %6363 = vrot.lane.b32.xlu1 %v11620_v54, %s11028_s21 }
 0x90c   : > { %6456 = vrot.lane.b32.xlu0 %v11624_v56, %s11028_s21 }
 0x90d   : > { %6359 = vrot.lane.b32.xlu1 %v11620_v54, %s11029_s23 }
 0x957   : > { %v5225_v33 = vpop.xlane.xlu0 %5224 }
 0x958   : > { %v5265_v44 = vsub.f32 %v12750_v26, %v5225_v33 }
 0x95a   : > { %v5284_v37 = vmul.f32 1.442695, %v5265_v44 }
 0x95b   : > { %v5222_v41 = vpop.xlane.xlu0 %5221 }
 0x95c   : > { %10624 = vpow2.f32 %v5284_v37  ;;  %v5264_v2 = vsub.f32 %v12756_v21, %v5222_v41 }
 0x95d   : > { %v5219_v35 = vpop.xlane.xlu1 %5218 }
 0x95e   : > { %v5282_v14 = vmul.f32 1.442695, %v5264_v2  ;;  %v5263_v48 = vsub.f32 %v12764_v38, %v5219_v35 }
 0x95f   : > { %v5216_v12 = vpop.xlane.xlu0 %5215 }
 0x960   : > { %10626 = vpow2.f32 %v5282_v14  ;;  %v5280_v23 = vmul.f32 1.442695, %v5263_v48  ;;  %v5262_v46 = vsub.f32 %v12770_v6, %v5216_v12 }
 0x962   : > { %10628 = vpow2.f32 %v5280_v23  ;;  %v5278_v52 = vmul.f32 1.442695, %v5262_v46 }
 0x963   : > { %v5237_v40 = vpop.xlane.xlu0 %5236 }
 0x964   : > { %10630 = vpow2.f32 %v5278_v52  ;;  %v5269_v33 = vsub.f32 %v12776_v3, %v5237_v40 }
 0x965   : > { %v5231_v44 = vpop.xlane.xlu1 %5230 }
 0x966   : > { %v5292_v26 = vmul.f32 1.442695, %v5269_v33  ;;  %v5267_v37 = vsub.f32 %v12786_v22, %v5231_v44 }
 0x967   : > { %v5234_v41 = vpop.xlane.xlu0 %5233 }
 0x968   : > { %10632 = vpow2.f32 %v5292_v26  ;;  %v5288_v2 = vmul.f32 1.442695, %v5267_v37  ;;  %v5268_v35 = vsub.f32 %v12782_v28, %v5234_v41 }
 0x969   : > { %v12905_v21 = vpop.eup %10624 }
 0x96a   : > { %10634 = vpow2.f32 %v5288_v2  ;;  %v5290_v48 = vmul.f32 1.442695, %v5268_v35  ;;  %v5319_v12 = vsel %vm1981_vm6, %v12905_v21, 0.0 }
 0x96b   : > { %5320 = vadd.xlane.f32.xlu0 %v5319_v12  ;;  %v5228_v52 = vpop.xlane.xlu0 %5227 }
 0x96c   : > { %10636 = vpow2.f32 %v5290_v48  ;;  %v5266_v40 = vsub.f32 %v12794_v7, %v5228_v52 }
 0x96d   : > { %v12910_v46 = vpop.eup %10626  ;;  %v5243_v23 = vpop.xlane.xlu1 %5242 }
 0x96e   : > { %v5286_v14 = vmul.f32 1.442695, %v5266_v40  ;;  %v5271_v38 = vsub.f32 %v12804_v43, %v5243_v23  ;;  %v5316_v6 = vsel %vm1981_vm6, %v12910_v46, 0.0 }
 0x96f   : > { %v12915_v3 = vpop.eup %10628  ;;  %5317 = vadd.xlane.f32.xlu0 %v5316_v6  ;;  %v5249_v28 = vpop.xlane.xlu0 %5248 }
 0x970   : > { %10638 = vpow2.f32 %v5286_v14  ;;  %v5296_v22 = vmul.f32 1.442695, %v5271_v38  ;;  %v5273_v33 = vsub.f32 %v12800_v15, %v5249_v28  ;;  %v5313_v7 = vsel %vm1981_vm6, %v12915_v3, 0.0 }
 0x971   : > { %v12920_v44 = vpop.eup %10630  ;;  %v5240_v26 = vpop.xlane.xlu1 %5239  ;;  %5314 = vadd.xlane.f32.xlu1 %v5313_v7 }
 0x972   : > { %10640 = vpow2.f32 %v5296_v22  ;;  %v5300_v43 = vmul.f32 1.442695, %v5273_v33  ;;  %v5270_v37 = vsub.f32 %v12810_v11, %v5240_v26  ;;  %v5310_v41 = vsel %vm1981_vm6, %v12920_v44, 0.0 }
 0x973   : > { %5311 = vadd.xlane.f32.xlu0 %v5310_v41  ;;  %v5246_v2 = vpop.xlane.xlu0 %5245 }
 0x974   : > { %10642 = vpow2.f32 %v5300_v43  ;;  %v5294_v35 = vmul.f32 1.442695, %v5270_v37  ;;  %v5272_v15 = vsub.f32 %v12816_v34, %v5246_v2 }
 0x975   : > { %v12926_v48 = vpop.eup %10632  ;;  %v5261_v12 = vpop.xlane.xlu1 %5260 }
 0x976   : > { %10644 = vpow2.f32 %v5294_v35  ;;  %v5298_v52 = vmul.f32 1.442695, %v5272_v15  ;;  %v5277_v40 = vsub.f32 %v12822_v31, %v5261_v12  ;;  %v5331_v23 = vsel %vm1981_vm6, %v12926_v48, 0.0 }
 0x977   : > { %v12931_v11 = vpop.eup %10634  ;;  %5332 = vadd.xlane.f32.xlu0 %v5331_v23  ;;  %v5258_v14 = vpop.xlane.xlu0 %5257 }
 0x978   : > { %10646 = vpow2.f32 %v5298_v52  ;;  %v5308_v38 = vmul.f32 1.442695, %v5277_v40  ;;  %v5276_v6 = vsub.f32 %v12828_v1, %v5258_v14  ;;  %v5325_v34 = vsel %vm1981_vm6, %v12931_v11, 0.0 }
 0x979   : > { %v12936_v28 = vpop.eup %10636  ;;  %5326 = vadd.xlane.f32.xlu1 %v5325_v34  ;;  %v5255_v22 = vpop.xlane.xlu1 %5254 }
 0x97a   : > { %10648 = vpow2.f32 %v5308_v38  ;;  %v5306_v31 = vmul.f32 1.442695, %v5276_v6  ;;  %v5275_v33 = vsub.f32 %v12834_v17, %v5255_v22  ;;  %v5328_v7 = vsel %vm1981_vm6, %v12936_v28, 0.0 }
 0x97b   : > { %5329 = vadd.xlane.f32.xlu0 %v5328_v7 }
 0x97c   : > { %10650 = vpow2.f32 %v5306_v31  ;;  %v5304_v26 = vmul.f32 1.442695, %v5275_v33 }
 0x97d   : > { %v12941_v43 = vpop.eup %10638  ;;  %v5252_v1 = vpop.xlane.xlu1 %5251 }
 0x97e   : > { %10652 = vpow2.f32 %v5304_v26  ;;  %v5274_v37 = vsub.f32 %v12842_v42, %v5252_v1  ;;  %v5322_v41 = vsel %vm1981_vm6, %v12941_v43, 0.0  ;;  %v14317_v26 = vld [vmem:[#allocation32_spill] sm:$0xff]  ;;  %v14318_v1 = vld [vmem:[#allocation33_spill] sm:$0xff] }
 0x97f   : > { %v12946_v2 = vpop.eup %10640  ;;  %5323 = vadd.xlane.f32.xlu1 %v5322_v41  ;;  %v14320_v41 = vld [vmem:[#allocation29_spill] sm:$0xff] }
 0x980   : > { %v5302_v35 = vmul.f32 1.442695, %v5274_v37  ;;  %v5337_v15 = vsel %vm1981_vm6, %v12946_v2, 0.0  ;;  %v14319_v37 = vld [vmem:[#allocation28_spill] sm:$0xff] }
 0x981   : > { %v12948_v17 = vpop.eup %10642 }
 0x982   : > { %10654 = vpow2.f32 %v5302_v35  ;;  %v5343_v12 = vsel %vm1981_vm6, %v12948_v17, 0.0  ;;  %v14321_v35 = vld [vmem:[#allocation30_spill] sm:$0xff] }
 0x983   : > { %v12954_v52 = vpop.eup %10644  ;;  %5338 = vadd.xlane.f32.xlu1 %v5337_v15  ;;  %5344 = vadd.xlane.f32.xlu0 %v5343_v12  ;;  %v14322_v15 = vld [vmem:[#allocation31_spill] sm:$0xff]  ;;  %v13026_v12 = vpop.permute.xlu0 %6365 }
 0x984   : > { %v5334_v40 = vsel %vm1981_vm6, %v12954_v52, 0.0 }
 0x985   : > { %v12956_v42 = vpop.eup %10646 }
 0x986   : > { %v5340_v23 = vsel %vm1981_vm6, %v12956_v42, 0.0 }
 0x987   : > { %v12962_v14 = vpop.eup %10648  ;;  %5335 = vadd.xlane.f32.xlu1 %v5334_v40  ;;  %5341 = vadd.xlane.f32.xlu0 %v5340_v23  ;;  %v13028_v40 = vpop.permute.xlu0 %6270 }
 0x988   : > { %v5355_v6 = vsel %vm1981_vm6, %v12962_v14, 0.0  ;;  %v13030_v23 = vpop.permute.xlu1 %6268 }
 0x989   : > { %v12964_v38 = vpop.eup %10650 }
 0x98a   : > { %v5352_v34 = vsel %vm1981_vm6, %v12964_v38, 0.0 }
 0x98b   : > { %v12970_v22 = vpop.eup %10652  ;;  %5356 = vadd.xlane.f32.xlu1 %v5355_v6  ;;  %5353 = vadd.xlane.f32.xlu0 %v5352_v34  ;;  %v13032_v6 = vpop.permute.xlu0 %6456 }
 0x98c   : > { %v5349_v31 = vsel %vm1981_vm6, %v12970_v22, 0.0  ;;  %v13034_v34 = vpop.permute.xlu1 %6363 }
 0x98f   : > { %v12974_v33 = vpop.eup %10654  ;;  %5350 = vadd.xlane.f32.xlu1 %v5349_v31 }
 0x990   : > { %v5346_v7 = vsel %vm1981_vm6, %v12974_v33, 0.0  ;;  %v13036_v31 = vpop.permute.xlu1 %6359 }
 0x993   : > { %5347 = vadd.xlane.f32.xlu1 %v5346_v7 }
 0x9a1   : > { %6361 = vrot.lane.b32.xlu0 %v11614_v47, %s11029_s23 }
 0x9a4   : > { %6454 = vrot.lane.b32.xlu1 %v11636_v60, %s11028_s21 }
 0x9a5   : > { %6547 = vrot.lane.b32.xlu0 %v11632_v53, %s11028_s21 }
 0x9a8   : > { %6450 = vrot.lane.b32.xlu1 %v11636_v60, %s11029_s23 }
 0x9a9   : > { %6452 = vrot.lane.b32.xlu0 %v11624_v56, %s11029_s23 }
 0x9ac   : > { %6545 = vrot.lane.b32.xlu1 %v11644_v63, %s11028_s21 }
 0x9ad   : > { %6638 = vrot.lane.b32.xlu0 %v11640_v62, %s11028_s21 }
 0x9b0   : > { %6541 = vrot.lane.b32.xlu1 %v11644_v63, %s11029_s23 }
 0x9b1   : > { %6543 = vrot.lane.b32.xlu0 %v11632_v53, %s11029_s23 }
 0x9b4   : > { %6636 = vrot.lane.b32.xlu1 %v11652_v4, %s11028_s21 }
 0x9b5   : > { %6729 = vrot.lane.b32.xlu0 %v14317_v26, %s11028_s21 }
 0x9b8   : > { %6632 = vrot.lane.b32.xlu1 %v11652_v4, %s11029_s23 }
 0x9b9   : > { %6634 = vrot.lane.b32.xlu0 %v11640_v62, %s11029_s23 }
 0x9bc   : > { %6727 = vrot.lane.b32.xlu1 %v14318_v1, %s11028_s21 }
 0x9bd   : > { %6723 = vrot.lane.b32.xlu0 %v14318_v1, %s11029_s23 }
 0x9c0   : > { %6725 = vrot.lane.b32.xlu1 %v14317_v26, %s11029_s23 }
 0x9c1   : > { %7008 = vrot.lane.b32.xlu0 %v14319_v37, %s11030_s6 }
 0x9c4   : > { %7006 = vrot.lane.b32.xlu1 %v14320_v41, %s11030_s6 }
 0x9c5   : > { %7095 = vrot.lane.b32.xlu0 %v14321_v35, %s11030_s6 }
 0x9c8   : > { %7093 = vrot.lane.b32.xlu1 %v14322_v15, %s11030_s6 }
 0x9c9   : > { %7269 = vrot.lane.b32.xlu0 %v11614_v47, %s11030_s6 }
 0x9cc   : > { %7182 = vrot.lane.b32.xlu1 %v11606_v30, %s11030_s6 }
 0x9d0   : > { %7180 = vrot.lane.b32.xlu1 %v11618_v51, %s11030_s6 }
 0x9d4   : > { %7267 = vrot.lane.b32.xlu1 %v11620_v54, %s11030_s6 }
 0x9f4   : > { %v5321_v47 = vpop.xlane.xlu0 %5320 }
 0x9f5   : > { %10656 = vrcp.f32 %v5321_v47 }
 0x9f8   : > { %v5318_v30 = vpop.xlane.xlu0 %5317 }
 0x9f9   : > { %10658 = vrcp.f32 %v5318_v30 }
 0x9fa   : > { %v5315_v51 = vpop.xlane.xlu1 %5314 }
 0x9fb   : > { %10660 = vrcp.f32 %v5315_v51 }
 0x9fc   : > { %v5312_v7 = vpop.xlane.xlu0 %5311 }
 0x9fd   : > { %10662 = vrcp.f32 %v5312_v7 }
 0xa00   : > { %v5333_v54 = vpop.xlane.xlu0 %5332 }
 0xa01   : > { %10664 = vrcp.f32 %v5333_v54 }
 0xa02   : > { %v5327_v37 = vpop.xlane.xlu1 %5326  ;;  %v10657_v35 = vpop.eup %10656 }
 0xa03   : > { %v5377_v59 = vmul.f32 %v10657_v35, %v12905_v21 }
 0xa04   : > { %v5330_v41 = vpop.xlane.xlu0 %5329 }
 0xa05   : > { %10666 = vrcp.f32 %v5330_v41 }
 0xa06   : > { %v10659_v15 = vpop.eup %10658  ;;  %10668 = vrcp.f32 %v5327_v37 }
 0xa07   : > { %v5376_v13 = vmul.f32 %v10659_v15, %v12910_v46 }
 0xa08   : > { %v5324_v26 = vpop.xlane.xlu1 %5323  ;;  %v10661_v47 = vpop.eup %10660 }
 0xa09   : > { %10092 = vmatprep.mubr.msk.f32.mxu1 %vm1981_vm6, %v5376_v13  ;;  %10670 = vrcp.f32 %v5324_v26  ;;  %v5375_v46 = vmul.f32 %v10661_v47, %v12915_v3 }
 0xa0a   : > { %v10663_v30 = vpop.eup %10662  ;;  %10093 = vmatmul.mubr.msk.f32.vlgmr.msra.gmra.mxu1 %vm1981_vm6, %v5377_v59 }
 0xa0b   : > { %10103 = vmatpush3.msra.mxu1 %v12709_v32  ;;  %v5374_v51 = vmul.f32 %v10663_v30, %v12920_v44 }
 0xa0c   : > { %10104 = vmatprep.subr.mxu1 %v12860_v45  ;;  %v5339_v7 = vpop.xlane.xlu1 %5338  ;;  %v5345_v54 = vpop.xlane.xlu0 %5344 }
 0xa0d   : > { %10105 = vmatpush3.msra.mxu1 %v12860_v45  ;;  %10085 = vmatprep.mubr.msk.f32.mxu0 %vm1981_vm6, %v5374_v51  ;;  %10672 = vrcp.f32 %v5339_v7 }
 0xa0e   : > { %10116 = vmatprep.subr.mxu1 %v12864_v10  ;;  %10086 = vmatmul.mubr.msk.f32.vlgmr.msra.gmra.mxu0 %vm1981_vm6, %v5375_v46  ;;  %10674 = vrcp.f32 %v5345_v54  ;;  %v10665_v13 = vpop.eup %10664 }
 0xa0f   : > { %10096 = vmatpush3.msra.mxu0 %v12715_v19  ;;  %v5381_v26 = vmul.f32 %v10665_v13, %v12926_v48 }
 0xa10   : > { %10097 = vmatprep.subr.mxu0 %v12858_v49  ;;  %v5336_v32 = vpop.xlane.xlu1 %5335  ;;  %v5342_v59 = vpop.xlane.xlu0 %5341 }
 0xa11   : > { %10676 = vrcp.f32 %v5336_v32  ;;  %10098 = vmatpush3.msra.mxu0 %v12858_v49 }
 0xa12   : > { %v10667_v21 = vpop.eup %10666  ;;  %10678 = vrcp.f32 %v5342_v59  ;;  %10109 = vmatprep.subr.mxu0 %v12862_v5 }
 0xa13   : > { %v5380_v45 = vmul.f32 %v10667_v21, %v12936_v28  ;;  %v10669_v19 = vpop.eup %10668 }
 0xa14   : > { %v5357_v3 = vpop.xlane.xlu1 %5356  ;;  %v5354_v44 = vpop.xlane.xlu0 %5353  ;;  %v5379_v35 = vmul.f32 %v10669_v19, %v12931_v11 }
 0xa15   : > { %10680 = vrcp.f32 %v5357_v3  ;;  %10106 = vmatprep.mubr.msk.f32.mxu1 %vm1981_vm6, %v5380_v45 }
 0xa16   : > { %v10671_v37 = vpop.eup %10670  ;;  %10682 = vrcp.f32 %v5354_v44  ;;  %10107 = vmatmul.mubr.msk.f32.vlgmr.msra.gmra.mxu1 %vm1981_vm6, %v5381_v26 }
 0xa17   : > { %10117 = vmatpush3.msra.mxu1 %v12864_v10  ;;  %v5378_v49 = vmul.f32 %v10671_v37, %v12941_v43 }
 0xa18   : > { %10118 = vmatprep.subr.mxu1 %v12868_v39  ;;  %v5351_v41 = vpop.xlane.xlu1 %5350  ;;  %v13061_v28 = vpop.permute.xlu0 %6361 }
 0xa19   : > { %10119 = vmatpush3.msra.mxu1 %v12868_v39  ;;  %10099 = vmatprep.mubr.msk.f32.mxu0 %vm1981_vm6, %v5378_v49  ;;  %10684 = vrcp.f32 %v5351_v41 }
 0xa1a   : > { %10130 = vmatprep.subr.mxu1 %v12872_v0  ;;  %10100 = vmatmul.mubr.msk.f32.vlgmr.msra.gmra.mxu0 %vm1981_vm6, %v5379_v35  ;;  %v10673_v10 = vpop.eup %10672 }
 0xa1b   : > { %10110 = vmatpush3.msra.mxu0 %v12862_v5  ;;  %v10675_v15 = vpop.eup %10674  ;;  %v5383_v7 = vmul.f32 %v10673_v10, %v12946_v2 }
 0xa1c   : > { %10111 = vmatprep.subr.mxu0 %v12866_v20  ;;  %v5348_v48 = vpop.xlane.xlu1 %5347  ;;  %v13070_v43 = vpop.permute.xlu0 %6547  ;;  %v5385_v54 = vmul.f32 %v10675_v15, %v12948_v17 }
 0xa1d   : > { %10686 = vrcp.f32 %v5348_v48  ;;  %10112 = vmatpush3.msra.mxu0 %v12866_v20 }
 0xa1e   : > { %v10677_v39 = vpop.eup %10676  ;;  %10123 = vmatprep.subr.mxu0 %v12870_v55 }
 0xa1f   : > { %v10679_v11 = vpop.eup %10678  ;;  %v5382_v47 = vmul.f32 %v10677_v39, %v12954_v52 }
 0xa20   : > { %v13075_v30 = vpop.permute.xlu1 %6454  ;;  %v13077_v5 = vpop.permute.xlu0 %6452  ;;  %v5384_v51 = vmul.f32 %v10679_v11, %v12956_v42 }
 0xa21   : > { %10113 = vmatprep.mubr.msk.f32.mxu0 %vm1981_vm6, %v5382_v47 }
 0xa22   : > { %v10681_v46 = vpop.eup %10680  ;;  %10120 = vmatprep.mubr.msk.f32.mxu1 %vm1981_vm6, %v5384_v51  ;;  %10114 = vmatmul.mubr.msk.f32.vlgmr.msra.gmra.mxu0 %vm1981_vm6, %v5383_v7 }
 0xa23   : > { %v10683_v20 = vpop.eup %10682  ;;  %10121 = vmatmul.mubr.msk.f32.vlgmr.msra.gmra.mxu1 %vm1981_vm6, %v5385_v54  ;;  %10124 = vmatpush3.msra.mxu0 %v12870_v55  ;;  %v5389_v17 = vmul.f32 %v10681_v46, %v12962_v14 }
 0xa24   : > { %10131 = vmatpush3.msra.mxu1 %v12872_v0  ;;  %10125 = vmatprep.subr.mxu0 %v12874_v58  ;;  %v6451_v52 = vpop.permute.xlu1 %6450  ;;  %v13089_v2 = vpop.permute.xlu0 %6638  ;;  %v5388_v42 = vmul.f32 %v10683_v20, %v12964_v38 }
 0xa25   : > { %10132 = vmatprep.subr.mxu1 %v12876_v57  ;;  %10126 = vmatpush3.msra.mxu0 %v12874_v58 }
 0xa26   : > { %10133 = vmatpush3.msra.mxu1 %v12876_v57  ;;  %10134 = vmatprep.mubr.msk.f32.mxu1 %vm1981_vm6, %v5388_v42  ;;  %v10685_v38 = vpop.eup %10684 }
 0xa27   : > { %10137 = vmatprep.subr.msk.mxu0 %vm1258_vm4, %v12878_v50  ;;  %10144 = vmatprep.subr.msk.mxu1 %vm1258_vm4, %v12880_v16  ;;  %v5387_v32 = vmul.f32 %v10685_v38, %v12970_v22 }
 0xa28   : > { %10135 = vmatmul.mubr.msk.f32.vlgmr.msra.gmra.mxu1 %vm1981_vm6, %v5389_v17  ;;  %v6546_v55 = vpop.permute.xlu1 %6545  ;;  %v6544_v0 = vpop.permute.xlu0 %6543 }
 0xa29   : > { %10145 = vmatpush3.xpose.msk.msra.mxu1 %vm1258_vm4, %v12880_v16  ;;  %10148 = vmatprep.mubr.msk.f32.mxu1 %vm1258_vm4, %v12894_v24 }
 0xa2a   : > { %v10687_v58 = vpop.eup %10686  ;;  %10146 = vmatprep.subr.msk.mxu1 %vm1258_vm4, %v12890_v25 }
 0xa2b   : > { %v5386_v57 = vmul.f32 %v10687_v58, %v12974_v33 }
 0xa2c   : > { %v6542_v14 = vpop.permute.xlu1 %6541  ;;  %v6730_v59 = vpop.permute.xlu0 %6729 }
 0xa2d   : > { %10147 = vmatpush3.xpose.msk.msra.mxu1 %vm1258_vm4, %v12890_v25  ;;  %10127 = vmatprep.mubr.msk.f32.mxu0 %vm1981_vm6, %v5386_v57 }
 0xa2e   : > { %10158 = vmatprep.subr.msk.mxu1 %vm1258_vm4, %v13026_v12  ;;  %10128 = vmatmul.mubr.msk.f32.vlgmr.msra.gmra.mxu0 %vm1981_vm6, %v5387_v32 }
 0xa2f   : > { %10138 = vmatpush3.xpose.msk.msra.mxu0 %vm1258_vm4, %v12878_v50  ;;  %10141 = vmatprep.mubr.msk.f32.mxu0 %vm1258_vm4, %v12886_v36 }
 0xa30   : > { %10149 = vmatmul.mubr.msk.f32.vlgmr.msra.gmra.mxu1 %vm1258_vm4, %v12892_v29  ;;  %10139 = vmatprep.subr.msk.mxu0 %vm1258_vm4, %v12882_v27  ;;  %v6637_v16 = vpop.permute.xlu1 %6636  ;;  %v6635_v50 = vpop.permute.xlu0 %6634 }
 0xa31   : > { %10159 = vmatpush3.xpose.msk.msra.mxu1 %vm1258_vm4, %v13026_v12  ;;  %10162 = vmatprep.mubr.msk.f32.mxu1 %vm1258_vm4, %v13036_v31 }
 0xa32   : > { %10160 = vmatprep.subr.msk.mxu1 %vm1258_vm4, %v13034_v34 }
 0xa33   : > { %10140 = vmatpush3.xpose.msk.msra.mxu0 %vm1258_vm4, %v12882_v27 }
 0xa34   : > { %10151 = vmatprep.subr.msk.mxu0 %vm1258_vm4, %v12888_v18  ;;  %v6633_v36 = vpop.permute.xlu1 %6632  ;;  %v6724_v25 = vpop.permute.xlu0 %6723 }
 0xa35   : > { %10161 = vmatpush3.xpose.msk.msra.mxu1 %vm1258_vm4, %v13034_v34 }
 0xa36   : > { %10172 = vmatprep.subr.msk.mxu1 %vm1258_vm4, %v13070_v43  ;;  %10142 = vmatmul.mubr.msk.f32.vlgmr.msra.gmra.mxu0 %vm1258_vm4, %v12884_v61 }
 0xa37   : > { %10152 = vmatpush3.xpose.msk.msra.mxu0 %vm1258_vm4, %v12888_v18  ;;  %10155 = vmatprep.mubr.msk.f32.mxu0 %vm1258_vm4, %v13030_v23 }
 0xa38   : > { %10163 = vmatmul.mubr.msk.f32.vlgmr.msra.gmra.mxu1 %vm1258_vm4, %v13061_v28  ;;  %10153 = vmatprep.subr.msk.mxu0 %vm1258_vm4, %v12897_v9  ;;  %v6728_v27 = vpop.permute.xlu1 %6727  ;;  %v7009_v18 = vpop.permute.xlu0 %7008 }
 0xa39   : > { %10173 = vmatpush3.xpose.msk.msra.mxu1 %vm1258_vm4, %v13070_v43  ;;  %10176 = vmatprep.mubr.msk.f32.mxu1 %vm1258_vm4, %v6542_v14 }
 0xa3a   : > { %10174 = vmatprep.subr.msk.mxu1 %vm1258_vm4, %v6546_v55 }
 0xa3b   : > { %10154 = vmatpush3.xpose.msk.msra.mxu0 %vm1258_vm4, %v12897_v9 }
 0xa3c   : > { %10165 = vmatprep.subr.msk.mxu0 %vm1258_vm4, %v13032_v6  ;;  %v6726_v61 = vpop.permute.xlu1 %6725  ;;  %v7096_v29 = vpop.permute.xlu0 %7095 }
 0xa3d   : > { %10175 = vmatpush3.xpose.msk.msra.mxu1 %vm1258_vm4, %v6546_v55 }
 0xa3e   : > { %10186 = vmatprep.subr.msk.mxu1 %vm1258_vm4, %v6730_v59  ;;  %10156 = vmatmul.mubr.msk.f32.vlgmr.msra.gmra.mxu0 %vm1258_vm4, %v13028_v40 }
 0xa3f   : > { %10166 = vmatpush3.xpose.msk.msra.mxu0 %vm1258_vm4, %v13032_v6  ;;  %10169 = vmatprep.mubr.msk.f32.mxu0 %vm1258_vm4, %v6451_v52 }
 0xa40   : > { %10177 = vmatmul.mubr.msk.f32.vlgmr.msra.gmra.mxu1 %vm1258_vm4, %v6544_v0  ;;  %10167 = vmatprep.subr.msk.mxu0 %vm1258_vm4, %v13075_v30  ;;  %v7007_v9 = vpop.permute.xlu1 %7006  ;;  %v13181_v22 = vpop.permute.xlu0 %7269 }
 0xa41   : > { %10187 = vmatpush3.xpose.msk.msra.mxu1 %vm1258_vm4, %v6730_v59  ;;  %10190 = vmatprep.mubr.msk.f32.mxu1 %vm1258_vm4, %v6724_v25 }
 0xa42   : > { %10188 = vmatprep.subr.msk.mxu1 %vm1258_vm4, %v6728_v27 }
 0xa43   : > { %10168 = vmatpush3.xpose.msk.msra.mxu0 %vm1258_vm4, %v13075_v30 }
 0xa44   : > { %10179 = vmatprep.subr.msk.mxu0 %vm1258_vm4, %v13089_v2  ;;  %v7094_v24 = vpop.permute.xlu1 %7093 }
 0xa45   : > { %10189 = vmatpush3.xpose.msk.msra.mxu1 %vm1258_vm4, %v6728_v27 }
 0xa46   : > { %10200 = vmatprep.subr.mxu1 %v7096_v29  ;;  %10170 = vmatmul.mubr.msk.f32.vlgmr.msra.gmra.mxu0 %vm1258_vm4, %v13077_v5 }
 0xa47   : > { %10180 = vmatpush3.xpose.msk.msra.mxu0 %vm1258_vm4, %v13089_v2  ;;  %10183 = vmatprep.mubr.msk.f32.mxu0 %vm1258_vm4, %v6633_v36 }
 0xa48   : > { %10191 = vmatmul.mubr.msk.f32.vlgmr.msra.gmra.mxu1 %vm1258_vm4, %v6726_v61  ;;  %10181 = vmatprep.subr.msk.mxu0 %vm1258_vm4, %v6637_v16  ;;  %v13186_v33 = vpop.permute.xlu1 %7182 }
 0xa49   : > { %10201 = vmatpush3.msra.mxu1 %v7096_v29 }
 0xa4a   : > { %10202 = vmatprep.subr.mxu1 %v7094_v24 }
 0xa4b   : > { %10203 = vmatpush3.msra.mxu1 %v7094_v24  ;;  %10182 = vmatpush3.xpose.msk.msra.mxu0 %vm1258_vm4, %v6637_v16 }
 0xa4c   : > { %10214 = vmatprep.subr.mxu1 %v13181_v22  ;;  %10193 = vmatprep.subr.mxu0 %v7009_v18  ;;  %v13329_v8 = vpop.permute.xlu1 %7180 }
 0xa4e   : > { %10184 = vmatmul.mubr.msk.f32.vlgmr.msra.gmra.mxu0 %vm1258_vm4, %v6635_v50 }
 0xa4f   : > { %10194 = vmatpush3.msra.mxu0 %v7009_v18 }
 0xa50   : > { %10195 = vmatprep.subr.mxu0 %v7007_v9 }
 0xa51   : > { %10196 = vmatpush3.msra.mxu0 %v7007_v9 }
 0xa52   : > { %10207 = vmatprep.subr.mxu0 %v13186_v33 }
 0xaca   : > { %v13189_v12 = vpop.f32.mrf.mxu1 }
 0xacc   : > { %v13191_v40 = vpop.f32.mrf.mxu1 }
 0xace   : > { %v13195_v6 = vpop.f32.mrf.mxu0 }
 0xad0   : > { %v13199_v31 = vpop.f32.mrf.mxu0 }
 0xad6   : > { %v13193_v23 = vpop.f32.mrf.mxu1 }
 0xad8   : > { %v13197_v34 = vpop.f32.mrf.mxu1 }
 0xada   : > { %v13203_v21 = vpop.f32.mrf.mxu0 }
 0xadc   : > { %v13207_v3 = vpop.f32.mrf.mxu0 }
 0xae2   : > { %v13209_v44 = vpop.f32.mrf.mxu0 }
 0xae3   : > { %v13201_v13 = vpop.f32.mrf.mxu1 }
 0xae4   : > { %v13213_v19 = vpop.f32.mrf.mxu0 }
 0xae5   : > { %v13205_v45 = vpop.f32.mrf.mxu1 }
 0xae8   : > { %v13211_v26 = vpop.f32.mrf.mxu1 }
 0xaea   : > { %v13215_v37 = vpop.f32.mrf.mxu1 }
 0xaee   : > { %v13217_v41 = vpop.f32.mrf.mxu0 }
 0xaf0   : > { %v10150_v49 = vpop.f32.mrf.mxu1  ;;  %v13229_v43 = vpop.f32.mrf.mxu0 }
 0xaf1   : > { %v13221_v28 = vsel %vm1251_vm5, %v10150_v49, -1e+30 }
 0xaf2   : > { %v6839_v35 = vsel %vm1981_vm6, %v13221_v28, -inf  ;;  %v6259_v10 = vpop.f32.mrf.mxu1 }
 0xaf3   : > { %v13227_v48 = vsel %vm1251_vm5, %v6259_v10, -1e+30  ;;  %6840 = vmax.xlane.f32.xlu0 %v6839_v35 }
 0xaf4   : > { %v6836_v15 = vsel %vm1981_vm6, %v13227_v48, -inf }
 0xaf6   : > { %v10143_v39 = vpop.f32.mrf.mxu0 }
 0xaf7   : > { %6837 = vmax.xlane.f32.xlu0 %v6836_v15  ;;  %v13235_v11 = vsel %vm1251_vm5, %v10143_v39, -1e+30 }
 0xaf8   : > { %v6833_v47 = vsel %vm1981_vm6, %v13235_v11, -inf  ;;  %v10164_v30 = vpop.f32.mrf.mxu1  ;;  %v6168_v5 = vpop.f32.mrf.mxu0 }
 0xaf9   : > { %v13241_v51 = vsel %vm1251_vm5, %v10164_v30, -1e+30  ;;  %v13245_v7 = vsel %vm1251_vm5, %v6168_v5, -1e+30  ;;  %6834 = vmax.xlane.f32.xlu1 %v6833_v47 }
 0xafa   : > { %v6830_v54 = vsel %vm1981_vm6, %v13245_v7, -inf  ;;  %v6441_v46 = vpop.f32.mrf.mxu1  ;;  %v6851_v52 = vsel %vm1981_vm6, %v13241_v51, -inf }
 0xafb   : > { %v13251_v20 = vsel %vm1251_vm5, %v6441_v46, -1e+30  ;;  %6831 = vmax.xlane.f32.xlu0 %v6830_v54 }
 0xafc   : > { %v6848_v2 = vsel %vm1981_vm6, %v13251_v20, -inf }
 0xafd   : > { %6852 = vmax.xlane.f32.xlu1 %v6851_v52 }
 0xafe   : > { %v10157_v42 = vpop.f32.mrf.mxu0 }
 0xaff   : > { %v13259_v17 = vsel %vm1251_vm5, %v10157_v42, -1e+30  ;;  %6849 = vmax.xlane.f32.xlu0 %v6848_v2  ;;  %v13332_v2 = vpop.permute.xlu1 %7267 }
 0xb00   : > { %v6845_v55 = vsel %vm1981_vm6, %v13259_v17, -inf  ;;  %v10178_v0 = vpop.f32.mrf.mxu1  ;;  %v6350_v38 = vpop.f32.mrf.mxu0 }
 0xb01   : > { %v13265_v58 = vsel %vm1251_vm5, %v10178_v0, -1e+30  ;;  %v13269_v57 = vsel %vm1251_vm5, %v6350_v38, -1e+30  ;;  %6846 = vmax.xlane.f32.xlu1 %v6845_v55 }
 0xb02   : > { %v6842_v14 = vsel %vm1981_vm6, %v13269_v57, -inf  ;;  %v6623_v32 = vpop.f32.mrf.mxu1  ;;  %v6863_v16 = vsel %vm1981_vm6, %v13265_v58, -inf }
 0xb03   : > { %v13275_v59 = vsel %vm1251_vm5, %v6623_v32, -1e+30  ;;  %6843 = vmax.xlane.f32.xlu0 %v6842_v14 }
 0xb04   : > { %v6860_v50 = vsel %vm1981_vm6, %v13275_v59, -inf }
 0xb05   : > { %6864 = vmax.xlane.f32.xlu1 %v6863_v16 }
 0xb06   : > { %v10171_v36 = vpop.f32.mrf.mxu0 }
 0xb07   : > { %v13283_v27 = vsel %vm1251_vm5, %v10171_v36, -1e+30  ;;  %6861 = vmax.xlane.f32.xlu0 %v6860_v50 }
 0xb08   : > { %v6857_v25 = vsel %vm1981_vm6, %v13283_v27, -inf  ;;  %v10192_v61 = vpop.f32.mrf.mxu1  ;;  %v6532_v18 = vpop.f32.mrf.mxu0 }
 0xb09   : > { %v13289_v9 = vsel %vm1251_vm5, %v10192_v61, -1e+30  ;;  %v13293_v29 = vsel %vm1251_vm5, %v6532_v18, -1e+30  ;;  %6858 = vmax.xlane.f32.xlu1 %v6857_v25 }
 0xb0a   : > { %v6854_v24 = vsel %vm1981_vm6, %v13293_v29, -inf  ;;  %v6805_v49 = vpop.f32.mrf.mxu1  ;;  %v6875_v10 = vsel %vm1981_vm6, %v13289_v9, -inf }
 0xb0b   : > { %v13299_v35 = vsel %vm1251_vm5, %v6805_v49, -1e+30  ;;  %6855 = vmax.xlane.f32.xlu0 %v6854_v24 }
 0xb0c   : > { %v6872_v15 = vsel %vm1981_vm6, %v13299_v35, -inf }
 0xb0d   : > { %6876 = vmax.xlane.f32.xlu1 %v6875_v10 }
 0xb0e   : > { %v10185_v39 = vpop.f32.mrf.mxu0 }
 0xb0f   : > { %v13307_v47 = vsel %vm1251_vm5, %v10185_v39, -1e+30  ;;  %6873 = vmax.xlane.f32.xlu0 %v6872_v15 }
 0xb10   : > { %v6869_v30 = vsel %vm1981_vm6, %v13307_v47, -inf  ;;  %v6714_v5 = vpop.f32.mrf.mxu0 }
 0xb11   : > { %v13313_v54 = vsel %vm1251_vm5, %v6714_v5, -1e+30  ;;  %6870 = vmax.xlane.f32.xlu1 %v6869_v30 }
 0xb12   : > { %v6866_v46 = vsel %vm1981_vm6, %v13313_v54, -inf }
 0xb13   : > { %6867 = vmax.xlane.f32.xlu0 %v6866_v46 }
 0xb22   : > { %7354 = vrot.lane.b32.xlu1 %v11636_v60, %s11030_s6 }
 0xb26   : > { %7441 = vrot.lane.b32.xlu1 %v11644_v63, %s11030_s6 }
 0xb29   : > { %7356 = vrot.lane.b32.xlu0 %v11624_v56, %s11030_s6 }
 0xb2a   : > { %7528 = vrot.lane.b32.xlu1 %v11652_v4, %s11030_s6 }
 0xb2d   : > { %7443 = vrot.lane.b32.xlu0 %v11632_v53, %s11030_s6 }
 0xb31   : > { %7530 = vrot.lane.b32.xlu0 %v11640_v62, %s11030_s6 }
 0xb7c   : > { %v6841_v52 = vpop.xlane.xlu0 %6840 }
 0xb7d   : > { %v6881_v60 = vsub.f32 %v13221_v28, %v6841_v52 }
 0xb7f   : > { %v6900_v63 = vmul.f32 1.442695, %v6881_v60 }
 0xb80   : > { %v6838_v42 = vpop.xlane.xlu0 %6837 }
 0xb81   : > { %10688 = vpow2.f32 %v6900_v63  ;;  %v6880_v56 = vsub.f32 %v13227_v48, %v6838_v42 }
 0xb82   : > { %v6835_v55 = vpop.xlane.xlu1 %6834 }
 0xb83   : > { %v6898_v4 = vmul.f32 1.442695, %v6880_v56  ;;  %v6879_v0 = vsub.f32 %v13235_v11, %v6835_v55 }
 0xb84   : > { %v6832_v53 = vpop.xlane.xlu0 %6831 }
 0xb85   : > { %10690 = vpow2.f32 %v6898_v4  ;;  %v6896_v38 = vmul.f32 1.442695, %v6879_v0  ;;  %v6878_v62 = vsub.f32 %v13245_v7, %v6832_v53 }
 0xb86   : > { %v6853_v14 = vpop.xlane.xlu1 %6852 }
 0xb87   : > { %10692 = vpow2.f32 %v6896_v38  ;;  %v6894_v32 = vmul.f32 1.442695, %v6878_v62  ;;  %v6885_v28 = vsub.f32 %v13241_v51, %v6853_v14 }
 0xb88   : > { %v6850_v16 = vpop.xlane.xlu0 %6849 }
 0xb89   : > { %10694 = vpow2.f32 %v6894_v32  ;;  %v6908_v50 = vmul.f32 1.442695, %v6885_v28  ;;  %v6884_v36 = vsub.f32 %v13251_v20, %v6850_v16 }
 0xb8a   : > { %v6847_v48 = vpop.xlane.xlu1 %6846 }
 0xb8b   : > { %10696 = vpow2.f32 %v6908_v50  ;;  %v6906_v25 = vmul.f32 1.442695, %v6884_v36  ;;  %v6883_v11 = vsub.f32 %v13259_v17, %v6847_v48 }
 0xb8c   : > { %v6844_v61 = vpop.xlane.xlu0 %6843 }
 0xb8d   : > { %10698 = vpow2.f32 %v6906_v25  ;;  %v6904_v18 = vmul.f32 1.442695, %v6883_v11  ;;  %v6882_v7 = vsub.f32 %v13269_v57, %v6844_v61 }
 0xb8e   : > { %v13341_v24 = vpop.eup %10688  ;;  %v6865_v49 = vpop.xlane.xlu1 %6864 }
 0xb8f   : > { %10700 = vpow2.f32 %v6904_v18  ;;  %v6902_v51 = vmul.f32 1.442695, %v6882_v7  ;;  %v6889_v10 = vsub.f32 %v13265_v58, %v6865_v49  ;;  %v6935_v20 = vsel %vm1981_vm6, %v13341_v24, 0.0 }
 0xb90   : > { %6936 = vadd.xlane.f32.xlu1 %v6935_v20  ;;  %v6862_v15 = vpop.xlane.xlu0 %6861 }
 0xb91   : > { %10702 = vpow2.f32 %v6902_v51  ;;  %v6916_v39 = vmul.f32 1.442695, %v6889_v10  ;;  %v6888_v17 = vsub.f32 %v13275_v59, %v6862_v15 }
 0xb92   : > { %v13347_v30 = vpop.eup %10690  ;;  %v6859_v5 = vpop.xlane.xlu1 %6858 }
 0xb93   : > { %10704 = vpow2.f32 %v6916_v39  ;;  %v6914_v57 = vmul.f32 1.442695, %v6888_v17  ;;  %v6887_v46 = vsub.f32 %v13283_v27, %v6859_v5  ;;  %v6932_v52 = vsel %vm1981_vm6, %v13347_v30, 0.0 }
 0xb94   : > { %v13352_v58 = vpop.eup %10692  ;;  %6933 = vadd.xlane.f32.xlu0 %v6932_v52  ;;  %v6856_v60 = vpop.xlane.xlu0 %6855 }
 0xb95   : > { %10706 = vpow2.f32 %v6914_v57  ;;  %v6912_v63 = vmul.f32 1.442695, %v6887_v46  ;;  %v6886_v42 = vsub.f32 %v13293_v29, %v6856_v60  ;;  %v6929_v59 = vsel %vm1981_vm6, %v13352_v58, 0.0 }
 0xb96   : > { %v13357_v56 = vpop.eup %10694  ;;  %v6877_v55 = vpop.xlane.xlu1 %6876  ;;  %6930 = vadd.xlane.f32.xlu1 %v6929_v59  ;;  %v14323_v59 = vld [vmem:[#allocation54_spill] sm:$0xff] }
 0xb97   : > { %10708 = vpow2.f32 %v6912_v63  ;;  %v6910_v27 = vmul.f32 1.442695, %v6886_v42  ;;  %v6893_v4 = vsub.f32 %v13289_v9, %v6877_v55  ;;  %v6926_v0 = vsel %vm1981_vm6, %v13357_v56, 0.0  ;;  %v14324_v55 = vld [vmem:[#allocation32_spill] sm:$0xff] }
 0xb98   : > { %v13362_v53 = vpop.eup %10696  ;;  %6927 = vadd.xlane.f32.xlu0 %v6926_v0  ;;  %v6874_v38 = vpop.xlane.xlu0 %6873  ;;  %v14328_v0 = vld [vmem:[#allocation58_spill] sm:$0xff] }
 0xb99   : > { %10710 = vpow2.f32 %v6910_v27  ;;  %v6924_v29 = vmul.f32 1.442695, %v6893_v4  ;;  %v6892_v62 = vsub.f32 %v13299_v35, %v6874_v38  ;;  %v6947_v14 = vsel %vm1981_vm6, %v13362_v53, 0.0  ;;  %v14325_v27 = vld [vmem:[#allocation56_spill] sm:$0xff]  ;;  %v14326_v4 = vld [vmem:[#allocation51_spill] sm:$0xff] }
 0xb9a   : > { %v13367_v32 = vpop.eup %10698  ;;  %v6871_v28 = vpop.xlane.xlu1 %6870  ;;  %6948 = vadd.xlane.f32.xlu1 %v6947_v14 }
 0xb9b   : > { %10712 = vpow2.f32 %v6924_v29  ;;  %v6922_v9 = vmul.f32 1.442695, %v6892_v62  ;;  %v6891_v16 = vsub.f32 %v13307_v47, %v6871_v28  ;;  %v6944_v50 = vsel %vm1981_vm6, %v13367_v32, 0.0 }
 0xb9c   : > { %v13372_v36 = vpop.eup %10700  ;;  %6945 = vadd.xlane.f32.xlu0 %v6944_v50  ;;  %v6868_v48 = vpop.xlane.xlu0 %6867 }
 0xb9d   : > { %10714 = vpow2.f32 %v6922_v9  ;;  %v6920_v35 = vmul.f32 1.442695, %v6891_v16  ;;  %v6890_v25 = vsub.f32 %v13313_v54, %v6868_v48  ;;  %v6941_v11 = vsel %vm1981_vm6, %v13372_v36, 0.0 }
 0xb9e   : > { %v13377_v61 = vpop.eup %10702  ;;  %6942 = vadd.xlane.f32.xlu1 %v6941_v11  ;;  %v13477_v38 = vpop.permute.xlu1 %7354 }
 0xb9f   : > { %10716 = vpow2.f32 %v6920_v35  ;;  %v6918_v18 = vmul.f32 1.442695, %v6890_v25  ;;  %v6938_v47 = vsel %vm1981_vm6, %v13377_v61, 0.0 }
 0xba0   : > { %v13381_v7 = vpop.eup %10704  ;;  %6939 = vadd.xlane.f32.xlu0 %v6938_v47  ;;  %v13479_v29 = vpop.permute.xlu0 %7356 }
 0xba1   : > { %10718 = vpow2.f32 %v6918_v18  ;;  %v6959_v49 = vsel %vm1981_vm6, %v13381_v7, 0.0 }
 0xba2   : > { %v13385_v51 = vpop.eup %10706  ;;  %6960 = vadd.xlane.f32.xlu1 %v6959_v49 }
 0xba3   : > { %v6956_v54 = vsel %vm1981_vm6, %v13385_v51, 0.0 }
 0xba4   : > { %v13389_v10 = vpop.eup %10708  ;;  %6957 = vadd.xlane.f32.xlu0 %v6956_v54  ;;  %v7444_v62 = vpop.permute.xlu0 %7443 }
 0xba5   : > { %v6953_v20 = vsel %vm1981_vm6, %v13389_v10, 0.0 }
 0xba6   : > { %v13393_v15 = vpop.eup %10710  ;;  %6954 = vadd.xlane.f32.xlu1 %v6953_v20 }
 0xba7   : > { %v6950_v39 = vsel %vm1981_vm6, %v13393_v15, 0.0 }
 0xba8   : > { %v13397_v17 = vpop.eup %10712  ;;  %6951 = vadd.xlane.f32.xlu0 %v6950_v39  ;;  %v13485_v14 = vpop.permute.xlu0 %7530 }
 0xba9   : > { %v6971_v57 = vsel %vm1981_vm6, %v13397_v17, 0.0 }
 0xbaa   : > { %v13399_v5 = vpop.eup %10714 }
 0xbab   : > { %v6968_v46 = vsel %vm1981_vm6, %v13399_v5, 0.0 }
 0xbac   : > { %v13405_v52 = vpop.eup %10716  ;;  %6972 = vadd.xlane.f32.xlu0 %v6971_v57  ;;  %6969 = vadd.xlane.f32.xlu1 %v6968_v46 }
 0xbad   : > { %v6965_v63 = vsel %vm1981_vm6, %v13405_v52, 0.0 }
 0xbae   : > { %v13407_v60 = vpop.eup %10718 }
 0xbaf   : > { %v6962_v42 = vsel %vm1981_vm6, %v13407_v60, 0.0 }
 0xbb0   : > { %6966 = vadd.xlane.f32.xlu1 %v6965_v63  ;;  %6963 = vadd.xlane.f32.xlu0 %v6962_v42 }
 0xbc1   : > { %7615 = vrot.lane.b32.xlu1 %v14318_v1, %s11030_s6  ;;  %v14327_v1 = vld [vmem:[#allocation52_spill] sm:$0xff] }
 0xbc5   : > { %7720 = vrot.lane.b32.xlu1 %v14323_v59, %s11031_s8 }
 0xbc6   : > { %7617 = vrot.lane.b32.xlu0 %v14324_v55, %s11030_s6  ;;  %s14365_s6 = sld [smem:[#allocation71_spill]] }
 0xbc9   : > { %7784 = vrot.lane.b32.xlu1 %v13195_v6, %s11032_s27  ;;  %v14329_v6 = vld [vmem:[#allocation60_spill] sm:$0xff] }
 0xbca   : > { %7718 = vrot.lane.b32.xlu0 %v14325_v27, %s11031_s8 }
 0xbcd   : > { %7724 = vrot.lane.b32.xlu1 %v14326_v4, %s11031_s8 }
 0xbce   : > { %7782 = vrot.lane.b32.xlu0 %v13199_v31, %s11032_s27  ;;  %v14330_v31 = vld [vmem:[#allocation53_spill] sm:$0xff] }
 0xbd1   : > { %7788 = vrot.lane.b32.xlu1 %v13189_v12, %s11032_s27  ;;  %v14331_v12 = vld [vmem:[#allocation55_spill] sm:$0xff] }
 0xbd2   : > { %7722 = vrot.lane.b32.xlu0 %v14327_v1, %s11031_s8 }
 0xbd5   : > { %7728 = vrot.lane.b32.xlu1 %v14328_v0, %s11031_s8 }
 0xbd6   : > { %7786 = vrot.lane.b32.xlu0 %v13191_v40, %s11032_s27  ;;  %v14332_v40 = vld [vmem:[#allocation61_spill] sm:$0xff] }
 0xbd9   : > { %7792 = vrot.lane.b32.xlu1 %v13203_v21, %s11032_s27  ;;  %v14333_v21 = vld [vmem:[#allocation63_spill] sm:$0xff] }
 0xbda   : > { %7726 = vrot.lane.b32.xlu0 %v14329_v6, %s11031_s8 }
 0xbdd   : > { %7732 = vrot.lane.b32.xlu1 %v14330_v31, %s11031_s8 }
 0xbde   : > { %7790 = vrot.lane.b32.xlu0 %v13207_v3, %s11032_s27  ;;  %v14334_v3 = vld [vmem:[#allocation57_spill] sm:$0xff] }
 0xbe1   : > { %7796 = vrot.lane.b32.xlu1 %v13193_v23, %s11032_s27  ;;  %v14335_v23 = vld [vmem:[#allocation59_spill] sm:$0xff] }
 0xbe2   : > { %7730 = vrot.lane.b32.xlu0 %v14331_v12, %s11031_s8 }
 0xbe5   : > { %7736 = vrot.lane.b32.xlu1 %v14332_v40, %s11031_s8 }
 0xbe6   : > { %7794 = vrot.lane.b32.xlu0 %v13197_v34, %s11032_s27  ;;  %v14336_v34 = vld [vmem:[#allocation65_spill] sm:$0xff] }
 0xbe9   : > { %7800 = vrot.lane.b32.xlu1 %v13209_v44, %s11032_s27  ;;  %v14337_v44 = vld [vmem:[#allocation34_spill] sm:$0xff] }
 0xbea   : > { %7734 = vrot.lane.b32.xlu0 %v14333_v21, %s11031_s8 }
 0xbed   : > { %7740 = vrot.lane.b32.xlu1 %v14334_v3, %s11031_s8 }
 0xbee   : > { %7798 = vrot.lane.b32.xlu0 %v13213_v19, %s11032_s27  ;;  %v14338_v19 = vld [vmem:[#allocation62_spill] sm:$0xff] }
 0xbf1   : > { %7804 = vrot.lane.b32.xlu1 %v13201_v13, %s11032_s27  ;;  %v14339_v13 = vld [vmem:[#allocation64_spill] sm:$0xff] }
 0xbf2   : > { %7738 = vrot.lane.b32.xlu0 %v14335_v23, %s11031_s8 }
 0xbf5   : > { %7744 = vrot.lane.b32.xlu1 %v14336_v34, %s11031_s8 }
 0xbf6   : > { %7802 = vrot.lane.b32.xlu0 %v13205_v45, %s11032_s27  ;;  %v13481_v45 = vpop.permute.xlu1 %7441 }
 0xbf9   : > { %7808 = vrot.lane.b32.xlu1 %v13217_v41, %s11032_s27 }
 0xbfa   : > { %7742 = vrot.lane.b32.xlu0 %v14337_v44, %s11031_s8  ;;  %v13483_v41 = vpop.permute.xlu1 %7528 }
 0xbfd   : > { %7748 = vrot.lane.b32.xlu1 %v14338_v19, %s11031_s8  ;;  %v7945_v19 = vld [vmem:[#allocation7 + $0x10] sm:$0xff] }
 0xbfe   : > { %7806 = vrot.lane.b32.xlu0 %v13229_v43, %s11032_s27 }
 0xc02   : > { %7746 = vrot.lane.b32.xlu0 %v14339_v13, %s11031_s8  ;;  %v7943_v13 = vld [vmem:[#allocation7] sm:$0xff]  ;;  %s14136_s8 = scalar_lea.hbm %s14365_s6, %s9389_s15 }
 0xc19   : > { %v6937_v28 = vpop.xlane.xlu1 %6936 }
 0xc1a   : > { %10720 = vrcp.f32 %v6937_v28 }
 0xc1d   : > { %v6934_v9 = vpop.xlane.xlu0 %6933 }
 0xc1e   : > { %10722 = vrcp.f32 %v6934_v9 }
 0xc1f   : > { %v6931_v16 = vpop.xlane.xlu1 %6930 }
 0xc20   : > { %10724 = vrcp.f32 %v6931_v16 }
 0xc21   : > { %v6928_v43 = vpop.xlane.xlu0 %6927 }
 0xc22   : > { %10726 = vrcp.f32 %v6928_v43 }
 0xc23   : > { %v6949_v50 = vpop.xlane.xlu1 %6948 }
 0xc24   : > { %10728 = vrcp.f32 %v6949_v50 }
 0xc25   : > { %v6946_v48 = vpop.xlane.xlu0 %6945 }
 0xc26   : > { %10730 = vrcp.f32 %v6946_v48 }
 0xc27   : > { %v6943_v35 = vpop.xlane.xlu1 %6942  ;;  %v10721_v11 = vpop.eup %10720 }
 0xc28   : > { %10732 = vrcp.f32 %v6943_v35  ;;  %v6993_v54 = vmul.f32 %v10721_v11, %v13341_v24 }
 0xc29   : > { %v6940_v25 = vpop.xlane.xlu0 %6939 }
 0xc2a   : > { %10734 = vrcp.f32 %v6940_v25 }
 0xc2b   : > { %v10723_v18 = vpop.eup %10722  ;;  %v6961_v47 = vpop.xlane.xlu1 %6960 }
 0xc2c   : > { %v6992_v49 = vmul.f32 %v10723_v18, %v13347_v30  ;;  %10736 = vrcp.f32 %v6961_v47 }
 0xc2d   : > { %v6958_v20 = vpop.xlane.xlu0 %6957  ;;  %v10725_v39 = vpop.eup %10724 }
 0xc2e   : > { %10204 = vmatprep.mubr.msk.f32.mxu1 %vm1981_vm6, %v6992_v49  ;;  %10738 = vrcp.f32 %v6958_v20  ;;  %v6991_v42 = vmul.f32 %v10725_v39, %v13352_v58 }
 0xc2f   : > { %v10727_v57 = vpop.eup %10726  ;;  %10205 = vmatmul.mubr.msk.f32.vlgmr.msra.gmra.mxu1 %vm1981_vm6, %v6993_v54  ;;  %v6955_v46 = vpop.xlane.xlu1 %6954 }
 0xc30   : > { %10215 = vmatpush3.msra.mxu1 %v13181_v22  ;;  %v6990_v63 = vmul.f32 %v10727_v57, %v13357_v56  ;;  %10740 = vrcp.f32 %v6955_v46 }
 0xc31   : > { %10216 = vmatprep.subr.mxu1 %v13332_v2  ;;  %v6952_v30 = vpop.xlane.xlu0 %6951  ;;  %v10729_v24 = vpop.eup %10728 }
 0xc32   : > { %10217 = vmatpush3.msra.mxu1 %v13332_v2  ;;  %10742 = vrcp.f32 %v6952_v30  ;;  %10197 = vmatprep.mubr.msk.f32.mxu0 %vm1981_vm6, %v6990_v63  ;;  %v6997_v58 = vmul.f32 %v10729_v24, %v13362_v53 }
 0xc33   : > { %v10731_v59 = vpop.eup %10730  ;;  %10228 = vmatprep.subr.mxu1 %v7444_v62  ;;  %10198 = vmatmul.mubr.msk.f32.vlgmr.msra.gmra.mxu0 %vm1981_vm6, %v6991_v42 }
 0xc34   : > { %10208 = vmatpush3.msra.mxu0 %v13186_v33  ;;  %v6996_v22 = vmul.f32 %v10731_v59, %v13367_v32 }
 0xc35   : > { %10209 = vmatprep.subr.mxu0 %v13329_v8  ;;  %v6970_v56 = vpop.xlane.xlu1 %6969  ;;  %v6973_v55 = vpop.xlane.xlu0 %6972 }
 0xc36   : > { %v10733_v27 = vpop.eup %10732  ;;  %10744 = vrcp.f32 %v6970_v56  ;;  %10210 = vmatpush3.msra.mxu0 %v13329_v8  ;;  %10218 = vmatprep.mubr.msk.f32.mxu1 %vm1981_vm6, %v6996_v22 }
 0xc37   : > { %v10735_v2 = vpop.eup %10734  ;;  %10746 = vrcp.f32 %v6973_v55  ;;  %10221 = vmatprep.subr.mxu0 %v13479_v29  ;;  %10219 = vmatmul.mubr.msk.f32.vlgmr.msra.gmra.mxu1 %vm1981_vm6, %v6997_v58  ;;  %v6995_v53 = vmul.f32 %v10733_v27, %v13372_v36 }
 0xc38   : > { %10229 = vmatpush3.msra.mxu1 %v7444_v62  ;;  %v6994_v33 = vmul.f32 %v10735_v2, %v13377_v61 }
 0xc39   : > { %10230 = vmatprep.subr.mxu1 %v13481_v45  ;;  %v6967_v32 = vpop.xlane.xlu1 %6966  ;;  %v6964_v4 = vpop.xlane.xlu0 %6963 }
 0xc3a   : > { %v10737_v1 = vpop.eup %10736  ;;  %10748 = vrcp.f32 %v6967_v32  ;;  %10231 = vmatpush3.msra.mxu1 %v13481_v45  ;;  %10211 = vmatprep.mubr.msk.f32.mxu0 %vm1981_vm6, %v6994_v33 }
 0xc3b   : > { %v10739_v8 = vpop.eup %10738  ;;  %10750 = vrcp.f32 %v6964_v4  ;;  %10212 = vmatmul.mubr.msk.f32.vlgmr.msra.gmra.mxu0 %vm1981_vm6, %v6995_v53  ;;  %v7001_v36 = vmul.f32 %v10737_v1, %v13381_v7 }
 0xc3c   : > { %10222 = vmatpush3.msra.mxu0 %v13479_v29  ;;  %v7000_v61 = vmul.f32 %v10739_v8, %v13385_v51 }
 0xc3d   : > { %10223 = vmatprep.subr.mxu0 %v13477_v38  ;;  %v7618_v0 = vpop.permute.xlu0 %7617  ;;  %v10741_v6 = vpop.eup %10740 }
 0xc3e   : > { %10224 = vmatpush3.msra.mxu0 %v13477_v38  ;;  %10232 = vmatprep.mubr.msk.f32.mxu1 %vm1981_vm6, %v7000_v61  ;;  %v7616_v40 = vpop.permute.xlu1 %7615  ;;  %v6999_v51 = vmul.f32 %v10741_v6, %v13389_v10 }
 0xc3f   : > { %v10743_v31 = vpop.eup %10742  ;;  %10235 = vmatprep.subr.mxu0 %v13485_v14  ;;  %10242 = vmatprep.subr.mxu1 %v7618_v0 }
 0xc40   : > { %10233 = vmatmul.mubr.msk.f32.vlgmr.msra.gmra.mxu1 %vm1981_vm6, %v7001_v36  ;;  %v6998_v12 = vmul.f32 %v10743_v31, %v13393_v15 }
 0xc41   : > { %10243 = vmatpush3.msra.mxu1 %v7618_v0  ;;  %v7719_v48 = vpop.permute.xlu0 %7718 }
 0xc42   : > { %10244 = vmatprep.subr.mxu1 %v7616_v40  ;;  %10225 = vmatprep.mubr.msk.f32.mxu0 %vm1981_vm6, %v6998_v12  ;;  %v7721_v50 = vpop.permute.xlu1 %7720  ;;  %v14340_v12 = vld [vmem:[#allocation40_spill] sm:$0xff] }
 0xc43   : > { %v10745_v21 = vpop.eup %10744  ;;  %10245 = vmatpush3.msra.mxu1 %v7616_v40  ;;  %10226 = vmatmul.mubr.msk.f32.vlgmr.msra.gmra.mxu0 %vm1981_vm6, %v6999_v51  ;;  %v7894_v40 = vsel %vm1258_vm4, %v14340_v12, %v7719_v48  ;;  %v14341_v51 = vld [vmem:[#allocation38_spill] sm:$0xff] }
 0xc44   : > { %v10747_v7 = vpop.eup %10746  ;;  %10236 = vmatpush3.msra.mxu0 %v13485_v14  ;;  %v7004_v3 = vmul.f32 %v10745_v21, %v13399_v5  ;;  %v7946_v5 = vld [vmem:[#allocation7 + $0x18] sm:$0xff]  ;;  %v7895_v21 = vsel %vm1258_vm4, %v14341_v51, %v7721_v50  ;;  %v14346_v50 = vld [vmem:[#allocation39_spill] sm:$0xff] }
 0xc45   : > { %10237 = vmatprep.subr.mxu0 %v13483_v41  ;;  %v7005_v15 = vmul.f32 %v10747_v7, %v13397_v17  ;;  %v7944_v17 = vld [vmem:[#allocation7 + $0x8] sm:$0xff]  ;;  %v7783_v47 = vpop.permute.xlu0 %7782 }
 0xc46   : > { %10238 = vmatpush3.msra.mxu0 %v13483_v41  ;;  %10246 = vmatprep.mubr.msk.f32.mxu1 %vm1981_vm6, %v7004_v3  ;;  %v7785_v18 = vpop.permute.xlu1 %7784  ;;  %v7910_v7 = vsel %vm1981_vm6, %v7894_v40, %v7783_v47 }
 0xc47   : > { %v10749_v10 = vpop.eup %10748  ;;  %10247 = vmatmul.mubr.msk.f32.vlgmr.msra.gmra.mxu1 %vm1981_vm6, %v7005_v15  ;;  %10249 = vmatprep.subr.mxu0 %v7946_v5  ;;  %v7911_v15 = vsel %vm1981_vm6, %v7895_v21, %v7785_v18 }
 0xc48   : > { %v10751_v23 = vpop.eup %10750  ;;  %v7003_v34 = vmul.f32 %v10749_v10, %v13405_v52  ;;  %v14342_v10 = vld [vmem:[#allocation36_spill] sm:$0xff] }
 0xc49   : > { %v7002_v44 = vmul.f32 %v10751_v23, %v13407_v60  ;;  %v7723_v54 = vpop.permute.xlu0 %7722 }
 0xc4a   : > { %v7896_v23 = vsel %vm1258_vm4, %v14342_v10, %v7723_v54 }
 0xc4b   : > { %10239 = vmatprep.mubr.msk.f32.mxu0 %vm1981_vm6, %v7002_v44 }
 0xc4c   : > { %10240 = vmatmul.mubr.msk.f32.vlgmr.msra.gmra.mxu0 %vm1981_vm6, %v7003_v34 }
 0xc4d   : > { %10250 = vmatpush3.msra.mxu0 %v7946_v5  ;;  %v7787_v39 = vpop.permute.xlu0 %7786 }
 0xc4e   : > { %10251 = vmatprep.subr.mxu0 %v7945_v19  ;;  %v7912_v44 = vsel %vm1981_vm6, %v7896_v23, %v7787_v39 }
 0xc4f   : > { %10252 = vmatpush3.msra.mxu0 %v7945_v19 }
 0xc50   : > { %10253 = vmatprep.subr.mxu0 %v7944_v17 }
 0xc51   : > { %10254 = vmatpush3.msra.mxu0 %v7944_v17  ;;  %v7727_v57 = vpop.permute.xlu0 %7726 }
 0xc52   : > { %10255 = vmatprep.subr.mxu0 %v7943_v13 }
 0xc53   : > { %10256 = vmatpush3.msra.mxu0 %v7943_v13  ;;  %v14343_v13 = vld [vmem:[#allocation35_spill] sm:$0xff] }
 0xc55   : > { %v7791_v63 = vpop.permute.xlu0 %7790 }
 0xc59   : > { %v7731_v42 = vpop.permute.xlu0 %7730 }
 0xc5a   : > { %v7900_v48 = vsel %vm1258_vm4, %v14346_v50, %v7731_v42 }
 0xc5d   : > { %v7795_v59 = vpop.permute.xlu0 %7794 }
 0xc61   : > { %v7735_v56 = vpop.permute.xlu0 %7734 }
 0xc65   : > { %v7799_v58 = vpop.permute.xlu0 %7798 }
 0xc69   : > { %v7739_v2 = vpop.permute.xlu0 %7738 }
 0xc6d   : > { %v7803_v32 = vpop.permute.xlu0 %7802 }
 0xc71   : > { %v13561_v53 = vpop.permute.xlu0 %7742 }
 0xc75   : > { %v13565_v8 = vpop.permute.xlu0 %7806 }
 0xc79   : > { %v13569_v0 = vpop.permute.xlu0 %7746 }
 0xcef   : > { %v10206_v38 = vpop.f32.mrf.mxu1 }
 0xcf0   : > { %7852 = vrot.lane.b32.xlu1 %v10206_v38, %s11033_s29 }
 0xcf1   : > { %v7171_v52 = vpop.f32.mrf.mxu1 }
 0xcf2   : > { %7850 = vrot.lane.b32.xlu0 %v7171_v52, %s11033_s29 }
 0xcf3   : > { %v10199_v60 = vpop.f32.mrf.mxu0 }
 0xcf4   : > { %7848 = vrot.lane.b32.xlu1 %v10199_v60, %s11033_s29 }
 0xcf5   : > { %v7084_v29 = vpop.f32.mrf.mxu0 }
 0xcf6   : > { %7846 = vrot.lane.b32.xlu0 %v7084_v29, %s11033_s29 }
 0xcf7   : > { %v10220_v45 = vpop.f32.mrf.mxu1 }
 0xcf8   : > { %7860 = vrot.lane.b32.xlu1 %v10220_v45, %s11033_s29 }
 0xcf9   : > { %v7345_v62 = vpop.f32.mrf.mxu1 }
 0xcfa   : > { %7858 = vrot.lane.b32.xlu0 %v7345_v62, %s11033_s29  ;;  %v14344_v62 = vld [vmem:[#allocation44_spill] sm:$0xff] }
 0xcfb   : > { %v10213_v41 = vpop.f32.mrf.mxu0 }
 0xcfc   : > { %7856 = vrot.lane.b32.xlu1 %v10213_v41, %s11033_s29  ;;  %v7898_v41 = vsel %vm1258_vm4, %v14344_v62, %v7727_v57  ;;  %v14348_v57 = vld [vmem:[#allocation47_spill] sm:$0xff] }
 0xcfd   : > { %v7258_v14 = vpop.f32.mrf.mxu0 }
 0xcfe   : > { %7854 = vrot.lane.b32.xlu0 %v7258_v14, %s11033_s29  ;;  %v14345_v14 = vld [vmem:[#allocation42_spill] sm:$0xff] }
 0xd00   : > { %v10234_v28 = vpop.f32.mrf.mxu1 }
 0xd01   : > { %7868 = vrot.lane.b32.xlu1 %v10234_v28, %s11033_s29 }
 0xd02   : > { %v7519_v9 = vpop.f32.mrf.mxu1 }
 0xd03   : > { %7866 = vrot.lane.b32.xlu0 %v7519_v9, %s11033_s29  ;;  %v10227_v16 = vpop.f32.mrf.mxu0  ;;  %v7914_v9 = vsel %vm1981_vm6, %v7898_v41, %v7791_v63  ;;  %v14349_v63 = vld [vmem:[#allocation45_spill] sm:$0xff]  ;;  %v14356_v41 = vld [vmem:[#allocation20_spill] sm:$0xff] }
 0xd05   : > { %7864 = vrot.lane.b32.xlu1 %v10227_v16, %s11033_s29  ;;  %v7432_v43 = vpop.f32.mrf.mxu0 }
 0xd07   : > { %7862 = vrot.lane.b32.xlu0 %v7432_v43, %s11033_s29  ;;  %v10248_v25 = vpop.f32.mrf.mxu1 }
 0xd09   : > { %7812 = vrot.lane.b32.xlu1 %v13211_v26, %s11032_s27  ;;  %v7693_v49 = vpop.f32.mrf.mxu1  ;;  %v7725_v26 = vpop.permute.xlu1 %7724 }
 0xd0a   : > { %v7897_v38 = vsel %vm1258_vm4, %v14343_v13, %v7725_v26 }
 0xd0b   : > { %7810 = vrot.lane.b32.xlu0 %v13215_v37, %s11032_s27  ;;  %s10938_s27 = scalar_lea.vmem %s9011_s19, 128 }
 0xd0c   : > { %v10241_v35 = vpop.f32.mrf.mxu0  ;;  %p10939_p6 = scmp.ne.s32.totalorder %s9011_s19, %s10938_s27 }
 0xd0d   : > { %7872 = vrot.lane.b32.xlu1 %v10241_v35, %s11033_s29  ;;  %v7789_v20 = vpop.permute.xlu1 %7788 }
 0xd0e   : > { %v7606_v11 = vpop.f32.mrf.mxu0  ;;  %v7913_v60 = vsel %vm1981_vm6, %v7897_v38, %v7789_v20  ;;  %p10940_p0 = pnand %p10939_p6, %p14366_p12 }
 0xd0f   : > { %7870 = vrot.lane.b32.xlu0 %v7606_v11, %s11033_s29 }
 0xd10   : > { %p10941_p5 = pneg %p10940_p0 }
 0xd11   : > { %7876 = vrot.lane.b32.xlu1 %v10248_v25, %s11033_s29  ;;  %v7729_v37 = vpop.permute.xlu1 %7728  ;;  %v7916_v25 = vsel %vm1981_vm6, %v7900_v48, %v7795_v59 }
 0xd12   : > { %v7899_v28 = vsel %vm1258_vm4, %v14345_v14, %v7729_v37 }
 0xd13   : > { %7874 = vrot.lane.b32.xlu0 %v7693_v49, %s11033_s29  ;;  %v14347_v49 = vld [vmem:[#allocation37_spill] sm:$0xff]  ;;  %s10944_s29 = scalar_lea.vmem %s10943_s20, 256 }
 0xd14   : > { %p10946_p7 = scmp.lt.s32.totalorder %s10944_s29, %s10938_s27 }
 0xd15   : > { %v7793_v46 = vpop.permute.xlu1 %7792 }
 0xd16   : > { %v7915_v43 = vsel %vm1981_vm6, %v7899_v28, %v7793_v46  ;;  %v7902_v46 = vsel %vm1258_vm4, %v14348_v57, %v7735_v56  ;;  %p10947_p9 = por %p10946_p7, %p10945_p3 }
 0xd17   : > { %v7918_v59 = vsel %vm1981_vm6, %v7902_v46, %v7799_v58 }
 0xd18   : > { %p10948_p13 = pnand %p10947_p9, %p10941_p5 }
 0xd19   : > { %v7733_v30 = vpop.permute.xlu1 %7732 }
 0xd1a   : > { %v7901_v26 = vsel %vm1258_vm4, %v14347_v49, %v7733_v30  ;;  %v10818_v49 = vld [vmem:[%s11295_s18 + $0x28] sm:$0xff] }
 0xd1d   : > { %v7797_v24 = vpop.permute.xlu1 %7796 }
 0xd1e   : > { %v7917_v54 = vsel %vm1981_vm6, %v7901_v26, %v7797_v24 }
 0xd21   : > { %v7737_v22 = vpop.permute.xlu1 %7736 }
 0xd22   : > { %v7903_v42 = vsel %vm1258_vm4, %v14349_v63, %v7737_v22  ;;  %v14351_v22 = vld [vmem:[#allocation41_spill] sm:$0xff] }
 0xd25   : > { %v7801_v55 = vpop.permute.xlu1 %7800 }
 0xd26   : > { %v7919_v30 = vsel %vm1981_vm6, %v7903_v42, %v7801_v55  ;;  %v10819_v42 = vld [vmem:[%s11295_s18 + $0x38] sm:$0xff] }
 0xd29   : > { %v13555_v27 = vpop.permute.xlu1 %7740 }
 0xd2a   : > { %v7905_v55 = vsel %vm1258_vm4, %v14351_v22, %v13555_v27  ;;  %v10820_v22 = vld [vmem:[%s11295_s18 + $0x48] sm:$0xff] }
 0xd2d   : > { %v13557_v33 = vpop.permute.xlu1 %7804 }
 0xd31   : > { %v13559_v4 = vpop.permute.xlu1 %7744 }
 0xd35   : > { %v13563_v1 = vpop.permute.xlu1 %7808 }
 0xd39   : > { %v13567_v61 = vpop.permute.xlu1 %7748 }
 0xd62   : > { %v7853_v6 = vpop.permute.xlu1 %7852 }
 0xd63   : > { %v7930_v29 = vsel %vm7926_vm7, %v7913_v60, %v7853_v6  ;;  %v13662_v60 = vld [vmem:[%s14183_s9] ss:$0 sm:$0xff] }
 0xd64   : > { %v7851_v36 = vpop.permute.xlu0 %7850 }
 0xd65   : > { %v7929_v17 = vsel %vm7926_vm7, %v7912_v44, %v7851_v36  ;;  %v14350_v36 = vld [vmem:[#allocation43_spill] sm:$0xff] }
 0xd66   : > { %v7849_v31 = vpop.permute.xlu1 %7848  ;;  %v7904_v24 = vsel %vm1258_vm4, %v14350_v36, %v7739_v2  ;;  %v7921_v2 = vsel %vm1981_vm6, %v7905_v55, %v13557_v33 }
 0xd67   : > { %v7928_v5 = vsel %vm7926_vm7, %v7911_v15, %v7849_v31  ;;  %v7920_v12 = vsel %vm1981_vm6, %v7904_v24, %v7803_v32  ;;  %v14353_v15 = vld [vmem:[#allocation49_spill] sm:$0xff] }
 0xd68   : > { %v7847_v3 = vpop.permute.xlu0 %7846  ;;  %v7907_v10 = vsel %vm1258_vm4, %v14353_v15, %v13559_v4  ;;  %v14355_v4 = vld [vmem:[#allocation46_spill] sm:$0xff] }
 0xd69   : > { %v7927_v34 = vsel %vm7926_vm7, %v7910_v7, %v7847_v3  ;;  %v14352_v7 = vld [vmem:[#allocation50_spill] sm:$0xff]  ;;  %v7923_v33 = vsel %vm1981_vm6, %v7907_v10, %v13563_v1  ;;  %v10821_v10 = vld [vmem:[%s11295_s18 + $0x58] sm:$0xff] }
 0xd6a   : > { %v7861_v19 = vpop.permute.xlu1 %7860  ;;  %10257 = vmatprep.mubr.msk.f32.mxu0 %vm791_vm3, %v7927_v34  ;;  %v7906_v3 = vsel %vm1258_vm4, %v14352_v7, %v13561_v53  ;;  %v14354_v53 = vld [vmem:[#allocation48_spill] sm:$0xff] }
 0xd6b   : > { %10258 = vmatmul.mubr.msk.f32.vlgmr.msra.gmra.mxu0 %vm791_vm3, %v7928_v5  ;;  %v7934_v39 = vsel %vm7926_vm7, %v7917_v54, %v7861_v19  ;;  %v7922_v27 = vsel %vm1981_vm6, %v7906_v3, %v13565_v8  ;;  %v7908_v5 = vsel %vm1258_vm4, %v14354_v53, %v13569_v0  ;;  %v7909_v8 = vsel %vm1258_vm4, %v14355_v4, %v13567_v61  ;;  %v10816_v61 = vld [vmem:[%s11295_s18 + $0x8] sm:$0xff]  ;;  %v14360_v7 = vld [vmem:[#allocation24_spill] sm:$0xff] }
 0xd6c   : > { %10260 = vmatprep.mubr.msk.f32.mxu0 %vm791_vm3, %v7929_v17  ;;  %v7859_v52 = vpop.permute.xlu0 %7858 }
 0xd6d   : > { %v7933_v18 = vsel %vm7926_vm7, %v7916_v25, %v7859_v52  ;;  %v14357_v25 = vld [vmem:[#allocation21_spill] sm:$0xff] }
 0xd6e   : > { %v7857_v45 = vpop.permute.xlu1 %7856 }
 0xd6f   : > { %10261 = vmatmul.mubr.msk.f32.gmra.mxu0 %vm791_vm3, %v7930_v29  ;;  %v7932_v11 = vsel %vm7926_vm7, %v7915_v43, %v7857_v45 }
 0xd70   : > { %v7855_v16 = vpop.permute.xlu0 %7854 }
 0xd71   : > { %v7931_v35 = vsel %vm7926_vm7, %v7914_v9, %v7855_v16  ;;  %v10817_v16 = vld [vmem:[%s11295_s18 + $0x18] sm:$0xff] }
 0xd72   : > { %10263 = vmatprep.mubr.msk.f32.mxu0 %vm791_vm3, %v7931_v35 }
 0xd73   : > { %v7869_v47 = vpop.permute.xlu1 %7868  ;;  %10264 = vmatmul.mubr.msk.f32.gmra.mxu0 %vm791_vm3, %v7932_v11 }
 0xd74   : > { %10266 = vmatprep.mubr.msk.f32.mxu0 %vm791_vm3, %v7933_v18  ;;  %v7938_v32 = vsel %vm7926_vm7, %v7921_v2, %v7869_v47 }
 0xd75   : > { %v7867_v20 = vpop.permute.xlu0 %7866 }
 0xd76   : > { %v7937_v56 = vsel %vm7926_vm7, %v7920_v12, %v7867_v20 }
 0xd77   : > { %v7865_v37 = vpop.permute.xlu1 %7864  ;;  %10267 = vmatmul.mubr.msk.f32.gmra.mxu0 %vm791_vm3, %v7934_v39 }
 0xd78   : > { %v7936_v40 = vsel %vm7926_vm7, %v7919_v30, %v7865_v37  ;;  %v14358_v37 = vld [vmem:[#allocation22_spill] sm:$0xff] }
 0xd79   : > { %v7863_v6 = vpop.permute.xlu0 %7862 }
 0xd7a   : > { %v7935_v31 = vsel %vm7926_vm7, %v7918_v59, %v7863_v6 }
 0xd7b   : > { %v7813_v51 = vpop.permute.xlu1 %7812  ;;  %10269 = vmatprep.mubr.msk.f32.mxu0 %vm791_vm3, %v7935_v31  ;;  %v14359_v31 = vld [vmem:[#allocation23_spill] sm:$0xff] }
 0xd7c   : > { %10270 = vmatmul.mubr.msk.f32.gmra.mxu0 %vm791_vm3, %v7936_v40  ;;  %v7925_v13 = vsel %vm1981_vm6, %v7909_v8, %v7813_v51  ;;  %v10822_v8 = vld [vmem:[%s11295_s18 + $0x68] sm:$0xff] }
 0xd7d   : > { %10272 = vmatprep.mubr.msk.f32.mxu0 %vm791_vm3, %v7937_v56  ;;  %v7811_v58 = vpop.permute.xlu0 %7810 }
 0xd7e   : > { %v7924_v1 = vsel %vm1981_vm6, %v7908_v5, %v7811_v58  ;;  %v14361_v5 = vld [vmem:[#allocation25_spill] sm:$0xff] }
 0xd7f   : > { %v7873_v21 = vpop.permute.xlu1 %7872 }
 0xd80   : > { %10273 = vmatmul.mubr.msk.f32.gmra.mxu0 %vm791_vm3, %v7938_v32  ;;  %v7940_v44 = vsel %vm7926_vm7, %v7923_v33, %v7873_v21 }
 0xd81   : > { %v7871_v23 = vpop.permute.xlu0 %7870 }
 0xd82   : > { %v7939_v34 = vsel %vm7926_vm7, %v7922_v27, %v7871_v23 }
 0xd83   : > { %10275 = vmatprep.mubr.msk.f32.mxu0 %vm791_vm3, %v7939_v34  ;;  %v7877_v19 = vpop.permute.xlu1 %7876 }
 0xd84   : > { %10276 = vmatmul.mubr.msk.f32.gmra.mxu0 %vm791_vm3, %v7940_v44  ;;  %v7942_v52 = vsel %vm7926_vm7, %v7925_v13, %v7877_v19 }
 0xd85   : > { %v7875_v17 = vpop.permute.xlu0 %7874 }
 0xd86   : > { %v7941_v38 = vsel %vm7926_vm7, %v7924_v1, %v7875_v17 }
 0xd87   : > { %10278 = vmatprep.mubr.msk.f32.mxu0 %vm791_vm3, %v7941_v38 }
 0xd88   : > { %10279 = vmatmul.mubr.msk.f32.gmra.mxu0 %vm791_vm3, %v7942_v52 }
 0xe2b   : > { %v10259_v0 = vpop.f32.mrf.mxu0 }
 0xe2c   : > { %v8141_v29 = vadd.f32 %v10816_v61, %v10259_v0  ;;  %v14362_v61 = vld [vmem:[#allocation26_spill] sm:$0xff] }
 0xe2d   : > { %v8061_v45 = vpop.f32.mrf.mxu0 }
 0xe2e   : > { %v13666_v62 = vadd.f32 %v13662_v60, %v8141_v29  ;;  %v8140_v14 = vadd.f32 %v8061_v45, %v14356_v41  ;;  %v10823_v41 = vld [vmem:[%s11295_s18 + $0x78] sm:$0xff] }
 0xe2f   : > { %v10262_v28 = vpop.f32.mrf.mxu0 }
 0xe30   : > { %v13670_v9 = vadd.f32 %v13662_v60, %v8140_v14  ;;  %v8143_v43 = vadd.f32 %v10817_v16, %v10262_v28  ;;  %v8184_v50 = vsel %vm791_vm3, %v13666_v62, 0.0 }
 0xe31   : > { %8185 = vadd.xlane.f32.xlu1 %v8184_v50  ;;  %v8071_v48 = vpop.f32.mrf.mxu0 }
 0xe32   : > { %v13676_v35 = vadd.f32 %v13662_v60, %v8143_v43  ;;  %v8142_v11 = vadd.f32 %v8071_v48, %v14357_v25  ;;  %v8181_v18 = vsel %vm791_vm3, %v13670_v9, 0.0  ;;  %v14363_v25 = vld [vmem:[#allocation27_spill] sm:$0xff] }
 0xe33   : > { %8182 = vadd.xlane.f32.xlu0 %v8181_v18  ;;  %v10265_v47 = vpop.f32.mrf.mxu0 }
 0xe34   : > { %v8145_v26 = vadd.f32 %v10818_v49, %v10265_v47  ;;  %v13683_v20 = vadd.f32 %v13662_v60, %v8142_v11  ;;  %v8190_v46 = vsel %vm791_vm3, %v13676_v35, 0.0 }
 0xe35   : > { %v8081_v54 = vpop.f32.mrf.mxu0 }
 0xe36   : > { %v13686_v39 = vadd.f32 %v13662_v60, %v8145_v26  ;;  %v8144_v57 = vadd.f32 %v8081_v54, %v14358_v37  ;;  %v8187_v40 = vsel %vm791_vm3, %v13683_v20, 0.0 }
 0xe37   : > { %8191 = vadd.xlane.f32.xlu0 %v8190_v46  ;;  %v10268_v63 = vpop.f32.mrf.mxu0 }
 0xe38   : > { %v8147_v59 = vadd.f32 %v10819_v42, %v10268_v63  ;;  %v8196_v6 = vsel %vm791_vm3, %v13686_v39, 0.0  ;;  %v13695_v36 = vadd.f32 %v13662_v60, %v8144_v57 }
 0xe39   : > { %8197 = vadd.xlane.f32.xlu1 %v8196_v6  ;;  %v8091_v30 = vpop.f32.mrf.mxu0 }
 0xe3a   : > { %v13698_v24 = vadd.f32 %v13662_v60, %v8147_v59  ;;  %v8146_v12 = vadd.f32 %v8091_v30, %v14359_v31  ;;  %v8193_v32 = vsel %vm791_vm3, %v13695_v36, 0.0 }
 0xe3b   : > { %8188 = vadd.xlane.f32.xlu0 %v8187_v40 }
 0xe3c   : > { %v10271_v51 = vpop.f32.mrf.mxu0  ;;  %v8202_v56 = vsel %vm791_vm3, %v13698_v24, 0.0  ;;  %v13707_v58 = vadd.f32 %v13662_v60, %v8146_v12 }
 0xe3d   : > { %v8149_v55 = vadd.f32 %v10820_v22, %v10271_v51  ;;  %8203 = vadd.xlane.f32.xlu1 %v8202_v56 }
 0xe3e   : > { %v8101_v2 = vpop.f32.mrf.mxu0  ;;  %v8199_v44 = vsel %vm791_vm3, %v13707_v58, 0.0 }
 0xe3f   : > { %v13712_v21 = vadd.f32 %v13662_v60, %v8149_v55  ;;  %v8148_v3 = vadd.f32 %v8101_v2, %v14360_v7  ;;  %8194 = vadd.xlane.f32.xlu0 %v8193_v32 }
 0xe40   : > { %v10274_v15 = vpop.f32.mrf.mxu0 }
 0xe41   : > { %v8151_v27 = vadd.f32 %v10821_v10, %v10274_v15  ;;  %v8208_v23 = vsel %vm791_vm3, %v13712_v21, 0.0  ;;  %v13719_v33 = vadd.f32 %v13662_v60, %v8148_v3 }
 0xe42   : > { %8209 = vadd.xlane.f32.xlu1 %v8208_v23  ;;  %v8111_v34 = vpop.f32.mrf.mxu0 }
 0xe43   : > { %v13724_v53 = vadd.f32 %v13662_v60, %v8151_v27  ;;  %v8150_v19 = vadd.f32 %v8111_v34, %v14361_v5  ;;  %8200 = vadd.xlane.f32.xlu0 %v8199_v44  ;;  %v8205_v52 = vsel %vm791_vm3, %v13719_v33, 0.0 }
 0xe44   : > { %v10277_v4 = vpop.f32.mrf.mxu0 }
 0xe45   : > { %v8153_v1 = vadd.f32 %v10822_v8, %v10277_v4  ;;  %v8214_v17 = vsel %vm791_vm3, %v13724_v53, 0.0  ;;  %v13731_v13 = vadd.f32 %v13662_v60, %v8150_v19 }
 0xe46   : > { %8215 = vadd.xlane.f32.xlu1 %v8214_v17  ;;  %v8121_v38 = vpop.f32.mrf.mxu0 }
 0xe47   : > { %v13736_v0 = vadd.f32 %v13662_v60, %v8153_v1  ;;  %v8152_v29 = vadd.f32 %v8121_v38, %v14362_v61  ;;  %8206 = vadd.xlane.f32.xlu0 %v8205_v52  ;;  %v8211_v50 = vsel %vm791_vm3, %v13731_v13, 0.0 }
 0xe48   : > { %v10280_v45 = vpop.f32.mrf.mxu0 }
 0xe49   : > { %v8155_v14 = vadd.f32 %v10823_v41, %v10280_v45  ;;  %v8220_v28 = vsel %vm791_vm3, %v13736_v0, 0.0  ;;  %v13743_v16 = vadd.f32 %v13662_v60, %v8152_v29 }
 0xe4a   : > { %8221 = vadd.xlane.f32.xlu1 %v8220_v28  ;;  %v8131_v43 = vpop.f32.mrf.mxu0 }
 0xe4b   : > { %v13748_v48 = vadd.f32 %v13662_v60, %v8155_v14  ;;  %v8154_v11 = vadd.f32 %v8131_v43, %v14363_v25  ;;  %8212 = vadd.xlane.f32.xlu0 %v8211_v50  ;;  %v8217_v49 = vsel %vm791_vm3, %v13743_v16, 0.0 }
 0xe4d   : > { %v8226_v18 = vsel %vm791_vm3, %v13748_v48, 0.0  ;;  %v13754_v47 = vadd.f32 %v13662_v60, %v8154_v11 }
 0xe4e   : > { %8227 = vadd.xlane.f32.xlu1 %v8226_v18 }
 0xe4f   : > { %8218 = vadd.xlane.f32.xlu0 %v8217_v49  ;;  %v8223_v26 = vsel %vm791_vm3, %v13754_v47, 0.0 }
 0xe53   : > { %8224 = vadd.xlane.f32.xlu0 %v8223_v26 }
 0xeba   : > { %v8186_v54 = vpop.xlane.xlu1 %8185 }
 0xebb   : > { %v8230_v37 = vmul.f32 0.03125, %v8186_v54 }
 0xebc   : > { %v8183_v57 = vpop.xlane.xlu0 %8182 }
 0xebd   : > { %v13761_v46 = vsub.f32 %v13666_v62, %v8230_v37  ;;  %v8229_v63 = vmul.f32 0.03125, %v8183_v57 }
 0xebf   : > { %v13764_v42 = vsub.f32 %v13670_v9, %v8229_v63  ;;  %v8262_v60 = vmul.f32 %v13761_v46, %v13761_v46 }
 0xec0   : > { %v8192_v59 = vpop.xlane.xlu0 %8191 }
 0xec1   : > { %v8232_v6 = vmul.f32 0.03125, %v8192_v59  ;;  %v8280_v30 = vsel %vm791_vm3, %v8262_v60, 0.0  ;;  %v8261_v31 = vmul.f32 %v13764_v42, %v13764_v42 }
 0xec2   : > { %v8198_v12 = vpop.xlane.xlu1 %8197  ;;  %8281 = vadd.xlane.f32.xlu1 %v8280_v30 }
 0xec3   : > { %v13772_v40 = vsub.f32 %v13676_v35, %v8232_v6  ;;  %v8234_v62 = vmul.f32 0.03125, %v8198_v12  ;;  %v8277_v51 = vsel %vm791_vm3, %v8261_v31, 0.0 }
 0xec4   : > { %8278 = vadd.xlane.f32.xlu0 %v8277_v51  ;;  %v8189_v56 = vpop.xlane.xlu0 %8188 }
 0xec5   : > { %v13776_v22 = vsub.f32 %v13686_v39, %v8234_v62  ;;  %v8231_v55 = vmul.f32 0.03125, %v8189_v56  ;;  %v8264_v2 = vmul.f32 %v13772_v40, %v13772_v40 }
 0xec6   : > { %v8204_v32 = vpop.xlane.xlu1 %8203 }
 0xec7   : > { %v13781_v7 = vsub.f32 %v13683_v20, %v8231_v55  ;;  %v8236_v3 = vmul.f32 0.03125, %v8204_v32  ;;  %v8286_v35 = vsel %vm791_vm3, %v8264_v2, 0.0  ;;  %v8266_v15 = vmul.f32 %v13776_v22, %v13776_v22 }
 0xec8   : > { %8287 = vadd.xlane.f32.xlu1 %v8286_v35  ;;  %v8195_v10 = vpop.xlane.xlu0 %8194 }
 0xec9   : > { %v13787_v27 = vsub.f32 %v13698_v24, %v8236_v3  ;;  %v8233_v39 = vmul.f32 0.03125, %v8195_v10  ;;  %v8263_v23 = vmul.f32 %v13781_v7, %v13781_v7  ;;  %v8292_v5 = vsel %vm791_vm3, %v8266_v15, 0.0 }
 0xecb   : > { %v13792_v34 = vsub.f32 %v13695_v36, %v8233_v39  ;;  %v8210_v44 = vpop.xlane.xlu1 %8209  ;;  %v8283_v19 = vsel %vm791_vm3, %v8263_v23, 0.0  ;;  %v8268_v4 = vmul.f32 %v13787_v27, %v13787_v27 }
 0xecc   : > { %v8238_v8 = vmul.f32 0.03125, %v8210_v44  ;;  %8293 = vadd.xlane.f32.xlu1 %v8292_v5  ;;  %8284 = vadd.xlane.f32.xlu0 %v8283_v19  ;;  %v8201_v24 = vpop.xlane.xlu0 %8200  ;;  %v8436_v5 = vld [vmem:[#allocation8 + $0x18] sm:$0xff] }
 0xecd   : > { %v8235_v1 = vmul.f32 0.03125, %v8201_v24  ;;  %v8265_v17 = vmul.f32 %v13792_v34, %v13792_v34  ;;  %v8298_v29 = vsel %vm791_vm3, %v8268_v4, 0.0  ;;  %10281 = vmatprep.subr.mxu1 %v8436_v5  ;;  %v8435_v4 = vld [vmem:[#allocation8 + $0x10] sm:$0xff]  ;;  %v8433_v24 = vld [vmem:[#allocation8] sm:$0xff] }
 0xece   : > { %v13801_v38 = vsub.f32 %v13712_v21, %v8238_v8  ;;  %10282 = vmatpush3.msra.mxu1 %v8436_v5  ;;  %v8434_v8 = vld [vmem:[#allocation8 + $0x8] sm:$0xff] }
 0xecf   : > { %v13804_v52 = vsub.f32 %v13707_v58, %v8235_v1  ;;  %v8216_v61 = vpop.xlane.xlu1 %8215  ;;  %v8289_v45 = vsel %vm791_vm3, %v8265_v17, 0.0  ;;  %10283 = vmatprep.subr.mxu1 %v8435_v4 }
 0xed0   : > { %v8240_v41 = vmul.f32 0.03125, %v8216_v61  ;;  %8299 = vadd.xlane.f32.xlu1 %v8298_v29  ;;  %8290 = vadd.xlane.f32.xlu0 %v8289_v45  ;;  %v8207_v14 = vpop.xlane.xlu0 %8206  ;;  %v8270_v28 = vmul.f32 %v13801_v38, %v13801_v38 }
 0xed1   : > { %v8237_v43 = vmul.f32 0.03125, %v8207_v14  ;;  %v8267_v21 = vmul.f32 %v13804_v52, %v13804_v52  ;;  %10284 = vmatpush3.msra.mxu1 %v8435_v4 }
 0xed2   : > { %v13813_v50 = vsub.f32 %v13724_v53, %v8240_v41  ;;  %v8304_v18 = vsel %vm791_vm3, %v8270_v28, 0.0  ;;  %10285 = vmatprep.subr.mxu1 %v8434_v8 }
 0xed3   : > { %v13816_v25 = vsub.f32 %v13719_v33, %v8237_v43  ;;  %v8222_v11 = vpop.xlane.xlu1 %8221  ;;  %v8295_v49 = vsel %vm791_vm3, %v8267_v21, 0.0  ;;  %10286 = vmatpush3.msra.mxu1 %v8434_v8 }
 0xed4   : > { %v8242_v26 = vmul.f32 0.03125, %v8222_v11  ;;  %8305 = vadd.xlane.f32.xlu1 %v8304_v18  ;;  %8296 = vadd.xlane.f32.xlu0 %v8295_v49  ;;  %v8213_v54 = vpop.xlane.xlu0 %8212  ;;  %v8272_v37 = vmul.f32 %v13813_v50, %v13813_v50 }
 0xed5   : > { %v8239_v57 = vmul.f32 0.03125, %v8213_v54  ;;  %v8269_v53 = vmul.f32 %v13816_v25, %v13816_v25  ;;  %10287 = vmatprep.subr.mxu1 %v8433_v24 }
 0xed6   : > { %v13825_v63 = vsub.f32 %v13736_v0, %v8242_v26  ;;  %v8310_v6 = vsel %vm791_vm3, %v8272_v37, 0.0  ;;  %10288 = vmatpush3.msra.mxu1 %v8433_v24 }
 0xed7   : > { %v13828_v60 = vsub.f32 %v13731_v13, %v8239_v57  ;;  %v8228_v59 = vpop.xlane.xlu1 %8227  ;;  %v8301_v30 = vsel %vm791_vm3, %v8269_v53, 0.0 }
 0xed8   : > { %v8244_v31 = vmul.f32 0.03125, %v8228_v59  ;;  %8311 = vadd.xlane.f32.xlu1 %v8310_v6  ;;  %8302 = vadd.xlane.f32.xlu0 %v8301_v30  ;;  %v8219_v12 = vpop.xlane.xlu0 %8218  ;;  %v8274_v62 = vmul.f32 %v13825_v63, %v13825_v63 }
 0xed9   : > { %v8241_v51 = vmul.f32 0.03125, %v8219_v12  ;;  %v8271_v0 = vmul.f32 %v13828_v60, %v13828_v60 }
 0xeda   : > { %v13837_v56 = vsub.f32 %v13748_v48, %v8244_v31  ;;  %v8316_v2 = vsel %vm791_vm3, %v8274_v62, 0.0 }
 0xedb   : > { %v13840_v55 = vsub.f32 %v13743_v16, %v8241_v51  ;;  %v8307_v32 = vsel %vm791_vm3, %v8271_v0, 0.0 }
 0xedc   : > { %8317 = vadd.xlane.f32.xlu1 %v8316_v2  ;;  %8308 = vadd.xlane.f32.xlu0 %v8307_v32  ;;  %v8225_v3 = vpop.xlane.xlu0 %8224  ;;  %v8276_v35 = vmul.f32 %v13837_v56, %v13837_v56  ;;  %v13860_v32 = vld [vmem:[%s14184_s10] ss:$0 sm:$0xff] }
 0xedd   : > { %v8243_v15 = vmul.f32 0.03125, %v8225_v3  ;;  %v8273_v10 = vmul.f32 %v13840_v55, %v13840_v55 }
 0xede   : > { %v8322_v39 = vsel %vm791_vm3, %v8276_v35, 0.0 }
 0xedf   : > { %v13849_v48 = vsub.f32 %v13754_v47, %v8243_v15  ;;  %v8313_v23 = vsel %vm791_vm3, %v8273_v10, 0.0 }
 0xee0   : > { %8323 = vadd.xlane.f32.xlu1 %v8322_v39  ;;  %8314 = vadd.xlane.f32.xlu0 %v8313_v23 }
 0xee1   : > { %v8275_v44 = vmul.f32 %v13849_v48, %v13849_v48 }
 0xee3   : > { %v8319_v19 = vsel %vm791_vm3, %v8275_v44, 0.0 }
 0xee4   : > { %8320 = vadd.xlane.f32.xlu0 %v8319_v19  ;;  %v13867_v19 = vld [vmem:[%s14185_s11] ss:$0 sm:$0xff] }
 0xf4b   : > { %v8282_v1 = vpop.xlane.xlu1 %8281 }
 0xf4c   : > { %v8326_v17 = vmul.f32 0.03125, %v8282_v1 }
 0xf4d   : > { %v8279_v61 = vpop.xlane.xlu0 %8278 }
 0xf4e   : > { %v8342_v29 = vadd.f32 1e-06, %v8326_v17  ;;  %v8325_v45 = vmul.f32 0.03125, %v8279_v61 }
 0xf50   : > { %10752 = vrsqrt.f32 %v8342_v29  ;;  %v8341_v41 = vadd.f32 1e-06, %v8325_v45 }
 0xf51   : > { %v8288_v14 = vpop.xlane.xlu1 %8287 }
 0xf52   : > { %10754 = vrsqrt.f32 %v8341_v41  ;;  %v8328_v28 = vmul.f32 0.03125, %v8288_v14 }
 0xf54   : > { %v8344_v43 = vadd.f32 1e-06, %v8328_v28 }
 0xf55   : > { %v8294_v21 = vpop.xlane.xlu1 %8293  ;;  %v8285_v11 = vpop.xlane.xlu0 %8284 }
 0xf56   : > { %10756 = vrsqrt.f32 %v8344_v43  ;;  %v8330_v18 = vmul.f32 0.03125, %v8294_v21  ;;  %v8327_v49 = vmul.f32 0.03125, %v8285_v11 }
 0xf58   : > { %v8346_v26 = vadd.f32 1e-06, %v8330_v18  ;;  %v8343_v54 = vadd.f32 1e-06, %v8327_v49 }
 0xf59   : > { %v8300_v37 = vpop.xlane.xlu1 %8299  ;;  %v8291_v57 = vpop.xlane.xlu0 %8290 }
 0xf5a   : > { %10758 = vrsqrt.f32 %v8346_v26  ;;  %v8332_v53 = vmul.f32 0.03125, %v8300_v37  ;;  %v8329_v59 = vmul.f32 0.03125, %v8291_v57 }
 0xf5b   : > { %10760 = vrsqrt.f32 %v8343_v54 }
 0xf5c   : > { %v8348_v6 = vadd.f32 1e-06, %v8332_v53  ;;  %v8345_v30 = vadd.f32 1e-06, %v8329_v59 }
 0xf5d   : > { %v10753_v31 = vpop.eup %10752  ;;  %v8306_v12 = vpop.xlane.xlu1 %8305 }
 0xf5e   : > { %v8297_v62 = vpop.xlane.xlu0 %8296  ;;  %v8374_v51 = vmul.f32 %v10753_v31, %v13761_v46  ;;  %10762 = vrsqrt.f32 %v8348_v6  ;;  %v8334_v0 = vmul.f32 0.03125, %v8306_v12 }
 0xf5f   : > { %v8331_v2 = vmul.f32 0.03125, %v8297_v62  ;;  %v10755_v3 = vpop.eup %10754  ;;  %10764 = vrsqrt.f32 %v8345_v30 }
 0xf60   : > { %v8350_v35 = vadd.f32 1e-06, %v8334_v0  ;;  %v8373_v10 = vmul.f32 %v10755_v3, %v13764_v42  ;;  %v8396_v44 = vmul.f32 %v13860_v32, %v8374_v51 }
 0xf61   : > { %v8347_v15 = vadd.f32 1e-06, %v8331_v2  ;;  %v8312_v39 = vpop.xlane.xlu1 %8311 }
 0xf62   : > { %v8303_v23 = vpop.xlane.xlu0 %8302  ;;  %10766 = vrsqrt.f32 %v8350_v35  ;;  %v8336_v46 = vmul.f32 0.03125, %v8312_v39  ;;  %v8395_v4 = vmul.f32 %v13860_v32, %v8373_v10  ;;  %v8418_v29 = vadd.f32 %v13867_v19, %v8396_v44 }
 0xf63   : > { %v8333_v5 = vmul.f32 0.03125, %v8303_v23  ;;  %v10757_v8 = vpop.eup %10756  ;;  %10768 = vrsqrt.f32 %v8347_v15 }
 0xf64   : > { %v8352_v24 = vadd.f32 1e-06, %v8336_v46  ;;  %v8417_v42 = vadd.f32 %v13867_v19, %v8395_v4  ;;  %v8376_v45 = vmul.f32 %v10757_v8, %v13772_v40 }
 0xf65   : > { %v8349_v1 = vadd.f32 1e-06, %v8333_v5  ;;  %v8318_v17 = vpop.xlane.xlu1 %8317 }
 0xf66   : > { %v8309_v61 = vpop.xlane.xlu0 %8308  ;;  %10770 = vrsqrt.f32 %v8352_v24  ;;  %v8338_v41 = vmul.f32 0.03125, %v8318_v17  ;;  %10289 = vmatprep.mubr.msk.f32.mxu1 %vm791_vm3, %v8417_v42  ;;  %v8398_v54 = vmul.f32 %v13860_v32, %v8376_v45 }
 0xf67   : > { %v8335_v14 = vmul.f32 0.03125, %v8309_v61  ;;  %v10759_v28 = vpop.eup %10758  ;;  %10772 = vrsqrt.f32 %v8349_v1  ;;  %10290 = vmatmul.mubr.msk.f32.vlgmr.msra.gmra.mxu1 %vm791_vm3, %v8418_v29 }
 0xf68   : > { %v10761_v43 = vpop.eup %10760  ;;  %v8354_v21 = vadd.f32 1e-06, %v8338_v41  ;;  %v8378_v57 = vmul.f32 %v10759_v28, %v13776_v22  ;;  %v8420_v51 = vadd.f32 %v13867_v19, %v8398_v54 }
 0xf69   : > { %v8351_v11 = vadd.f32 1e-06, %v8335_v14  ;;  %v8324_v18 = vpop.xlane.xlu1 %8323  ;;  %v8375_v26 = vmul.f32 %v10761_v43, %v13781_v7 }
 0xf6a   : > { %v8315_v49 = vpop.xlane.xlu0 %8314  ;;  %10774 = vrsqrt.f32 %v8354_v21  ;;  %v8340_v40 = vmul.f32 0.03125, %v8324_v18  ;;  %v8400_v2 = vmul.f32 %v13860_v32, %v8378_v57 }
 0xf6b   : > { %v8337_v37 = vmul.f32 0.03125, %v8315_v49  ;;  %v10763_v53 = vpop.eup %10762  ;;  %10776 = vrsqrt.f32 %v8351_v11  ;;  %v8397_v59 = vmul.f32 %v13860_v32, %v8375_v26 }
 0xf6c   : > { %v10765_v6 = vpop.eup %10764  ;;  %v8356_v30 = vadd.f32 1e-06, %v8340_v40  ;;  %v8380_v22 = vmul.f32 %v10763_v53, %v13787_v27  ;;  %v8422_v23 = vadd.f32 %v13867_v19, %v8400_v2  ;;  %v8784_v2 = vld [vmem:[%s14188_s14 + $0x18] sm:$0xff] }
 0xf6d   : > { %v8353_v31 = vadd.f32 1e-06, %v8337_v37  ;;  %v8419_v62 = vadd.f32 %v13867_v19, %v8397_v59  ;;  %v8377_v7 = vmul.f32 %v10765_v6, %v13792_v34  ;;  %v8794_v59 = vld [vmem:[%s14188_s14 + $0x68] sm:$0xff]  ;;  %v8792_v6 = vld [vmem:[%s14188_s14 + $0x58] sm:$0xff] }
 0xf6e   : > { %v8321_v12 = vpop.xlane.xlu0 %8320  ;;  %10778 = vrsqrt.f32 %v8356_v30  ;;  %v8402_v44 = vmul.f32 %v13860_v32, %v8380_v22  ;;  %v8791_v30 = vld [vmem:[%s14188_s14 + $0x50] sm:$0xff] }
 0xf6f   : > { %v8339_v0 = vmul.f32 0.03125, %v8321_v12  ;;  %v10767_v3 = vpop.eup %10766  ;;  %10780 = vrsqrt.f32 %v8353_v31  ;;  %10292 = vmatprep.mubr.msk.f32.mxu1 %vm791_vm3, %v8419_v62  ;;  %v8399_v35 = vmul.f32 %v13860_v32, %v8377_v7  ;;  %v8790_v31 = vld [vmem:[%s14188_s14 + $0x48] sm:$0xff]  ;;  %v8789_v12 = vld [vmem:[%s14188_s14 + $0x40] sm:$0xff]  ;;  %v8788_v62 = vld [vmem:[%s14188_s14 + $0x38] sm:$0xff] }
 0xf70   : > { %v10769_v15 = vpop.eup %10768  ;;  %10293 = vmatmul.mubr.msk.f32.gmra.mxu1 %vm791_vm3, %v8420_v51  ;;  %v8382_v27 = vmul.f32 %v10767_v3, %v13801_v38  ;;  %v8787_v51 = vld [vmem:[%s14188_s14 + $0x30] sm:$0xff]  ;;  %v8786_v7 = vld [vmem:[%s14188_s14 + $0x28] sm:$0xff] }
 0xf71   : > { %v8355_v10 = vadd.f32 1e-06, %v8339_v0  ;;  %v8421_v39 = vadd.f32 %v13867_v19, %v8399_v35  ;;  %v8379_v34 = vmul.f32 %v10769_v15, %v13804_v52  ;;  %v8424_v52 = vadd.f32 %v13867_v19, %v8402_v44  ;;  %v8785_v0 = vld [vmem:[%s14188_s14 + $0x20] sm:$0xff]  ;;  %v8783_v22 = vld [vmem:[%s14188_s14 + $0x10] sm:$0xff]  ;;  %v8782_v3 = vld [vmem:[%s14188_s14 + $0x8] sm:$0xff] }
 0xf72   : > { %v8404_v1 = vmul.f32 %v13860_v32, %v8382_v27  ;;  %v8781_v35 = vld [vmem:[%s14188_s14] sm:$0xff] }
 0xf73   : > { %10782 = vrsqrt.f32 %v8355_v10  ;;  %v10771_v46 = vpop.eup %10770  ;;  %10295 = vmatprep.mubr.msk.f32.mxu1 %vm791_vm3, %v8421_v39  ;;  %v8401_v5 = vmul.f32 %v13860_v32, %v8379_v34  ;;  %v13981_v15 = vld [vmem:[%s14187_s13] ss:$0 sm:$0xff] }
 0xf74   : > { %v10773_v4 = vpop.eup %10772  ;;  %10296 = vmatmul.mubr.msk.f32.gmra.mxu1 %vm791_vm3, %v8422_v23  ;;  %v8384_v42 = vmul.f32 %v10771_v46, %v13813_v50 }
 0xf75   : > { %v8423_v8 = vadd.f32 %v13867_v19, %v8401_v5  ;;  %v8381_v24 = vmul.f32 %v10773_v4, %v13816_v25  ;;  %v8426_v25 = vadd.f32 %v13867_v19, %v8404_v1 }
 0xf76   : > { %v8406_v41 = vmul.f32 %v13860_v32, %v8384_v42 }
 0xf77   : > { %v10775_v17 = vpop.eup %10774  ;;  %10298 = vmatprep.mubr.msk.f32.mxu1 %vm791_vm3, %v8423_v8  ;;  %v8403_v38 = vmul.f32 %v13860_v32, %v8381_v24 }
 0xf78   : > { %v10777_v61 = vpop.eup %10776  ;;  %10299 = vmatmul.mubr.msk.f32.gmra.mxu1 %vm791_vm3, %v8424_v52  ;;  %v8386_v14 = vmul.f32 %v10775_v17, %v13825_v63 }
 0xf79   : > { %v8425_v29 = vadd.f32 %v13867_v19, %v8403_v38  ;;  %v8383_v45 = vmul.f32 %v10777_v61, %v13828_v60  ;;  %v8428_v60 = vadd.f32 %v13867_v19, %v8406_v41 }
 0xf7a   : > { %v8408_v18 = vmul.f32 %v13860_v32, %v8386_v14 }
 0xf7b   : > { %v10779_v28 = vpop.eup %10778  ;;  %10301 = vmatprep.mubr.msk.f32.mxu1 %vm791_vm3, %v8425_v29  ;;  %v8405_v50 = vmul.f32 %v13860_v32, %v8383_v45 }
 0xf7c   : > { %v10781_v43 = vpop.eup %10780  ;;  %10302 = vmatmul.mubr.msk.f32.gmra.mxu1 %vm791_vm3, %v8426_v25  ;;  %v8388_v49 = vmul.f32 %v10779_v28, %v13837_v56  ;;  %v8430_v37 = vadd.f32 %v13867_v19, %v8408_v18 }
 0xf7d   : > { %v8427_v21 = vadd.f32 %v13867_v19, %v8405_v50  ;;  %v8385_v11 = vmul.f32 %v10781_v43, %v13840_v55 }
 0xf7e   : > { %v8410_v57 = vmul.f32 %v13860_v32, %v8388_v49 }
 0xf7f   : > { %10304 = vmatprep.mubr.msk.f32.mxu1 %vm791_vm3, %v8427_v21  ;;  %v8407_v63 = vmul.f32 %v13860_v32, %v8385_v11 }
 0xf80   : > { %v10783_v26 = vpop.eup %10782  ;;  %10305 = vmatmul.mubr.msk.f32.gmra.mxu1 %vm791_vm3, %v8428_v60  ;;  %v8432_v53 = vadd.f32 %v13867_v19, %v8410_v57 }
 0xf81   : > { %v8387_v54 = vmul.f32 %v10783_v26, %v13849_v48  ;;  %v8429_v40 = vadd.f32 %v13867_v19, %v8407_v63  ;;  %v8796_v48 = vld [vmem:[%s14188_s14 + $0x78] sm:$0xff] }
 0xf82   : > { %10313 = vmatprep.subr.mxu0 %v8796_v48 }
 0xf83   : > { %v8409_v55 = vmul.f32 %v13860_v32, %v8387_v54  ;;  %10307 = vmatprep.mubr.msk.f32.mxu1 %vm791_vm3, %v8429_v40  ;;  %10314 = vmatpush3.msra.mxu0 %v8796_v48  ;;  %v8795_v32 = vld [vmem:[%s14188_s14 + $0x70] sm:$0xff] }
 0xf84   : > { %10308 = vmatmul.mubr.msk.f32.gmra.mxu1 %vm791_vm3, %v8430_v37  ;;  %10315 = vmatprep.subr.mxu0 %v8795_v32 }
 0xf85   : > { %v8431_v56 = vadd.f32 %v13867_v19, %v8409_v55  ;;  %10316 = vmatpush3.msra.mxu0 %v8795_v32  ;;  %v8793_v19 = vld [vmem:[%s14188_s14 + $0x60] sm:$0xff] }
 0xf86   : > { %10317 = vmatprep.subr.mxu0 %v8794_v59 }
 0xf87   : > { %10310 = vmatprep.mubr.msk.f32.mxu1 %vm791_vm3, %v8431_v56  ;;  %10318 = vmatpush3.msra.mxu0 %v8794_v59 }
 0xf88   : > { %10311 = vmatmul.mubr.msk.f32.gmra.mxu1 %vm791_vm3, %v8432_v53  ;;  %10319 = vmatprep.subr.mxu0 %v8793_v19 }
 0xf89   : > { %10320 = vmatpush3.msra.mxu0 %v8793_v19 }
 0xf8a   : > { %10321 = vmatprep.subr.mxu0 %v8792_v6 }
 0xf8b   : > { %10322 = vmatpush3.msra.mxu0 %v8792_v6 }
 0xf8c   : > { %10323 = vmatprep.subr.mxu0 %v8791_v30 }
 0xf8d   : > { %10324 = vmatpush3.msra.mxu0 %v8791_v30 }
 0xf8e   : > { %10325 = vmatprep.subr.mxu0 %v8790_v31 }
 0xf8f   : > { %10326 = vmatpush3.msra.mxu0 %v8790_v31 }
 0xf90   : > { %10327 = vmatprep.subr.mxu0 %v8789_v12 }
 0xf91   : > { %10328 = vmatpush3.msra.mxu0 %v8789_v12 }
 0xf92   : > { %10329 = vmatprep.subr.mxu0 %v8788_v62 }
 0xf93   : > { %10330 = vmatpush3.msra.mxu0 %v8788_v62 }
 0xf94   : > { %10331 = vmatprep.subr.mxu0 %v8787_v51 }
 0xf95   : > { %10332 = vmatpush3.msra.mxu0 %v8787_v51 }
 0xf96   : > { %10333 = vmatprep.subr.mxu0 %v8786_v7 }
 0xf97   : > { %10334 = vmatpush3.msra.mxu0 %v8786_v7 }
 0xf98   : > { %10335 = vmatprep.subr.mxu0 %v8785_v0 }
 0xf99   : > { %10336 = vmatpush3.msra.mxu0 %v8785_v0 }
 0xf9a   : > { %10337 = vmatprep.subr.mxu0 %v8784_v2 }
 0xf9b   : > { %10338 = vmatpush3.msra.mxu0 %v8784_v2 }
 0xf9c   : > { %10339 = vmatprep.subr.mxu0 %v8783_v22 }
 0xf9d   : > { %10340 = vmatpush3.msra.mxu0 %v8783_v22 }
 0xf9e   : > { %10341 = vmatprep.subr.mxu0 %v8782_v3 }
 0xf9f   : > { %10342 = vmatpush3.msra.mxu0 %v8782_v3 }
 0xfa0   : > { %10343 = vmatprep.subr.mxu0 %v8781_v35 }
 0xfa1   : > { %10344 = vmatpush3.msra.mxu0 %v8781_v35 }
0x1027   : > { %v10291_v10 = vpop.f32.mrf.mxu1 }
0x1028   : > { %v13984_v39 = vadd.f32 %v10291_v10, %v13981_v15 }
0x1029   : > { %v8558_v34 = vpop.f32.mrf.mxu1 }
0x102a   : > { %v8638_v23 = vmul.f32 %v13984_v39, %v13984_v39  ;;  %v13989_v44 = vadd.f32 %v13981_v15, %v8558_v34 }
0x102c   : > { %v8654_v27 = vmul.f32 %v8638_v23, %v13984_v39  ;;  %v8637_v46 = vmul.f32 %v13989_v44, %v13989_v44 }
0x102e   : > { %v8670_v5 = vmul.f32 0.044715, %v8654_v27  ;;  %v8653_v4 = vmul.f32 %v8637_v46, %v13989_v44 }
0x1030   : > { %v8686_v8 = vadd.f32 %v8670_v5, %v13984_v39  ;;  %v8669_v24 = vmul.f32 0.044715, %v8653_v4  ;;  %v10294_v52 = vpop.f32.mrf.mxu1 }
0x1031   : > { %v13997_v1 = vadd.f32 %v10294_v52, %v13981_v15 }
0x1032   : > { %v8702_v42 = vmul.f32 0.7978846, %v8686_v8  ;;  %v8685_v17 = vadd.f32 %v8669_v24, %v13989_v44  ;;  %v8568_v38 = vpop.f32.mrf.mxu1 }
0x1033   : > { %v8640_v61 = vmul.f32 %v13997_v1, %v13997_v1  ;;  %v14003_v29 = vadd.f32 %v13981_v15, %v8568_v38 }
0x1034   : > { %10784 = vtanh.f32 %v8702_v42  ;;  %v8701_v45 = vmul.f32 0.7978846, %v8685_v17  ;;  %v10297_v25 = vpop.f32.mrf.mxu1 }
0x1035   : > { %v8656_v41 = vmul.f32 %v8640_v61, %v13997_v1  ;;  %v8639_v14 = vmul.f32 %v14003_v29, %v14003_v29  ;;  %v14009_v28 = vadd.f32 %v10297_v25, %v13981_v15 }
0x1036   : > { %v8578_v50 = vpop.f32.mrf.mxu1  ;;  %10786 = vtanh.f32 %v8701_v45 }
0x1037   : > { %v8672_v43 = vmul.f32 0.044715, %v8656_v41  ;;  %v8655_v21 = vmul.f32 %v8639_v14, %v14003_v29  ;;  %v8642_v11 = vmul.f32 %v14009_v28, %v14009_v28  ;;  %v14015_v60 = vadd.f32 %v13981_v15, %v8578_v50 }
0x1038   : > { %v10300_v18 = vpop.f32.mrf.mxu1 }
0x1039   : > { %v8688_v49 = vadd.f32 %v8672_v43, %v13997_v1  ;;  %v8671_v26 = vmul.f32 0.044715, %v8655_v21  ;;  %v8658_v63 = vmul.f32 %v8642_v11, %v14009_v28  ;;  %v8641_v54 = vmul.f32 %v14015_v60, %v14015_v60 }
0x103a   : > { %v14022_v40 = vadd.f32 %v10300_v18, %v13981_v15  ;;  %v8588_v37 = vpop.f32.mrf.mxu1 }
0x103b   : > { %v8704_v55 = vmul.f32 0.7978846, %v8688_v49  ;;  %v8687_v57 = vadd.f32 %v8671_v26, %v14003_v29  ;;  %v8674_v56 = vmul.f32 0.044715, %v8658_v63  ;;  %v8657_v53 = vmul.f32 %v8641_v54, %v14015_v60 }
0x103c   : > { %v8644_v48 = vmul.f32 %v14022_v40, %v14022_v40  ;;  %v14029_v32 = vadd.f32 %v13981_v15, %v8588_v37  ;;  %v10303_v59 = vpop.f32.mrf.mxu1 }
0x103d   : > { %v8703_v19 = vmul.f32 0.7978846, %v8687_v57  ;;  %v8690_v6 = vadd.f32 %v8674_v56, %v14009_v28  ;;  %v8673_v30 = vmul.f32 0.044715, %v8657_v53  ;;  %10788 = vtanh.f32 %v8704_v55 }
0x103e   : > { %v8660_v31 = vmul.f32 %v8644_v48, %v14022_v40  ;;  %v8643_v12 = vmul.f32 %v14029_v32, %v14029_v32  ;;  %v14036_v62 = vadd.f32 %v10303_v59, %v13981_v15  ;;  %v8598_v51 = vpop.f32.mrf.mxu1 }
0x103f   : > { %10790 = vtanh.f32 %v8703_v19  ;;  %v8706_v7 = vmul.f32 0.7978846, %v8690_v6  ;;  %v8689_v0 = vadd.f32 %v8673_v30, %v14015_v60  ;;  %v14040_v2 = vadd.f32 %v13981_v15, %v8598_v51 }
0x1040   : > { %v8676_v22 = vmul.f32 0.044715, %v8660_v31  ;;  %v8659_v3 = vmul.f32 %v8643_v12, %v14029_v32  ;;  %v8646_v35 = vmul.f32 %v14036_v62, %v14036_v62  ;;  %v10306_v10 = vpop.f32.mrf.mxu1 }
0x1041   : > { %v10785_v34 = vpop.eup %10784  ;;  %10792 = vtanh.f32 %v8706_v7  ;;  %v8705_v23 = vmul.f32 0.7978846, %v8689_v0  ;;  %v8645_v27 = vmul.f32 %v14040_v2, %v14040_v2  ;;  %v14048_v46 = vadd.f32 %v10306_v10, %v13981_v15 }
0x1042   : > { %v8734_v5 = vadd.f32 1.0, %v10785_v34  ;;  %v8692_v4 = vadd.f32 %v8676_v22, %v14022_v40  ;;  %v8675_v8 = vmul.f32 0.044715, %v8659_v3  ;;  %v8662_v24 = vmul.f32 %v8646_v35, %v14036_v62  ;;  %v8608_v52 = vpop.f32.mrf.mxu1 }
0x1043   : > { %10794 = vtanh.f32 %v8705_v23  ;;  %v8661_v42 = vmul.f32 %v8645_v27, %v14040_v2  ;;  %v8648_v17 = vmul.f32 %v14048_v46, %v14048_v46  ;;  %v14056_v38 = vadd.f32 %v13981_v15, %v8608_v52  ;;  %v10787_v50 = vpop.eup %10786 }
0x1044   : > { %v8750_v61 = vmul.f32 0.5, %v8734_v5  ;;  %v8708_v45 = vmul.f32 0.7978846, %v8692_v4  ;;  %v8691_v25 = vadd.f32 %v8675_v8, %v14029_v32  ;;  %v8678_v41 = vmul.f32 0.044715, %v8662_v24  ;;  %v10309_v14 = vpop.f32.mrf.mxu1 }
0x1045   : > { %v8677_v43 = vmul.f32 0.044715, %v8661_v42  ;;  %v8664_v21 = vmul.f32 %v8648_v17, %v14048_v46  ;;  %v8647_v11 = vmul.f32 %v14056_v38, %v14056_v38  ;;  %v14063_v18 = vadd.f32 %v10309_v14, %v13981_v15 }
0x1046   : > { %v8766_v49 = vmul.f32 %v8750_v61, %v13984_v39  ;;  %10796 = vtanh.f32 %v8708_v45  ;;  %v8707_v26 = vmul.f32 0.7978846, %v8691_v25  ;;  %v8694_v63 = vadd.f32 %v8678_v41, %v14036_v62  ;;  %v8618_v54 = vpop.f32.mrf.mxu1 }
0x1047   : > { %v8693_v37 = vadd.f32 %v8677_v43, %v14040_v2  ;;  %v8680_v55 = vmul.f32 0.044715, %v8664_v21  ;;  %v8663_v57 = vmul.f32 %v8647_v11, %v14056_v38  ;;  %v8650_v56 = vmul.f32 %v14063_v18, %v14063_v18 }
0x1048   : > { %10798 = vtanh.f32 %v8707_v26  ;;  %v8710_v53 = vmul.f32 0.7978846, %v8694_v63  ;;  %v14072_v48 = vadd.f32 %v13981_v15, %v8618_v54  ;;  %v10312_v59 = vpop.f32.mrf.mxu1  ;;  %v8733_v39 = vadd.f32 1.0, %v10787_v50 }
0x1049   : > { %v8709_v19 = vmul.f32 0.7978846, %v8693_v37  ;;  %v8696_v6 = vadd.f32 %v8680_v55, %v14048_v46  ;;  %v8679_v30 = vmul.f32 0.044715, %v8663_v57  ;;  %v8666_v31 = vmul.f32 %v8650_v56, %v14063_v18 }
0x104a   : > { %10800 = vtanh.f32 %v8710_v53  ;;  %v8649_v12 = vmul.f32 %v14072_v48, %v14072_v48  ;;  %v14079_v51 = vadd.f32 %v10312_v59, %v13981_v15  ;;  %v8628_v7 = vpop.f32.mrf.mxu1  ;;  %v8749_v0 = vmul.f32 0.5, %v8733_v39  ;;  %v10789_v22 = vpop.eup %10788 }
0x104b   : > { %10802 = vtanh.f32 %v8709_v19  ;;  %v8712_v3 = vmul.f32 0.7978846, %v8696_v6  ;;  %v8695_v35 = vadd.f32 %v8679_v30, %v14056_v38  ;;  %v8682_v10 = vmul.f32 0.044715, %v8666_v31 }
0x104c   : > { %v10791_v34 = vpop.eup %10790  ;;  %v8665_v23 = vmul.f32 %v8649_v12, %v14072_v48  ;;  %v8652_v27 = vmul.f32 %v14079_v51, %v14079_v51  ;;  %v14086_v5 = vadd.f32 %v13981_v15, %v8628_v7  ;;  %v8765_v4 = vmul.f32 %v8749_v0, %v13989_v44 }
0x104d   : > { %10804 = vtanh.f32 %v8712_v3  ;;  %v8711_v8 = vmul.f32 0.7978846, %v8695_v35  ;;  %v8698_v24 = vadd.f32 %v8682_v10, %v14063_v18  ;;  %v8735_v52 = vadd.f32 1.0, %v10791_v34 }
0x104e   : > { %v10793_v42 = vpop.eup %10792  ;;  %v8681_v17 = vmul.f32 0.044715, %v8665_v23  ;;  %v8668_v61 = vmul.f32 %v8652_v27, %v14079_v51  ;;  %v8651_v45 = vmul.f32 %v14086_v5, %v14086_v5  ;;  %10345 = vmatprep.mubr.f32.mxu0 %v8765_v4  ;;  %v8736_v25 = vadd.f32 1.0, %v10789_v22 }
0x104f   : > { %10806 = vtanh.f32 %v8711_v8  ;;  %v8714_v41 = vmul.f32 0.7978846, %v8698_v24  ;;  %10346 = vmatmul.mubr.f32.vlgmr.msra.gmra.mxu0 %v8766_v49  ;;  %v8751_v15 = vmul.f32 0.5, %v8735_v52  ;;  %v8738_v14 = vadd.f32 1.0, %v10793_v42 }
0x1050   : > { %v10795_v44 = vpop.eup %10794  ;;  %v8697_v50 = vadd.f32 %v8681_v17, %v14072_v48  ;;  %v8684_v43 = vmul.f32 0.044715, %v8668_v61  ;;  %v8667_v21 = vmul.f32 %v8651_v45, %v14086_v5  ;;  %v8752_v11 = vmul.f32 0.5, %v8736_v25 }
0x1051   : > { %10808 = vtanh.f32 %v8714_v41  ;;  %v8767_v26 = vmul.f32 %v8751_v15, %v14003_v29  ;;  %v8737_v63 = vadd.f32 1.0, %v10795_v44  ;;  %v8754_v54 = vmul.f32 0.5, %v8738_v14 }
0x1052   : > { %v8713_v37 = vmul.f32 0.7978846, %v8697_v50  ;;  %v8700_v55 = vadd.f32 %v8684_v43, %v14079_v51  ;;  %v8683_v57 = vmul.f32 0.044715, %v8667_v21  ;;  %v8768_v49 = vmul.f32 %v8752_v11, %v13997_v1 }
0x1053   : > { %v10797_v56 = vpop.eup %10796  ;;  %10348 = vmatprep.mubr.f32.mxu0 %v8767_v26  ;;  %v8753_v53 = vmul.f32 0.5, %v8737_v63  ;;  %v8770_v31 = vmul.f32 %v8754_v54, %v14009_v28 }
0x1054   : > { %10810 = vtanh.f32 %v8713_v37  ;;  %v8716_v59 = vmul.f32 0.7978846, %v8700_v55  ;;  %v8699_v39 = vadd.f32 %v8683_v57, %v14086_v5  ;;  %10349 = vmatmul.mubr.f32.gmra.mxu0 %v8768_v49  ;;  %v8740_v19 = vadd.f32 1.0, %v10797_v56 }
0x1055   : > { %v10799_v6 = vpop.eup %10798  ;;  %v8769_v29 = vmul.f32 %v8753_v53, %v14015_v60 }
0x1056   : > { %10812 = vtanh.f32 %v8716_v59  ;;  %v8715_v30 = vmul.f32 0.7978846, %v8699_v39  ;;  %v8739_v12 = vadd.f32 1.0, %v10799_v6  ;;  %v8756_v1 = vmul.f32 0.5, %v8740_v19 }
0x1057   : > { %v10801_v7 = vpop.eup %10800  ;;  %10351 = vmatprep.mubr.f32.mxu0 %v8769_v29 }
0x1058   : > { %v10803_v0 = vpop.eup %10802  ;;  %10814 = vtanh.f32 %v8715_v30  ;;  %10352 = vmatmul.mubr.f32.gmra.mxu0 %v8770_v31  ;;  %v8755_v22 = vmul.f32 0.5, %v8739_v12  ;;  %v8742_v3 = vadd.f32 1.0, %v10801_v7  ;;  %v8772_v23 = vmul.f32 %v8756_v1, %v14022_v40  ;;  %v10824_v1 = vld [vmem:[%s11295_s18 + $0x10] sm:$0xff] }
0x1059   : > { %v8741_v35 = vadd.f32 1.0, %v10803_v0 }
0x105a   : > { %v10805_v10 = vpop.eup %10804  ;;  %v8771_v34 = vmul.f32 %v8755_v22, %v14029_v32  ;;  %v8758_v27 = vmul.f32 0.5, %v8742_v3  ;;  %v10825_v3 = vld [vmem:[%s11295_s18 + $0x20] sm:$0xff] }
0x105b   : > { %v8757_v60 = vmul.f32 0.5, %v8741_v35  ;;  %v8744_v4 = vadd.f32 1.0, %v10805_v10 }
0x105c   : > { %v10807_v8 = vpop.eup %10806  ;;  %10354 = vmatprep.mubr.f32.mxu0 %v8771_v34  ;;  %v8774_v42 = vmul.f32 %v8758_v27, %v14036_v62  ;;  %v10826_v34 = vld [vmem:[%s11295_s18 + $0x30] sm:$0xff] }
0x105d   : > { %10355 = vmatmul.mubr.f32.gmra.mxu0 %v8772_v23  ;;  %v8773_v28 = vmul.f32 %v8757_v60, %v14040_v2  ;;  %v8743_v24 = vadd.f32 1.0, %v10807_v8  ;;  %v8760_v61 = vmul.f32 0.5, %v8744_v4  ;;  %v10828_v8 = vld [vmem:[%s11295_s18 + $0x50] sm:$0xff] }
0x105e   : > { %v10809_v52 = vpop.eup %10808 }
0x105f   : > { %10357 = vmatprep.mubr.f32.mxu0 %v8773_v28  ;;  %v8759_v17 = vmul.f32 0.5, %v8743_v24  ;;  %v8746_v45 = vadd.f32 1.0, %v10809_v52  ;;  %v8776_v15 = vmul.f32 %v8760_v61, %v14048_v46 }
0x1061   : > { %v10811_v25 = vpop.eup %10810  ;;  %10358 = vmatmul.mubr.f32.gmra.mxu0 %v8774_v42  ;;  %v8775_v40 = vmul.f32 %v8759_v17, %v14056_v38  ;;  %v8762_v14 = vmul.f32 0.5, %v8746_v45  ;;  %v10829_v17 = vld [vmem:[%s11295_s18] sm:$0xff] }
0x1062   : > { %v8745_v32 = vadd.f32 1.0, %v10811_v25  ;;  %v10830_v25 = vld [vmem:[%s11295_s18 + $0x60] sm:$0xff] }
0x1063   : > { %v10813_v41 = vpop.eup %10812  ;;  %10360 = vmatprep.mubr.f32.mxu0 %v8775_v40  ;;  %v8778_v21 = vmul.f32 %v8762_v14, %v14063_v18 }
0x1064   : > { %v8761_v44 = vmul.f32 0.5, %v8745_v32  ;;  %v8748_v2 = vadd.f32 1.0, %v10813_v41 }
0x1065   : > { %v10815_v50 = vpop.eup %10814  ;;  %10361 = vmatmul.mubr.f32.gmra.mxu0 %v8776_v15 }
0x1066   : > { %v8777_v43 = vmul.f32 %v8761_v44, %v14072_v48  ;;  %v8747_v62 = vadd.f32 1.0, %v10815_v50  ;;  %v8764_v11 = vmul.f32 0.5, %v8748_v2 }
0x1068   : > { %10363 = vmatprep.mubr.f32.mxu0 %v8777_v43  ;;  %v8763_v26 = vmul.f32 0.5, %v8747_v62  ;;  %v8780_v63 = vmul.f32 %v8764_v11, %v14079_v51  ;;  %v10831_v43 = vld [vmem:[%s11295_s18 + $0x70] sm:$0xff] }
0x1069   : > { %10364 = vmatmul.mubr.f32.gmra.mxu0 %v8778_v21 }
0x106a   : > { %v8779_v38 = vmul.f32 %v8763_v26, %v14086_v5  ;;  %v9387_v5 = vld [vmem:[%s14364_s30] ss:$0 sm:$0xff] }
0x106c   : > { %10366 = vmatprep.mubr.f32.mxu0 %v8779_v38 }
0x106d   : > { %10367 = vmatmul.mubr.f32.gmra.mxu0 %v8780_v63 }
0x110f   : > { %v10347_v46 = vpop.f32.mrf.mxu0 }
0x1111   : > { %v8863_v54 = vpop.f32.mrf.mxu0 }
0x1114   : > { %v10350_v37 = vpop.f32.mrf.mxu0 }
0x1116   : > { %v8872_v55 = vpop.f32.mrf.mxu0 }
0x1117   : > { %v8935_v18 = vadd.f32 %v8872_v55, %v13683_v20  ;;  %v8934_v20 = vadd.f32 %v8863_v54, %v13670_v9  ;;  %v10827_v9 = vld [vmem:[%s11295_s18 + $0x40] sm:$0xff]  ;;  %s8997_s18 = scalar_lea.sflag [#allocation4], %s11246_s12 }
0x1118   : > { %v10353_v57 = vpop.f32.mrf.mxu0 }
0x1119   : > { %v8950_v29 = vadd.f32 %v9387_v5, %v8935_v18  ;;  %v8949_v10 = vadd.f32 %v9387_v5, %v8934_v20 }
0x111a   : > { %v8881_v49 = vpop.f32.mrf.mxu0 }
0x111b   : > { %v8936_v59 = vadd.f32 %v8881_v49, %v13695_v36  ;;  %v8958_v0 = vadd.f32 %v10824_v1, %v8950_v29  ;;  %v8957_v61 = vadd.f32 %v10829_v17, %v8949_v10 }
0x111d   : > { %v10356_v48 = vpop.f32.mrf.mxu0  ;;  %v8951_v30 = vadd.f32 %v9387_v5, %v8936_v59 }
0x111f   : > { %v8890_v56 = vpop.f32.mrf.mxu0  ;;  %v8959_v35 = vadd.f32 %v10825_v3, %v8951_v30 }
0x1120   : > { %v8937_v51 = vadd.f32 %v8890_v56, %v13707_v58 }
0x1121   : > { %v10359_v53 = vpop.f32.mrf.mxu0  ;;  %v8976_v52 = vrot.slane %v8959_v35, 6 }
0x1122   : > { %v8952_v12 = vadd.f32 %v9387_v5, %v8937_v51 }
0x1123   : > { %v8899_v39 = vpop.f32.mrf.mxu0 }
0x1124   : > { %v8938_v19 = vadd.f32 %v8899_v39, %v13719_v33  ;;  %v8960_v23 = vadd.f32 %v10826_v34, %v8952_v12 }
0x1125   : > { %v10362_v6 = vpop.f32.mrf.mxu0 }
0x1126   : > { %v8953_v7 = vadd.f32 %v9387_v5, %v8938_v19  ;;  %v8979_v45 = vrot.slane %v8960_v23, 5 }
0x1127   : > { %v8908_v31 = vpop.f32.mrf.mxu0 }
0x1128   : > { %v8939_v36 = vadd.f32 %v8908_v31, %v13731_v13  ;;  %v8961_v27 = vadd.f32 %v10827_v9, %v8953_v7  ;;  %v8973_v13 = vrot.slane %v8958_v0, 7 }
0x1129   : > { %v10365_v58 = vpop.f32.mrf.mxu0 }
0x112a   : > { %v8954_v22 = vadd.f32 %v9387_v5, %v8939_v36  ;;  %v8982_v32 = vrot.slane %v8961_v27, 4  ;;  %v8975_v41 = vsel %vm8974_vm8, %v8973_v13, %v8957_v61 }
0x112b   : > { %v8917_v33 = vpop.f32.mrf.mxu0  ;;  %v8978_v44 = vsel %vm8977_vm9, %v8976_v52, %v8975_v41 }
0x112c   : > { %v8940_v60 = vadd.f32 %v8917_v33, %v13743_v16  ;;  %v8962_v28 = vadd.f32 %v10828_v8, %v8954_v22  ;;  %v8981_v50 = vsel %vm8980_vm10, %v8979_v45, %v8978_v44 }
0x112d   : > { %v10368_v4 = vpop.f32.mrf.mxu0 }
0x112e   : > { %v8955_v24 = vadd.f32 %v9387_v5, %v8940_v60  ;;  %v8985_v15 = vrot.slane %v8962_v28, 3 }
0x112f   : > { %v8926_v42 = vpop.f32.mrf.mxu0 }
0x1130   : > { %v8963_v40 = vadd.f32 %v10830_v25, %v8955_v24  ;;  %v8941_v16 = vadd.f32 %v8926_v42, %v13754_v47  ;;  %v8984_v47 = vsel %vm8983_vm11, %v8982_v32, %v8981_v50 }
0x1131   : > { %v8987_v21 = vsel %vm8986_vm12, %v8985_v15, %v8984_v47 }
0x1132   : > { %v8956_v14 = vadd.f32 %v9387_v5, %v8941_v16  ;;  %v8988_v2 = vrot.slane %v8963_v40, 2 }
0x1134   : > { %v8964_v62 = vadd.f32 %v10831_v43, %v8956_v14  ;;  %v8990_v26 = vsel %vm8989_vm13, %v8988_v2, %v8987_v21 }
0x1136   : > { %v8991_v11 = vrot.slane %v8964_v62, 1 }
0x1138   : > { %v8993_v38 = vsel %vm8992_vm14, %v8991_v11, %v8990_v26 }
0x1139   : > { %8995 = vst.msk [vmem:[%s598_s26] sm:$0xff] %vm791_vm3, %v8993_v38 }
0x113a   : > { %10951 = shalt.err (!%p10948_p13)
}
0x113b   : > { %s10952_s0 = scalar_lea.hbm %s14136_s8, 128  ;;  %s10956_s16 = scalar_lea.hbm %s14365_s6, 256 }
0x113c   : > { %p10953_p8 = scmp.ne.s32.totalorder %s14136_s8, %s10952_s0  ;;  %p10957_p1 = scmp.lt.s32.totalorder %s14136_s8, %s14365_s6 }
0x113d   : > { %p10958_p2 = scmp.lt.s32.totalorder %s10956_s16, %s10952_s0 }
0x113e   : > { %p10954_p10 = pnand %p10953_p8, %p14366_p12 }
0x113f   : > { %p10959_p4 = por %p10958_p2, %p10957_p1 }
0x1140   : > { %p10955_p11 = pneg %p10954_p10 }
0x1142   : > { %p10960_p6 = pnand %p10959_p4, %p10955_p11 }
0x1144   : > { %10963 = shalt.err (!%p10960_p6)
}
0x1145   : > { %10383 = dma.vmem_to_hbm [thread:$0]  (%p14366_p12), %s9011_s19, 128, %s14136_s8, %s8997_s18  }
0x1146 PF: > { %s14367_s26 = sld [smem:[#allocation15_spill]]  ;;  %p14370_p5 = scmp.ge.s32.totalorder %s11010_s24, 2 }
0x1147   : > { %s14368_s21 = sld [smem:[#allocation17_spill]] }
0x114c   : > { %s9022_s23 = sand.u32 1, %s14367_s26  }
0x114d   : > { %p14369_p0 = scmp.ne.s32.totalorder %s14368_s21, 0  ;;  %s9023_s27 = scalar_lea.sflag [#allocation4], %s9022_s23 }
0x114f   : > { %p10400_p3 = pnand %p14370_p5, %p14369_p0 }
0x1151   : > { %p10401_p7 = pneg %p10400_p3 }
0x1153   : > { %10993 = dma.done.wait (%p10401_p7), %s9023_s27, 128  }
0x1154   : > { %10995 = vsyncadd (%p10401_p7), %s9023_s27, 4294967168  ;;  %s14371_s24 = sld [smem:[#allocation18_spill]]  ;;  %s14374_s21 = smov %s11002_s22 }
0x1155   : > { %s14372_s25 = sld [smem:[#allocation16_spill]] }
0x1156   : > { %s14373_s23 = sld [smem:[#allocation19_spill]] }
0x115a   : > { %p31_p9 = scmp.ge.s32.totalorder %s14371_s24, 4  }
0x115b   : > { %s14375_s22 = smov %s14372_s25 }
0x115c   :  { %33 = sbr.rel (!%p31_p9) target bundleno = 14 (0xe), region = 144 }
0x1161   :  { %9028 = vsyncpa [#allocation3], 1 }
0x1162   :  { %9030 = vsyncpa [#allocation3 + $0x1], 1 }
0x1163   :  { %9031 = vsyncpa [#allocation6], 1 }
0x1164   :  { %9032 = vsyncpa [#allocation9], 1 }
0x1165   :  { %9033 = vsyncpa [#allocation4], 1 }
0x1166   :  { %9035 = vsyncpa [#allocation4 + $0x1], 1 }

</bundles_post_ra>
